<compile_context>
chip_gen: v7x
topology: tpu7x:2x2x1
jax: 0.10.0
libtpu: 0.0.40
codegen_flags: <defaults>
</compile_context>

<pallas_src>
import jax
import jax.numpy as jnp
from jax import lax
from jax.experimental import pallas as pl
from jax.experimental.pallas import tpu as pltpu


def _round_up(x, m):
    return ((x + m - 1) // m) * m


def _choose_chunk(T, cap=32):
    """Largest divisor of T that is <= cap (so the grid tiles T exactly)."""
    for c in range(min(T, cap), 0, -1):
        if T % c == 0:
            return c
    return 1


# ---------------------------------------------------------------------------
# Fused kernel: all LSTM layers over one time chunk, FC on the last step.
# grid = (num_chunks,) over time; h/c for every layer live in VMEM scratch
# across grid steps.  Gate order matches PyTorch: [i, f, g, o].
# ---------------------------------------------------------------------------
def fused_lstm_fc_kernel(x_ref, h0_ref, c0_ref, wih_ref, whh_ref, b_ref,
                         fcw_ref, fcb_ref,
                         out_ref, hT_ref, cT_ref,
                         h_sc, c_sc, seq_sc, gx_sc):
    n = pl.program_id(0)
    num_layers = h0_ref.shape[0]
    Tc, Bp, Dp = x_ref.shape
    Hp = h0_ref.shape[-1]

    @pl.when(n == 0)
    def _():
        h_sc[...] = h0_ref[...]
        c_sc[...] = c0_ref[...]

    # Stage this chunk's layer-0 input; deeper layers overwrite [:, :, :Hp]
    # with their hidden states (stale columns beyond Hp hit zero weight rows).
    seq_sc[...] = x_ref[...]

    for l in range(num_layers):                       # static unroll over layers
        w_hh_l = whh_ref[l]                           # (Hp, 4Hp), loaded once per layer

        # ---- hoisted input projection: one big MXU matmul per (layer, chunk) ----
        x_flat = seq_sc[...].reshape(Tc * Bp, Dp)     # layout-preserving reshape
        gx = (jnp.dot(x_flat, wih_ref[l], preferred_element_type=jnp.float32)
              + b_ref[l])                             # (Tc*Bp, 4Hp)
        gx_sc[...] = gx.reshape(Tc, Bp, 4 * Hp)

        # ---- sequential recurrence: only h @ W_hh + gate math per step ----
        def step(t, carry, l=l, w_hh_l=w_hh_l):
            h, c = carry
            gates = gx_sc[t] + jnp.dot(h, w_hh_l,
                                       preferred_element_type=jnp.float32)
            i_g = jax.nn.sigmoid(gates[:, 0 * Hp:1 * Hp])
            f_g = jax.nn.sigmoid(gates[:, 1 * Hp:2 * Hp])
            g_g = jnp.tanh(gates[:, 2 * Hp:3 * Hp])
            o_g = jax.nn.sigmoid(gates[:, 3 * Hp:4 * Hp])
            c_new = f_g * c + i_g * g_g
            h_new = o_g * jnp.tanh(c_new)
            if l < num_layers - 1:                    # feed the next layer
                if Dp == Hp:
                    seq_sc[t] = h_new
                else:
                    seq_sc[t, :, :Hp] = h_new
            return (h_new, c_new)

        h_l, c_l = lax.fori_loop(0, Tc, step, (h_sc[l], c_sc[l]), unroll=True)
        h_sc[l] = h_l
        c_sc[l] = c_l

    # Final states + fused Linear(hidden -> 1) on out[-1], only on last chunk.
    @pl.when(n == pl.num_programs(0) - 1)
    def _():
        hT_ref[...] = h_sc[...]
        cT_ref[...] = c_sc[...]
        h_last = h_sc[num_layers - 1]                 # (Bp, Hp)
        out_ref[...] = (jnp.dot(h_last, fcw_ref[...],
                                preferred_element_type=jnp.float32)
                        + fcb_ref[...])


# ---------------------------------------------------------------------------
# Parameter packing: pad gates to lane-aligned Hp blocks, stack layers.
# ---------------------------------------------------------------------------
def _pad_gate_cols(w, H, Hp):
    """(..., 4H) gate-ordered [i|f|g|o] -> (..., 4Hp), zero-padding each gate."""
    lead = w.shape[:-1]
    w4 = w.reshape(*lead, 4, H)
    w4 = jnp.pad(w4, [(0, 0)] * len(lead) + [(0, 0), (0, Hp - H)])
    return w4.reshape(*lead, 4 * Hp)


def _pack_params(params, input_dim, hidden_size, num_layers):
    H = hidden_size
    Hp = _round_up(H, 128)
    Dp = max(_round_up(input_dim, 128), Hp)
    wih_l, whh_l, b_l = [], [], []
    for l in range(num_layers):
        w_ih, w_hh, b = params["lstm"][l]             # (d_in,4H), (H,4H), (1,4H)
        d_in = w_ih.shape[0]
        w_ih_p = jnp.pad(_pad_gate_cols(w_ih, H, Hp), ((0, Dp - d_in), (0, 0)))
        w_hh_p = jnp.pad(_pad_gate_cols(w_hh, H, Hp), ((0, Hp - H), (0, 0)))
        b_p = _pad_gate_cols(b, H, Hp)
        wih_l.append(w_ih_p)
        whh_l.append(w_hh_p)
        b_l.append(b_p)
    wih = jnp.stack(wih_l)                            # (L, Dp, 4Hp)
    whh = jnp.stack(whh_l)                            # (L, Hp, 4Hp)
    bb = jnp.stack(b_l)                               # (L, 1, 4Hp)
    fc_w = jnp.pad(params["fc_w"], ((0, Hp - H), (0, 0)))   # (Hp, 1)
    fc_b = params["fc_b"]                             # (1, 1)
    return wih, whh, bb, fc_w, fc_b, Dp, Hp


# ---------------------------------------------------------------------------
# Model wrapper reproducing Lstm_model.forward(x, hn, cn)
# ---------------------------------------------------------------------------
def lstm_model_forward(x, hn, cn, params):
    """x: (T, B, D); hn, cn: (L, B, H). Returns (final_out (B,1), hn, cn)."""
    T, B, D = x.shape
    L, _, H = hn.shape
    wih, whh, bb, fc_w, fc_b, Dp, Hp = _pack_params(params, D, H, L)
    Bp = _round_up(B, 8)
    Tc = _choose_chunk(T)
    num_chunks = T // Tc

    x_p = jnp.pad(x, ((0, 0), (0, Bp - B), (0, Dp - D)))
    h0_p = jnp.pad(hn, ((0, 0), (0, Bp - B), (0, Hp - H)))
    c0_p = jnp.pad(cn, ((0, 0), (0, Bp - B), (0, Hp - H)))

    out_p, hT_p, cT_p = pl.pallas_call(
        fused_lstm_fc_kernel,
        out_shape=(
            jax.ShapeDtypeStruct((Bp, 1), jnp.float32),
            jax.ShapeDtypeStruct((L, Bp, Hp), jnp.float32),
            jax.ShapeDtypeStruct((L, Bp, Hp), jnp.float32),
        ),
        grid_spec=pltpu.PrefetchScalarGridSpec(
            num_scalar_prefetch=0,
            grid=(num_chunks,),
            in_specs=[
                pl.BlockSpec((Tc, Bp, Dp), lambda n: (n, 0, 0)),        # x chunk
                pl.BlockSpec((L, Bp, Hp), lambda n: (0, 0, 0)),         # h0
                pl.BlockSpec((L, Bp, Hp), lambda n: (0, 0, 0)),         # c0
                pl.BlockSpec((L, Dp, 4 * Hp), lambda n: (0, 0, 0)),     # W_ih
                pl.BlockSpec((L, Hp, 4 * Hp), lambda n: (0, 0, 0)),     # W_hh
                pl.BlockSpec((L, 1, 4 * Hp), lambda n: (0, 0, 0)),      # bias
                pl.BlockSpec((Hp, 1), lambda n: (0, 0)),                # fc_w
                pl.BlockSpec((1, 1), lambda n: (0, 0)),                 # fc_b
            ],
            out_specs=[
                pl.BlockSpec((Bp, 1), lambda n: (0, 0)),
                pl.BlockSpec((L, Bp, Hp), lambda n: (0, 0, 0)),
                pl.BlockSpec((L, Bp, Hp), lambda n: (0, 0, 0)),
            ],
            scratch_shapes=[
                pltpu.VMEM((L, Bp, Hp), jnp.float32),        # h state per layer
                pltpu.VMEM((L, Bp, Hp), jnp.float32),        # c state per layer
                pltpu.VMEM((Tc, Bp, Dp), jnp.float32),       # inter-layer activations
                pltpu.VMEM((Tc, Bp, 4 * Hp), jnp.float32),   # hoisted input projection
            ],
        ),
        compiler_params=pltpu.CompilerParams(
            dimension_semantics=("arbitrary",)),   # sequential time recurrence
    )(x_p, h0_p, c0_p, wih, whh, bb, fc_w, fc_b)

    return out_p[:B], hT_p[:, :B, :H], cT_p[:, :B, :H]


def init_params(key, input_dim, hidden_size, num_layers):
    params = {"lstm": []}
    for l in range(num_layers):
        d_in = input_dim if l == 0 else hidden_size
        key, k1, k2, k3, k4 = jax.random.split(key, 5)
        w_ih = jax.random.normal(k1, (d_in, 4 * hidden_size), jnp.float32) * 0.1
        w_hh = jax.random.normal(k2, (hidden_size, 4 * hidden_size), jnp.float32) * 0.1
        # b = b_ih + b_hh (PyTorch keeps them separate; the sum is equivalent).
        b = (jax.random.normal(k3, (1, 4 * hidden_size), jnp.float32) * 0.1
             + jax.random.normal(k4, (1, 4 * hidden_size), jnp.float32) * 0.1)
        params["lstm"].append((w_ih, w_hh, b))
    key, k5, k6 = jax.random.split(key, 3)
    params["fc_w"] = jax.random.normal(k5, (hidden_size, 1), jnp.float32) * 0.1
    params["fc_b"] = jax.random.normal(k6, (1, 1), jnp.float32) * 0.1
    return params


if __name__ == "__main__":
    input_dim = 8
    hidden_size = 32
    num_layers = 2
    batch_size = 4
    seq_len = 8

    key = jax.random.PRNGKey(0)
    key, kx = jax.random.split(key)
    x = jax.random.normal(kx, (seq_len, batch_size, input_dim), jnp.float32)
    hn = jnp.zeros((num_layers, batch_size, hidden_size), jnp.float32)
    cn = jnp.zeros((num_layers, batch_size, hidden_size), jnp.float32)

    params = init_params(key, input_dim, hidden_size, num_layers)

    final_out, hn_out, cn_out = lstm_model_forward(x, hn, cn, params)
    jax.block_until_ready((final_out, hn_out, cn_out))

    assert final_out.shape == (batch_size, 1)
    assert hn_out.shape == (num_layers, batch_size, hidden_size)
    assert cn_out.shape == (num_layers, batch_size, hidden_size)
    assert bool(jnp.all(jnp.isfinite(final_out)))
    print("KERNEL_OK")
</pallas_src>

<mosaic_0001>
module attributes {stable_mosaic.version = 11 : i64} {
  func.func @fused_lstm_fc_kernel(%arg0: i32, %arg1: memref<8x8x128xf32, #tpu.memory_space<vmem>>, %arg2: memref<2x8x128xf32, #tpu.memory_space<vmem>>, %arg3: memref<2x8x128xf32, #tpu.memory_space<vmem>>, %arg4: memref<2x128x512xf32, #tpu.memory_space<vmem>>, %arg5: memref<2x128x512xf32, #tpu.memory_space<vmem>>, %arg6: memref<2x1x512xf32, #tpu.memory_space<vmem>>, %arg7: memref<128x1xf32, #tpu.memory_space<vmem>>, %arg8: memref<1x1xf32, #tpu.memory_space<vmem>>, %arg9: memref<8x1xf32, #tpu.memory_space<vmem>>, %arg10: memref<2x8x128xf32, #tpu.memory_space<vmem>>, %arg11: memref<2x8x128xf32, #tpu.memory_space<vmem>>, %arg12: memref<2x8x128xf32, #tpu.memory_space<vmem>>, %arg13: memref<2x8x128xf32, #tpu.memory_space<vmem>>, %arg14: memref<8x8x128xf32, #tpu.memory_space<vmem>>, %arg15: memref<8x8x512xf32, #tpu.memory_space<vmem>>) attributes {dimension_semantics = [#tpu.dimension_semantics<arbitrary>], iteration_bounds = array<i64: 1>, scalar_prefetch = 0 : i64, scratch_operands = 4 : i64, tpu.core_type = #tpu.core_type<tc>, window_params = [{transform_indices = @transform_0, window_bounds = array<i64: 8, 8, 128>}, {pipeline_mode = #tpu.pipeline_mode<synchronous>, transform_indices = @transform_1, window_bounds = array<i64: 2, 8, 128>}, {pipeline_mode = #tpu.pipeline_mode<synchronous>, transform_indices = @transform_2, window_bounds = array<i64: 2, 8, 128>}, {pipeline_mode = #tpu.pipeline_mode<synchronous>, transform_indices = @transform_3, window_bounds = array<i64: 2, 128, 512>}, {pipeline_mode = #tpu.pipeline_mode<synchronous>, transform_indices = @transform_4, window_bounds = array<i64: 2, 128, 512>}, {pipeline_mode = #tpu.pipeline_mode<synchronous>, transform_indices = @transform_5, window_bounds = array<i64: 2, 1, 512>}, {pipeline_mode = #tpu.pipeline_mode<synchronous>, transform_indices = @transform_6, window_bounds = array<i64: 128, 1>}, {pipeline_mode = #tpu.pipeline_mode<synchronous>, transform_indices = @transform_7, window_bounds = array<i64: 1, 1>}, {pipeline_mode = #tpu.pipeline_mode<synchronous>, transform_indices = @transform_8, window_bounds = array<i64: 8, 1>}, {pipeline_mode = #tpu.pipeline_mode<synchronous>, transform_indices = @transform_9, window_bounds = array<i64: 2, 8, 128>}, {pipeline_mode = #tpu.pipeline_mode<synchronous>, transform_indices = @transform_10, window_bounds = array<i64: 2, 8, 128>}]} {
    %c0_i32 = arith.constant 0 : i32
    %0 = arith.cmpi eq, %arg0, %c0_i32 : i32
    %1 = arith.extui %0 : i1 to i32
    %c0_i32_0 = arith.constant 0 : i32
    %2 = arith.cmpi ne, %1, %c0_i32_0 : i32
    scf.if %2 {
      %c0_184 = arith.constant 0 : index
      %c0_185 = arith.constant 0 : index
      %c0_186 = arith.constant 0 : index
      %566 = vector.load %arg2[%c0_184, %c0_185, %c0_186] : memref<2x8x128xf32, #tpu.memory_space<vmem>>, vector<2x8x128xf32>
      %c0_187 = arith.constant 0 : index
      %c0_188 = arith.constant 0 : index
      %c0_189 = arith.constant 0 : index
      %567 = vector.load %arg12[%c0_187, %c0_188, %c0_189] : memref<2x8x128xf32, #tpu.memory_space<vmem>>, vector<2x8x128xf32>
      tpu.vector_store %arg12[%c0_187, %c0_188, %c0_189], %566 {strides = array<i32>} : memref<2x8x128xf32, #tpu.memory_space<vmem>>, vector<2x8x128xf32>,
      %c0_190 = arith.constant 0 : index
      %c0_191 = arith.constant 0 : index
      %c0_192 = arith.constant 0 : index
      %568 = vector.load %arg3[%c0_190, %c0_191, %c0_192] : memref<2x8x128xf32, #tpu.memory_space<vmem>>, vector<2x8x128xf32>
      %c0_193 = arith.constant 0 : index
      %c0_194 = arith.constant 0 : index
      %c0_195 = arith.constant 0 : index
      %569 = vector.load %arg13[%c0_193, %c0_194, %c0_195] : memref<2x8x128xf32, #tpu.memory_space<vmem>>, vector<2x8x128xf32>
      tpu.vector_store %arg13[%c0_193, %c0_194, %c0_195], %568 {strides = array<i32>} : memref<2x8x128xf32, #tpu.memory_space<vmem>>, vector<2x8x128xf32>,
    } else {
    }
    %c0 = arith.constant 0 : index
    %c0_1 = arith.constant 0 : index
    %c0_2 = arith.constant 0 : index
    %3 = vector.load %arg1[%c0, %c0_1, %c0_2] : memref<8x8x128xf32, #tpu.memory_space<vmem>>, vector<8x8x128xf32>
    %c0_3 = arith.constant 0 : index
    %c0_4 = arith.constant 0 : index
    %c0_5 = arith.constant 0 : index
    %4 = vector.load %arg14[%c0_3, %c0_4, %c0_5] : memref<8x8x128xf32, #tpu.memory_space<vmem>>, vector<8x8x128xf32>
    tpu.vector_store %arg14[%c0_3, %c0_4, %c0_5], %3 {strides = array<i32>} : memref<8x8x128xf32, #tpu.memory_space<vmem>>, vector<8x8x128xf32>,
    %c0_6 = arith.constant 0 : index
    %c0_7 = arith.constant 0 : index
    %c0_8 = arith.constant 0 : index
    %5 = vector.load %arg5[%c0_6, %c0_7, %c0_8] : memref<2x128x512xf32, #tpu.memory_space<vmem>>, vector<1x128x512xf32>
    %6 = vector.shape_cast %5 : vector<1x128x512xf32> to vector<128x512xf32>
    %c0_9 = arith.constant 0 : index
    %c0_10 = arith.constant 0 : index
    %c0_11 = arith.constant 0 : index
    %7 = vector.load %arg14[%c0_9, %c0_10, %c0_11] : memref<8x8x128xf32, #tpu.memory_space<vmem>>, vector<8x8x128xf32>
    %8 = vector.shape_cast %7 : vector<8x8x128xf32> to vector<64x128xf32>
    %c0_12 = arith.constant 0 : index
    %c0_13 = arith.constant 0 : index
    %c0_14 = arith.constant 0 : index
    %9 = vector.load %arg4[%c0_12, %c0_13, %c0_14] : memref<2x128x512xf32, #tpu.memory_space<vmem>>, vector<1x128x512xf32>
    %10 = vector.shape_cast %9 : vector<1x128x512xf32> to vector<128x512xf32>
    %cst = arith.constant dense<0.000000e+00> : vector<64x512xf32>
    %11 = tpu.matmul %8, %10, %cst {dimension_numbers = #tpu.dot_dimension_numbers<[1], [0], [0], [1], [0, 0, 1, 1], [], []>} : vector<64x128xf32>, vector<128x512xf32>, vector<64x512xf32> -> vector<64x512xf32>
    %c0_15 = arith.constant 0 : index
    %c0_16 = arith.constant 0 : index
    %c0_17 = arith.constant 0 : index
    %12 = vector.load %arg6[%c0_15, %c0_16, %c0_17] : memref<2x1x512xf32, #tpu.memory_space<vmem>>, vector<1x1x512xf32>
    %13 = vector.shape_cast %12 : vector<1x1x512xf32> to vector<1x512xf32>
    %14 = vector.broadcast %13 : vector<1x512xf32> to vector<64x512xf32>
    %15 = arith.addf %11, %14 : vector<64x512xf32>
    %16 = vector.shape_cast %15 : vector<64x512xf32> to vector<8x8x512xf32>
    %c0_18 = arith.constant 0 : index
    %c0_19 = arith.constant 0 : index
    %c0_20 = arith.constant 0 : index
    %17 = vector.load %arg15[%c0_18, %c0_19, %c0_20] : memref<8x8x512xf32, #tpu.memory_space<vmem>>, vector<8x8x512xf32>
    tpu.vector_store %arg15[%c0_18, %c0_19, %c0_20], %16 {strides = array<i32>} : memref<8x8x512xf32, #tpu.memory_space<vmem>>, vector<8x8x512xf32>,
    %c0_21 = arith.constant 0 : index
    %c0_22 = arith.constant 0 : index
    %c0_23 = arith.constant 0 : index
    %18 = vector.load %arg12[%c0_21, %c0_22, %c0_23] : memref<2x8x128xf32, #tpu.memory_space<vmem>>, vector<1x8x128xf32>
    %19 = vector.shape_cast %18 : vector<1x8x128xf32> to vector<8x128xf32>
    %c0_24 = arith.constant 0 : index
    %c0_25 = arith.constant 0 : index
    %c0_26 = arith.constant 0 : index
    %20 = vector.load %arg13[%c0_24, %c0_25, %c0_26] : memref<2x8x128xf32, #tpu.memory_space<vmem>>, vector<1x8x128xf32>
    %21 = vector.shape_cast %20 : vector<1x8x128xf32> to vector<8x128xf32>
    %c0_i32_27 = arith.constant 0 : i32
    %22 = arith.index_cast %c0_i32_27 : i32 to index
    %c0_28 = arith.constant 0 : index
    %c0_29 = arith.constant 0 : index
    %23 = vector.load %arg15[%22, %c0_28, %c0_29] : memref<8x8x512xf32, #tpu.memory_space<vmem>>, vector<1x8x512xf32>
    %24 = vector.shape_cast %23 : vector<1x8x512xf32> to vector<8x512xf32>
    %cst_30 = arith.constant dense<0.000000e+00> : vector<8x512xf32>
    %25 = tpu.matmul %19, %6, %cst_30 {dimension_numbers = #tpu.dot_dimension_numbers<[1], [0], [0], [1], [0, 0, 1, 1], [], []>} : vector<8x128xf32>, vector<128x512xf32>, vector<8x512xf32> -> vector<8x512xf32>
    %26 = arith.addf %24, %25 : vector<8x512xf32>
    %27 = vector.extract_strided_slice %26 {offsets = [0, 0], sizes = [8, 128], strides = [1, 1]} : vector<8x512xf32> to vector<8x128xf32>
    %28 = arith.negf %27 : vector<8x128xf32>
    %29 = math.exp %28 : vector<8x128xf32>
    %cst_31 = arith.constant 1.000000e+00 : f32
    %30 = vector.broadcast %cst_31 : f32 to vector<8x128xf32>
    %31 = arith.addf %30, %29 : vector<8x128xf32>
    %32 = arith.divf %30, %31 : vector<8x128xf32>
    %33 = vector.extract_strided_slice %26 {offsets = [0, 128], sizes = [8, 128], strides = [1, 1]} : vector<8x512xf32> to vector<8x128xf32>
    %34 = arith.negf %33 : vector<8x128xf32>
    %35 = math.exp %34 : vector<8x128xf32>
    %cst_32 = arith.constant 1.000000e+00 : f32
    %36 = vector.broadcast %cst_32 : f32 to vector<8x128xf32>
    %37 = arith.addf %36, %35 : vector<8x128xf32>
    %38 = arith.divf %36, %37 : vector<8x128xf32>
    %39 = vector.extract_strided_slice %26 {offsets = [0, 256], sizes = [8, 128], strides = [1, 1]} : vector<8x512xf32> to vector<8x128xf32>
    %40 = math.tanh %39 : vector<8x128xf32>
    %41 = vector.extract_strided_slice %26 {offsets = [0, 384], sizes = [8, 128], strides = [1, 1]} : vector<8x512xf32> to vector<8x128xf32>
    %42 = arith.negf %41 : vector<8x128xf32>
    %43 = math.exp %42 : vector<8x128xf32>
    %cst_33 = arith.constant 1.000000e+00 : f32
    %44 = vector.broadcast %cst_33 : f32 to vector<8x128xf32>
    %45 = arith.addf %44, %43 : vector<8x128xf32>
    %46 = arith.divf %44, %45 : vector<8x128xf32>
    %47 = arith.mulf %38, %21 : vector<8x128xf32>
    %48 = arith.mulf %32, %40 : vector<8x128xf32>
    %49 = arith.addf %47, %48 : vector<8x128xf32>
    %50 = math.tanh %49 : vector<8x128xf32>
    %51 = arith.mulf %46, %50 : vector<8x128xf32>
    %52 = arith.index_cast %c0_i32_27 : i32 to index
    %c0_34 = arith.constant 0 : index
    %c0_35 = arith.constant 0 : index
    %53 = vector.load %arg14[%52, %c0_34, %c0_35] : memref<8x8x128xf32, #tpu.memory_space<vmem>>, vector<1x8x128xf32>
    %54 = vector.shape_cast %53 : vector<1x8x128xf32> to vector<8x128xf32>
    %55 = vector.shape_cast %51 : vector<8x128xf32> to vector<1x8x128xf32>
    tpu.vector_store %arg14[%52, %c0_34, %c0_35], %55 {strides = array<i32>} : memref<8x8x128xf32, #tpu.memory_space<vmem>>, vector<1x8x128xf32>,
    %c1_i32 = arith.constant 1 : i32
    %56 = arith.index_cast %c1_i32 : i32 to index
    %c0_36 = arith.constant 0 : index
    %c0_37 = arith.constant 0 : index
    %57 = vector.load %arg15[%56, %c0_36, %c0_37] : memref<8x8x512xf32, #tpu.memory_space<vmem>>, vector<1x8x512xf32>
    %58 = vector.shape_cast %57 : vector<1x8x512xf32> to vector<8x512xf32>
    %cst_38 = arith.constant dense<0.000000e+00> : vector<8x512xf32>
    %59 = tpu.matmul %51, %6, %cst_38 {dimension_numbers = #tpu.dot_dimension_numbers<[1], [0], [0], [1], [0, 0, 1, 1], [], []>} : vector<8x128xf32>, vector<128x512xf32>, vector<8x512xf32> -> vector<8x512xf32>
    %60 = arith.addf %58, %59 : vector<8x512xf32>
    %61 = vector.extract_strided_slice %60 {offsets = [0, 0], sizes = [8, 128], strides = [1, 1]} : vector<8x512xf32> to vector<8x128xf32>
    %62 = arith.negf %61 : vector<8x128xf32>
    %63 = math.exp %62 : vector<8x128xf32>
    %cst_39 = arith.constant 1.000000e+00 : f32
    %64 = vector.broadcast %cst_39 : f32 to vector<8x128xf32>
    %65 = arith.addf %64, %63 : vector<8x128xf32>
    %66 = arith.divf %64, %65 : vector<8x128xf32>
    %67 = vector.extract_strided_slice %60 {offsets = [0, 128], sizes = [8, 128], strides = [1, 1]} : vector<8x512xf32> to vector<8x128xf32>
    %68 = arith.negf %67 : vector<8x128xf32>
    %69 = math.exp %68 : vector<8x128xf32>
    %cst_40 = arith.constant 1.000000e+00 : f32
    %70 = vector.broadcast %cst_40 : f32 to vector<8x128xf32>
    %71 = arith.addf %70, %69 : vector<8x128xf32>
    %72 = arith.divf %70, %71 : vector<8x128xf32>
    %73 = vector.extract_strided_slice %60 {offsets = [0, 256], sizes = [8, 128], strides = [1, 1]} : vector<8x512xf32> to vector<8x128xf32>
    %74 = math.tanh %73 : vector<8x128xf32>
    %75 = vector.extract_strided_slice %60 {offsets = [0, 384], sizes = [8, 128], strides = [1, 1]} : vector<8x512xf32> to vector<8x128xf32>
    %76 = arith.negf %75 : vector<8x128xf32>
    %77 = math.exp %76 : vector<8x128xf32>
    %cst_41 = arith.constant 1.000000e+00 : f32
    %78 = vector.broadcast %cst_41 : f32 to vector<8x128xf32>
    %79 = arith.addf %78, %77 : vector<8x128xf32>
    %80 = arith.divf %78, %79 : vector<8x128xf32>
    %81 = arith.mulf %72, %49 : vector<8x128xf32>
    %82 = arith.mulf %66, %74 : vector<8x128xf32>
    %83 = arith.addf %81, %82 : vector<8x128xf32>
    %84 = math.tanh %83 : vector<8x128xf32>
    %85 = arith.mulf %80, %84 : vector<8x128xf32>
    %86 = arith.index_cast %c1_i32 : i32 to index
    %c0_42 = arith.constant 0 : index
    %c0_43 = arith.constant 0 : index
    %87 = vector.load %arg14[%86, %c0_42, %c0_43] : memref<8x8x128xf32, #tpu.memory_space<vmem>>, vector<1x8x128xf32>
    %88 = vector.shape_cast %87 : vector<1x8x128xf32> to vector<8x128xf32>
    %89 = vector.shape_cast %85 : vector<8x128xf32> to vector<1x8x128xf32>
    tpu.vector_store %arg14[%86, %c0_42, %c0_43], %89 {strides = array<i32>} : memref<8x8x128xf32, #tpu.memory_space<vmem>>, vector<1x8x128xf32>,
    %c2_i32 = arith.constant 2 : i32
    %90 = arith.index_cast %c2_i32 : i32 to index
    %c0_44 = arith.constant 0 : index
    %c0_45 = arith.constant 0 : index
    %91 = vector.load %arg15[%90, %c0_44, %c0_45] : memref<8x8x512xf32, #tpu.memory_space<vmem>>, vector<1x8x512xf32>
    %92 = vector.shape_cast %91 : vector<1x8x512xf32> to vector<8x512xf32>
    %cst_46 = arith.constant dense<0.000000e+00> : vector<8x512xf32>
    %93 = tpu.matmul %85, %6, %cst_46 {dimension_numbers = #tpu.dot_dimension_numbers<[1], [0], [0], [1], [0, 0, 1, 1], [], []>} : vector<8x128xf32>, vector<128x512xf32>, vector<8x512xf32> -> vector<8x512xf32>
    %94 = arith.addf %92, %93 : vector<8x512xf32>
    %95 = vector.extract_strided_slice %94 {offsets = [0, 0], sizes = [8, 128], strides = [1, 1]} : vector<8x512xf32> to vector<8x128xf32>
    %96 = arith.negf %95 : vector<8x128xf32>
    %97 = math.exp %96 : vector<8x128xf32>
    %cst_47 = arith.constant 1.000000e+00 : f32
    %98 = vector.broadcast %cst_47 : f32 to vector<8x128xf32>
    %99 = arith.addf %98, %97 : vector<8x128xf32>
    %100 = arith.divf %98, %99 : vector<8x128xf32>
    %101 = vector.extract_strided_slice %94 {offsets = [0, 128], sizes = [8, 128], strides = [1, 1]} : vector<8x512xf32> to vector<8x128xf32>
    %102 = arith.negf %101 : vector<8x128xf32>
    %103 = math.exp %102 : vector<8x128xf32>
    %cst_48 = arith.constant 1.000000e+00 : f32
    %104 = vector.broadcast %cst_48 : f32 to vector<8x128xf32>
    %105 = arith.addf %104, %103 : vector<8x128xf32>
    %106 = arith.divf %104, %105 : vector<8x128xf32>
    %107 = vector.extract_strided_slice %94 {offsets = [0, 256], sizes = [8, 128], strides = [1, 1]} : vector<8x512xf32> to vector<8x128xf32>
    %108 = math.tanh %107 : vector<8x128xf32>
    %109 = vector.extract_strided_slice %94 {offsets = [0, 384], sizes = [8, 128], strides = [1, 1]} : vector<8x512xf32> to vector<8x128xf32>
    %110 = arith.negf %109 : vector<8x128xf32>
    %111 = math.exp %110 : vector<8x128xf32>
    %cst_49 = arith.constant 1.000000e+00 : f32
    %112 = vector.broadcast %cst_49 : f32 to vector<8x128xf32>
    %113 = arith.addf %112, %111 : vector<8x128xf32>
    %114 = arith.divf %112, %113 : vector<8x128xf32>
    %115 = arith.mulf %106, %83 : vector<8x128xf32>
    %116 = arith.mulf %100, %108 : vector<8x128xf32>
    %117 = arith.addf %115, %116 : vector<8x128xf32>
    %118 = math.tanh %117 : vector<8x128xf32>
    %119 = arith.mulf %114, %118 : vector<8x128xf32>
    %120 = arith.index_cast %c2_i32 : i32 to index
    %c0_50 = arith.constant 0 : index
    %c0_51 = arith.constant 0 : index
    %121 = vector.load %arg14[%120, %c0_50, %c0_51] : memref<8x8x128xf32, #tpu.memory_space<vmem>>, vector<1x8x128xf32>
    %122 = vector.shape_cast %121 : vector<1x8x128xf32> to vector<8x128xf32>
    %123 = vector.shape_cast %119 : vector<8x128xf32> to vector<1x8x128xf32>
    tpu.vector_store %arg14[%120, %c0_50, %c0_51], %123 {strides = array<i32>} : memref<8x8x128xf32, #tpu.memory_space<vmem>>, vector<1x8x128xf32>,
    %c3_i32 = arith.constant 3 : i32
    %124 = arith.index_cast %c3_i32 : i32 to index
    %c0_52 = arith.constant 0 : index
    %c0_53 = arith.constant 0 : index
    %125 = vector.load %arg15[%124, %c0_52, %c0_53] : memref<8x8x512xf32, #tpu.memory_space<vmem>>, vector<1x8x512xf32>
    %126 = vector.shape_cast %125 : vector<1x8x512xf32> to vector<8x512xf32>
    %cst_54 = arith.constant dense<0.000000e+00> : vector<8x512xf32>
    %127 = tpu.matmul %119, %6, %cst_54 {dimension_numbers = #tpu.dot_dimension_numbers<[1], [0], [0], [1], [0, 0, 1, 1], [], []>} : vector<8x128xf32>, vector<128x512xf32>, vector<8x512xf32> -> vector<8x512xf32>
    %128 = arith.addf %126, %127 : vector<8x512xf32>
    %129 = vector.extract_strided_slice %128 {offsets = [0, 0], sizes = [8, 128], strides = [1, 1]} : vector<8x512xf32> to vector<8x128xf32>
    %130 = arith.negf %129 : vector<8x128xf32>
    %131 = math.exp %130 : vector<8x128xf32>
    %cst_55 = arith.constant 1.000000e+00 : f32
    %132 = vector.broadcast %cst_55 : f32 to vector<8x128xf32>
    %133 = arith.addf %132, %131 : vector<8x128xf32>
    %134 = arith.divf %132, %133 : vector<8x128xf32>
    %135 = vector.extract_strided_slice %128 {offsets = [0, 128], sizes = [8, 128], strides = [1, 1]} : vector<8x512xf32> to vector<8x128xf32>
    %136 = arith.negf %135 : vector<8x128xf32>
    %137 = math.exp %136 : vector<8x128xf32>
    %cst_56 = arith.constant 1.000000e+00 : f32
    %138 = vector.broadcast %cst_56 : f32 to vector<8x128xf32>
    %139 = arith.addf %138, %137 : vector<8x128xf32>
    %140 = arith.divf %138, %139 : vector<8x128xf32>
    %141 = vector.extract_strided_slice %128 {offsets = [0, 256], sizes = [8, 128], strides = [1, 1]} : vector<8x512xf32> to vector<8x128xf32>
    %142 = math.tanh %141 : vector<8x128xf32>
    %143 = vector.extract_strided_slice %128 {offsets = [0, 384], sizes = [8, 128], strides = [1, 1]} : vector<8x512xf32> to vector<8x128xf32>
    %144 = arith.negf %143 : vector<8x128xf32>
    %145 = math.exp %144 : vector<8x128xf32>
    %cst_57 = arith.constant 1.000000e+00 : f32
    %146 = vector.broadcast %cst_57 : f32 to vector<8x128xf32>
    %147 = arith.addf %146, %145 : vector<8x128xf32>
    %148 = arith.divf %146, %147 : vector<8x128xf32>
    %149 = arith.mulf %140, %117 : vector<8x128xf32>
    %150 = arith.mulf %134, %142 : vector<8x128xf32>
    %151 = arith.addf %149, %150 : vector<8x128xf32>
    %152 = math.tanh %151 : vector<8x128xf32>
    %153 = arith.mulf %148, %152 : vector<8x128xf32>
    %154 = arith.index_cast %c3_i32 : i32 to index
    %c0_58 = arith.constant 0 : index
    %c0_59 = arith.constant 0 : index
    %155 = vector.load %arg14[%154, %c0_58, %c0_59] : memref<8x8x128xf32, #tpu.memory_space<vmem>>, vector<1x8x128xf32>
    %156 = vector.shape_cast %155 : vector<1x8x128xf32> to vector<8x128xf32>
    %157 = vector.shape_cast %153 : vector<8x128xf32> to vector<1x8x128xf32>
    tpu.vector_store %arg14[%154, %c0_58, %c0_59], %157 {strides = array<i32>} : memref<8x8x128xf32, #tpu.memory_space<vmem>>, vector<1x8x128xf32>,
    %c4_i32 = arith.constant 4 : i32
    %158 = arith.index_cast %c4_i32 : i32 to index
    %c0_60 = arith.constant 0 : index
    %c0_61 = arith.constant 0 : index
    %159 = vector.load %arg15[%158, %c0_60, %c0_61] : memref<8x8x512xf32, #tpu.memory_space<vmem>>, vector<1x8x512xf32>
    %160 = vector.shape_cast %159 : vector<1x8x512xf32> to vector<8x512xf32>
    %cst_62 = arith.constant dense<0.000000e+00> : vector<8x512xf32>
    %161 = tpu.matmul %153, %6, %cst_62 {dimension_numbers = #tpu.dot_dimension_numbers<[1], [0], [0], [1], [0, 0, 1, 1], [], []>} : vector<8x128xf32>, vector<128x512xf32>, vector<8x512xf32> -> vector<8x512xf32>
    %162 = arith.addf %160, %161 : vector<8x512xf32>
    %163 = vector.extract_strided_slice %162 {offsets = [0, 0], sizes = [8, 128], strides = [1, 1]} : vector<8x512xf32> to vector<8x128xf32>
    %164 = arith.negf %163 : vector<8x128xf32>
    %165 = math.exp %164 : vector<8x128xf32>
    %cst_63 = arith.constant 1.000000e+00 : f32
    %166 = vector.broadcast %cst_63 : f32 to vector<8x128xf32>
    %167 = arith.addf %166, %165 : vector<8x128xf32>
    %168 = arith.divf %166, %167 : vector<8x128xf32>
    %169 = vector.extract_strided_slice %162 {offsets = [0, 128], sizes = [8, 128], strides = [1, 1]} : vector<8x512xf32> to vector<8x128xf32>
    %170 = arith.negf %169 : vector<8x128xf32>
    %171 = math.exp %170 : vector<8x128xf32>
    %cst_64 = arith.constant 1.000000e+00 : f32
    %172 = vector.broadcast %cst_64 : f32 to vector<8x128xf32>
    %173 = arith.addf %172, %171 : vector<8x128xf32>
    %174 = arith.divf %172, %173 : vector<8x128xf32>
    %175 = vector.extract_strided_slice %162 {offsets = [0, 256], sizes = [8, 128], strides = [1, 1]} : vector<8x512xf32> to vector<8x128xf32>
    %176 = math.tanh %175 : vector<8x128xf32>
    %177 = vector.extract_strided_slice %162 {offsets = [0, 384], sizes = [8, 128], strides = [1, 1]} : vector<8x512xf32> to vector<8x128xf32>
    %178 = arith.negf %177 : vector<8x128xf32>
    %179 = math.exp %178 : vector<8x128xf32>
    %cst_65 = arith.constant 1.000000e+00 : f32
    %180 = vector.broadcast %cst_65 : f32 to vector<8x128xf32>
    %181 = arith.addf %180, %179 : vector<8x128xf32>
    %182 = arith.divf %180, %181 : vector<8x128xf32>
    %183 = arith.mulf %174, %151 : vector<8x128xf32>
    %184 = arith.mulf %168, %176 : vector<8x128xf32>
    %185 = arith.addf %183, %184 : vector<8x128xf32>
    %186 = math.tanh %185 : vector<8x128xf32>
    %187 = arith.mulf %182, %186 : vector<8x128xf32>
    %188 = arith.index_cast %c4_i32 : i32 to index
    %c0_66 = arith.constant 0 : index
    %c0_67 = arith.constant 0 : index
    %189 = vector.load %arg14[%188, %c0_66, %c0_67] : memref<8x8x128xf32, #tpu.memory_space<vmem>>, vector<1x8x128xf32>
    %190 = vector.shape_cast %189 : vector<1x8x128xf32> to vector<8x128xf32>
    %191 = vector.shape_cast %187 : vector<8x128xf32> to vector<1x8x128xf32>
    tpu.vector_store %arg14[%188, %c0_66, %c0_67], %191 {strides = array<i32>} : memref<8x8x128xf32, #tpu.memory_space<vmem>>, vector<1x8x128xf32>,
    %c5_i32 = arith.constant 5 : i32
    %192 = arith.index_cast %c5_i32 : i32 to index
    %c0_68 = arith.constant 0 : index
    %c0_69 = arith.constant 0 : index
    %193 = vector.load %arg15[%192, %c0_68, %c0_69] : memref<8x8x512xf32, #tpu.memory_space<vmem>>, vector<1x8x512xf32>
    %194 = vector.shape_cast %193 : vector<1x8x512xf32> to vector<8x512xf32>
    %cst_70 = arith.constant dense<0.000000e+00> : vector<8x512xf32>
    %195 = tpu.matmul %187, %6, %cst_70 {dimension_numbers = #tpu.dot_dimension_numbers<[1], [0], [0], [1], [0, 0, 1, 1], [], []>} : vector<8x128xf32>, vector<128x512xf32>, vector<8x512xf32> -> vector<8x512xf32>
    %196 = arith.addf %194, %195 : vector<8x512xf32>
    %197 = vector.extract_strided_slice %196 {offsets = [0, 0], sizes = [8, 128], strides = [1, 1]} : vector<8x512xf32> to vector<8x128xf32>
    %198 = arith.negf %197 : vector<8x128xf32>
    %199 = math.exp %198 : vector<8x128xf32>
    %cst_71 = arith.constant 1.000000e+00 : f32
    %200 = vector.broadcast %cst_71 : f32 to vector<8x128xf32>
    %201 = arith.addf %200, %199 : vector<8x128xf32>
    %202 = arith.divf %200, %201 : vector<8x128xf32>
    %203 = vector.extract_strided_slice %196 {offsets = [0, 128], sizes = [8, 128], strides = [1, 1]} : vector<8x512xf32> to vector<8x128xf32>
    %204 = arith.negf %203 : vector<8x128xf32>
    %205 = math.exp %204 : vector<8x128xf32>
    %cst_72 = arith.constant 1.000000e+00 : f32
    %206 = vector.broadcast %cst_72 : f32 to vector<8x128xf32>
    %207 = arith.addf %206, %205 : vector<8x128xf32>
    %208 = arith.divf %206, %207 : vector<8x128xf32>
    %209 = vector.extract_strided_slice %196 {offsets = [0, 256], sizes = [8, 128], strides = [1, 1]} : vector<8x512xf32> to vector<8x128xf32>
    %210 = math.tanh %209 : vector<8x128xf32>
    %211 = vector.extract_strided_slice %196 {offsets = [0, 384], sizes = [8, 128], strides = [1, 1]} : vector<8x512xf32> to vector<8x128xf32>
    %212 = arith.negf %211 : vector<8x128xf32>
    %213 = math.exp %212 : vector<8x128xf32>
    %cst_73 = arith.constant 1.000000e+00 : f32
    %214 = vector.broadcast %cst_73 : f32 to vector<8x128xf32>
    %215 = arith.addf %214, %213 : vector<8x128xf32>
    %216 = arith.divf %214, %215 : vector<8x128xf32>
    %217 = arith.mulf %208, %185 : vector<8x128xf32>
    %218 = arith.mulf %202, %210 : vector<8x128xf32>
    %219 = arith.addf %217, %218 : vector<8x128xf32>
    %220 = math.tanh %219 : vector<8x128xf32>
    %221 = arith.mulf %216, %220 : vector<8x128xf32>
    %222 = arith.index_cast %c5_i32 : i32 to index
    %c0_74 = arith.constant 0 : index
    %c0_75 = arith.constant 0 : index
    %223 = vector.load %arg14[%222, %c0_74, %c0_75] : memref<8x8x128xf32, #tpu.memory_space<vmem>>, vector<1x8x128xf32>
    %224 = vector.shape_cast %223 : vector<1x8x128xf32> to vector<8x128xf32>
    %225 = vector.shape_cast %221 : vector<8x128xf32> to vector<1x8x128xf32>
    tpu.vector_store %arg14[%222, %c0_74, %c0_75], %225 {strides = array<i32>} : memref<8x8x128xf32, #tpu.memory_space<vmem>>, vector<1x8x128xf32>,
    %c6_i32 = arith.constant 6 : i32
    %226 = arith.index_cast %c6_i32 : i32 to index
    %c0_76 = arith.constant 0 : index
    %c0_77 = arith.constant 0 : index
    %227 = vector.load %arg15[%226, %c0_76, %c0_77] : memref<8x8x512xf32, #tpu.memory_space<vmem>>, vector<1x8x512xf32>
    %228 = vector.shape_cast %227 : vector<1x8x512xf32> to vector<8x512xf32>
    %cst_78 = arith.constant dense<0.000000e+00> : vector<8x512xf32>
    %229 = tpu.matmul %221, %6, %cst_78 {dimension_numbers = #tpu.dot_dimension_numbers<[1], [0], [0], [1], [0, 0, 1, 1], [], []>} : vector<8x128xf32>, vector<128x512xf32>, vector<8x512xf32> -> vector<8x512xf32>
    %230 = arith.addf %228, %229 : vector<8x512xf32>
    %231 = vector.extract_strided_slice %230 {offsets = [0, 0], sizes = [8, 128], strides = [1, 1]} : vector<8x512xf32> to vector<8x128xf32>
    %232 = arith.negf %231 : vector<8x128xf32>
    %233 = math.exp %232 : vector<8x128xf32>
    %cst_79 = arith.constant 1.000000e+00 : f32
    %234 = vector.broadcast %cst_79 : f32 to vector<8x128xf32>
    %235 = arith.addf %234, %233 : vector<8x128xf32>
    %236 = arith.divf %234, %235 : vector<8x128xf32>
    %237 = vector.extract_strided_slice %230 {offsets = [0, 128], sizes = [8, 128], strides = [1, 1]} : vector<8x512xf32> to vector<8x128xf32>
    %238 = arith.negf %237 : vector<8x128xf32>
    %239 = math.exp %238 : vector<8x128xf32>
    %cst_80 = arith.constant 1.000000e+00 : f32
    %240 = vector.broadcast %cst_80 : f32 to vector<8x128xf32>
    %241 = arith.addf %240, %239 : vector<8x128xf32>
    %242 = arith.divf %240, %241 : vector<8x128xf32>
    %243 = vector.extract_strided_slice %230 {offsets = [0, 256], sizes = [8, 128], strides = [1, 1]} : vector<8x512xf32> to vector<8x128xf32>
    %244 = math.tanh %243 : vector<8x128xf32>
    %245 = vector.extract_strided_slice %230 {offsets = [0, 384], sizes = [8, 128], strides = [1, 1]} : vector<8x512xf32> to vector<8x128xf32>
    %246 = arith.negf %245 : vector<8x128xf32>
    %247 = math.exp %246 : vector<8x128xf32>
    %cst_81 = arith.constant 1.000000e+00 : f32
    %248 = vector.broadcast %cst_81 : f32 to vector<8x128xf32>
    %249 = arith.addf %248, %247 : vector<8x128xf32>
    %250 = arith.divf %248, %249 : vector<8x128xf32>
    %251 = arith.mulf %242, %219 : vector<8x128xf32>
    %252 = arith.mulf %236, %244 : vector<8x128xf32>
    %253 = arith.addf %251, %252 : vector<8x128xf32>
    %254 = math.tanh %253 : vector<8x128xf32>
    %255 = arith.mulf %250, %254 : vector<8x128xf32>
    %256 = arith.index_cast %c6_i32 : i32 to index
    %c0_82 = arith.constant 0 : index
    %c0_83 = arith.constant 0 : index
    %257 = vector.load %arg14[%256, %c0_82, %c0_83] : memref<8x8x128xf32, #tpu.memory_space<vmem>>, vector<1x8x128xf32>
    %258 = vector.shape_cast %257 : vector<1x8x128xf32> to vector<8x128xf32>
    %259 = vector.shape_cast %255 : vector<8x128xf32> to vector<1x8x128xf32>
    tpu.vector_store %arg14[%256, %c0_82, %c0_83], %259 {strides = array<i32>} : memref<8x8x128xf32, #tpu.memory_space<vmem>>, vector<1x8x128xf32>,
    %c7_i32 = arith.constant 7 : i32
    %260 = arith.index_cast %c7_i32 : i32 to index
    %c0_84 = arith.constant 0 : index
    %c0_85 = arith.constant 0 : index
    %261 = vector.load %arg15[%260, %c0_84, %c0_85] : memref<8x8x512xf32, #tpu.memory_space<vmem>>, vector<1x8x512xf32>
    %262 = vector.shape_cast %261 : vector<1x8x512xf32> to vector<8x512xf32>
    %cst_86 = arith.constant dense<0.000000e+00> : vector<8x512xf32>
    %263 = tpu.matmul %255, %6, %cst_86 {dimension_numbers = #tpu.dot_dimension_numbers<[1], [0], [0], [1], [0, 0, 1, 1], [], []>} : vector<8x128xf32>, vector<128x512xf32>, vector<8x512xf32> -> vector<8x512xf32>
    %264 = arith.addf %262, %263 : vector<8x512xf32>
    %265 = vector.extract_strided_slice %264 {offsets = [0, 0], sizes = [8, 128], strides = [1, 1]} : vector<8x512xf32> to vector<8x128xf32>
    %266 = arith.negf %265 : vector<8x128xf32>
    %267 = math.exp %266 : vector<8x128xf32>
    %cst_87 = arith.constant 1.000000e+00 : f32
    %268 = vector.broadcast %cst_87 : f32 to vector<8x128xf32>
    %269 = arith.addf %268, %267 : vector<8x128xf32>
    %270 = arith.divf %268, %269 : vector<8x128xf32>
    %271 = vector.extract_strided_slice %264 {offsets = [0, 128], sizes = [8, 128], strides = [1, 1]} : vector<8x512xf32> to vector<8x128xf32>
    %272 = arith.negf %271 : vector<8x128xf32>
    %273 = math.exp %272 : vector<8x128xf32>
    %cst_88 = arith.constant 1.000000e+00 : f32
    %274 = vector.broadcast %cst_88 : f32 to vector<8x128xf32>
    %275 = arith.addf %274, %273 : vector<8x128xf32>
    %276 = arith.divf %274, %275 : vector<8x128xf32>
    %277 = vector.extract_strided_slice %264 {offsets = [0, 256], sizes = [8, 128], strides = [1, 1]} : vector<8x512xf32> to vector<8x128xf32>
    %278 = math.tanh %277 : vector<8x128xf32>
    %279 = vector.extract_strided_slice %264 {offsets = [0, 384], sizes = [8, 128], strides = [1, 1]} : vector<8x512xf32> to vector<8x128xf32>
    %280 = arith.negf %279 : vector<8x128xf32>
    %281 = math.exp %280 : vector<8x128xf32>
    %cst_89 = arith.constant 1.000000e+00 : f32
    %282 = vector.broadcast %cst_89 : f32 to vector<8x128xf32>
    %283 = arith.addf %282, %281 : vector<8x128xf32>
    %284 = arith.divf %282, %283 : vector<8x128xf32>
    %285 = arith.mulf %276, %253 : vector<8x128xf32>
    %286 = arith.mulf %270, %278 : vector<8x128xf32>
    %287 = arith.addf %285, %286 : vector<8x128xf32>
    %288 = math.tanh %287 : vector<8x128xf32>
    %289 = arith.mulf %284, %288 : vector<8x128xf32>
    %290 = arith.index_cast %c7_i32 : i32 to index
    %c0_90 = arith.constant 0 : index
    %c0_91 = arith.constant 0 : index
    %291 = vector.load %arg14[%290, %c0_90, %c0_91] : memref<8x8x128xf32, #tpu.memory_space<vmem>>, vector<1x8x128xf32>
    %292 = vector.shape_cast %291 : vector<1x8x128xf32> to vector<8x128xf32>
    %293 = vector.shape_cast %289 : vector<8x128xf32> to vector<1x8x128xf32>
    tpu.vector_store %arg14[%290, %c0_90, %c0_91], %293 {strides = array<i32>} : memref<8x8x128xf32, #tpu.memory_space<vmem>>, vector<1x8x128xf32>,
    %c8_i32 = arith.constant 8 : i32
    %c0_92 = arith.constant 0 : index
    %c0_93 = arith.constant 0 : index
    %c0_94 = arith.constant 0 : index
    %294 = vector.load %arg12[%c0_92, %c0_93, %c0_94] : memref<2x8x128xf32, #tpu.memory_space<vmem>>, vector<1x8x128xf32>
    %295 = vector.shape_cast %294 : vector<1x8x128xf32> to vector<8x128xf32>
    %296 = vector.shape_cast %289 : vector<8x128xf32> to vector<1x8x128xf32>
    tpu.vector_store %arg12[%c0_92, %c0_93, %c0_94], %296 {strides = array<i32>} : memref<2x8x128xf32, #tpu.memory_space<vmem>>, vector<1x8x128xf32>,
    %c0_95 = arith.constant 0 : index
    %c0_96 = arith.constant 0 : index
    %c0_97 = arith.constant 0 : index
    %297 = vector.load %arg13[%c0_95, %c0_96, %c0_97] : memref<2x8x128xf32, #tpu.memory_space<vmem>>, vector<1x8x128xf32>
    %298 = vector.shape_cast %297 : vector<1x8x128xf32> to vector<8x128xf32>
    %299 = vector.shape_cast %287 : vector<8x128xf32> to vector<1x8x128xf32>
    tpu.vector_store %arg13[%c0_95, %c0_96, %c0_97], %299 {strides = array<i32>} : memref<2x8x128xf32, #tpu.memory_space<vmem>>, vector<1x8x128xf32>,
    %c1 = arith.constant 1 : index
    %c0_98 = arith.constant 0 : index
    %c0_99 = arith.constant 0 : index
    %300 = vector.load %arg5[%c1, %c0_98, %c0_99] : memref<2x128x512xf32, #tpu.memory_space<vmem>>, vector<1x128x512xf32>
    %301 = vector.shape_cast %300 : vector<1x128x512xf32> to vector<128x512xf32>
    %c0_100 = arith.constant 0 : index
    %c0_101 = arith.constant 0 : index
    %c0_102 = arith.constant 0 : index
    %302 = vector.load %arg14[%c0_100, %c0_101, %c0_102] : memref<8x8x128xf32, #tpu.memory_space<vmem>>, vector<8x8x128xf32>
    %303 = vector.shape_cast %302 : vector<8x8x128xf32> to vector<64x128xf32>
    %c1_103 = arith.constant 1 : index
    %c0_104 = arith.constant 0 : index
    %c0_105 = arith.constant 0 : index
    %304 = vector.load %arg4[%c1_103, %c0_104, %c0_105] : memref<2x128x512xf32, #tpu.memory_space<vmem>>, vector<1x128x512xf32>
    %305 = vector.shape_cast %304 : vector<1x128x512xf32> to vector<128x512xf32>
    %cst_106 = arith.constant dense<0.000000e+00> : vector<64x512xf32>
    %306 = tpu.matmul %303, %305, %cst_106 {dimension_numbers = #tpu.dot_dimension_numbers<[1], [0], [0], [1], [0, 0, 1, 1], [], []>} : vector<64x128xf32>, vector<128x512xf32>, vector<64x512xf32> -> vector<64x512xf32>
    %c1_107 = arith.constant 1 : index
    %c0_108 = arith.constant 0 : index
    %c0_109 = arith.constant 0 : index
    %307 = vector.load %arg6[%c1_107, %c0_108, %c0_109] : memref<2x1x512xf32, #tpu.memory_space<vmem>>, vector<1x1x512xf32>
    %308 = vector.shape_cast %307 : vector<1x1x512xf32> to vector<1x512xf32>
    %309 = vector.broadcast %308 : vector<1x512xf32> to vector<64x512xf32>
    %310 = arith.addf %306, %309 : vector<64x512xf32>
    %311 = vector.shape_cast %310 : vector<64x512xf32> to vector<8x8x512xf32>
    %c0_110 = arith.constant 0 : index
    %c0_111 = arith.constant 0 : index
    %c0_112 = arith.constant 0 : index
    %312 = vector.load %arg15[%c0_110, %c0_111, %c0_112] : memref<8x8x512xf32, #tpu.memory_space<vmem>>, vector<8x8x512xf32>
    tpu.vector_store %arg15[%c0_110, %c0_111, %c0_112], %311 {strides = array<i32>} : memref<8x8x512xf32, #tpu.memory_space<vmem>>, vector<8x8x512xf32>,
    %c1_113 = arith.constant 1 : index
    %c0_114 = arith.constant 0 : index
    %c0_115 = arith.constant 0 : index
    %313 = vector.load %arg12[%c1_113, %c0_114, %c0_115] : memref<2x8x128xf32, #tpu.memory_space<vmem>>, vector<1x8x128xf32>
    %314 = vector.shape_cast %313 : vector<1x8x128xf32> to vector<8x128xf32>
    %c1_116 = arith.constant 1 : index
    %c0_117 = arith.constant 0 : index
    %c0_118 = arith.constant 0 : index
    %315 = vector.load %arg13[%c1_116, %c0_117, %c0_118] : memref<2x8x128xf32, #tpu.memory_space<vmem>>, vector<1x8x128xf32>
    %316 = vector.shape_cast %315 : vector<1x8x128xf32> to vector<8x128xf32>
    %c0_i32_119 = arith.constant 0 : i32
    %317 = arith.index_cast %c0_i32_119 : i32 to index
    %c0_120 = arith.constant 0 : index
    %c0_121 = arith.constant 0 : index
    %318 = vector.load %arg15[%317, %c0_120, %c0_121] : memref<8x8x512xf32, #tpu.memory_space<vmem>>, vector<1x8x512xf32>
    %319 = vector.shape_cast %318 : vector<1x8x512xf32> to vector<8x512xf32>
    %cst_122 = arith.constant dense<0.000000e+00> : vector<8x512xf32>
    %320 = tpu.matmul %314, %301, %cst_122 {dimension_numbers = #tpu.dot_dimension_numbers<[1], [0], [0], [1], [0, 0, 1, 1], [], []>} : vector<8x128xf32>, vector<128x512xf32>, vector<8x512xf32> -> vector<8x512xf32>
    %321 = arith.addf %319, %320 : vector<8x512xf32>
    %322 = vector.extract_strided_slice %321 {offsets = [0, 0], sizes = [8, 128], strides = [1, 1]} : vector<8x512xf32> to vector<8x128xf32>
    %323 = arith.negf %322 : vector<8x128xf32>
    %324 = math.exp %323 : vector<8x128xf32>
    %cst_123 = arith.constant 1.000000e+00 : f32
    %325 = vector.broadcast %cst_123 : f32 to vector<8x128xf32>
    %326 = arith.addf %325, %324 : vector<8x128xf32>
    %327 = arith.divf %325, %326 : vector<8x128xf32>
    %328 = vector.extract_strided_slice %321 {offsets = [0, 128], sizes = [8, 128], strides = [1, 1]} : vector<8x512xf32> to vector<8x128xf32>
    %329 = arith.negf %328 : vector<8x128xf32>
    %330 = math.exp %329 : vector<8x128xf32>
    %cst_124 = arith.constant 1.000000e+00 : f32
    %331 = vector.broadcast %cst_124 : f32 to vector<8x128xf32>
    %332 = arith.addf %331, %330 : vector<8x128xf32>
    %333 = arith.divf %331, %332 : vector<8x128xf32>
    %334 = vector.extract_strided_slice %321 {offsets = [0, 256], sizes = [8, 128], strides = [1, 1]} : vector<8x512xf32> to vector<8x128xf32>
    %335 = math.tanh %334 : vector<8x128xf32>
    %336 = vector.extract_strided_slice %321 {offsets = [0, 384], sizes = [8, 128], strides = [1, 1]} : vector<8x512xf32> to vector<8x128xf32>
    %337 = arith.negf %336 : vector<8x128xf32>
    %338 = math.exp %337 : vector<8x128xf32>
    %cst_125 = arith.constant 1.000000e+00 : f32
    %339 = vector.broadcast %cst_125 : f32 to vector<8x128xf32>
    %340 = arith.addf %339, %338 : vector<8x128xf32>
    %341 = arith.divf %339, %340 : vector<8x128xf32>
    %342 = arith.mulf %333, %316 : vector<8x128xf32>
    %343 = arith.mulf %327, %335 : vector<8x128xf32>
    %344 = arith.addf %342, %343 : vector<8x128xf32>
    %345 = math.tanh %344 : vector<8x128xf32>
    %346 = arith.mulf %341, %345 : vector<8x128xf32>
    %c1_i32_126 = arith.constant 1 : i32
    %347 = arith.index_cast %c1_i32_126 : i32 to index
    %c0_127 = arith.constant 0 : index
    %c0_128 = arith.constant 0 : index
    %348 = vector.load %arg15[%347, %c0_127, %c0_128] : memref<8x8x512xf32, #tpu.memory_space<vmem>>, vector<1x8x512xf32>
    %349 = vector.shape_cast %348 : vector<1x8x512xf32> to vector<8x512xf32>
    %cst_129 = arith.constant dense<0.000000e+00> : vector<8x512xf32>
    %350 = tpu.matmul %346, %301, %cst_129 {dimension_numbers = #tpu.dot_dimension_numbers<[1], [0], [0], [1], [0, 0, 1, 1], [], []>} : vector<8x128xf32>, vector<128x512xf32>, vector<8x512xf32> -> vector<8x512xf32>
    %351 = arith.addf %349, %350 : vector<8x512xf32>
    %352 = vector.extract_strided_slice %351 {offsets = [0, 0], sizes = [8, 128], strides = [1, 1]} : vector<8x512xf32> to vector<8x128xf32>
    %353 = arith.negf %352 : vector<8x128xf32>
    %354 = math.exp %353 : vector<8x128xf32>
    %cst_130 = arith.constant 1.000000e+00 : f32
    %355 = vector.broadcast %cst_130 : f32 to vector<8x128xf32>
    %356 = arith.addf %355, %354 : vector<8x128xf32>
    %357 = arith.divf %355, %356 : vector<8x128xf32>
    %358 = vector.extract_strided_slice %351 {offsets = [0, 128], sizes = [8, 128], strides = [1, 1]} : vector<8x512xf32> to vector<8x128xf32>
    %359 = arith.negf %358 : vector<8x128xf32>
    %360 = math.exp %359 : vector<8x128xf32>
    %cst_131 = arith.constant 1.000000e+00 : f32
    %361 = vector.broadcast %cst_131 : f32 to vector<8x128xf32>
    %362 = arith.addf %361, %360 : vector<8x128xf32>
    %363 = arith.divf %361, %362 : vector<8x128xf32>
    %364 = vector.extract_strided_slice %351 {offsets = [0, 256], sizes = [8, 128], strides = [1, 1]} : vector<8x512xf32> to vector<8x128xf32>
    %365 = math.tanh %364 : vector<8x128xf32>
    %366 = vector.extract_strided_slice %351 {offsets = [0, 384], sizes = [8, 128], strides = [1, 1]} : vector<8x512xf32> to vector<8x128xf32>
    %367 = arith.negf %366 : vector<8x128xf32>
    %368 = math.exp %367 : vector<8x128xf32>
    %cst_132 = arith.constant 1.000000e+00 : f32
    %369 = vector.broadcast %cst_132 : f32 to vector<8x128xf32>
    %370 = arith.addf %369, %368 : vector<8x128xf32>
    %371 = arith.divf %369, %370 : vector<8x128xf32>
    %372 = arith.mulf %363, %344 : vector<8x128xf32>
    %373 = arith.mulf %357, %365 : vector<8x128xf32>
    %374 = arith.addf %372, %373 : vector<8x128xf32>
    %375 = math.tanh %374 : vector<8x128xf32>
    %376 = arith.mulf %371, %375 : vector<8x128xf32>
    %c2_i32_133 = arith.constant 2 : i32
    %377 = arith.index_cast %c2_i32_133 : i32 to index
    %c0_134 = arith.constant 0 : index
    %c0_135 = arith.constant 0 : index
    %378 = vector.load %arg15[%377, %c0_134, %c0_135] : memref<8x8x512xf32, #tpu.memory_space<vmem>>, vector<1x8x512xf32>
    %379 = vector.shape_cast %378 : vector<1x8x512xf32> to vector<8x512xf32>
    %cst_136 = arith.constant dense<0.000000e+00> : vector<8x512xf32>
    %380 = tpu.matmul %376, %301, %cst_136 {dimension_numbers = #tpu.dot_dimension_numbers<[1], [0], [0], [1], [0, 0, 1, 1], [], []>} : vector<8x128xf32>, vector<128x512xf32>, vector<8x512xf32> -> vector<8x512xf32>
    %381 = arith.addf %379, %380 : vector<8x512xf32>
    %382 = vector.extract_strided_slice %381 {offsets = [0, 0], sizes = [8, 128], strides = [1, 1]} : vector<8x512xf32> to vector<8x128xf32>
    %383 = arith.negf %382 : vector<8x128xf32>
    %384 = math.exp %383 : vector<8x128xf32>
    %cst_137 = arith.constant 1.000000e+00 : f32
    %385 = vector.broadcast %cst_137 : f32 to vector<8x128xf32>
    %386 = arith.addf %385, %384 : vector<8x128xf32>
    %387 = arith.divf %385, %386 : vector<8x128xf32>
    %388 = vector.extract_strided_slice %381 {offsets = [0, 128], sizes = [8, 128], strides = [1, 1]} : vector<8x512xf32> to vector<8x128xf32>
    %389 = arith.negf %388 : vector<8x128xf32>
    %390 = math.exp %389 : vector<8x128xf32>
    %cst_138 = arith.constant 1.000000e+00 : f32
    %391 = vector.broadcast %cst_138 : f32 to vector<8x128xf32>
    %392 = arith.addf %391, %390 : vector<8x128xf32>
    %393 = arith.divf %391, %392 : vector<8x128xf32>
    %394 = vector.extract_strided_slice %381 {offsets = [0, 256], sizes = [8, 128], strides = [1, 1]} : vector<8x512xf32> to vector<8x128xf32>
    %395 = math.tanh %394 : vector<8x128xf32>
    %396 = vector.extract_strided_slice %381 {offsets = [0, 384], sizes = [8, 128], strides = [1, 1]} : vector<8x512xf32> to vector<8x128xf32>
    %397 = arith.negf %396 : vector<8x128xf32>
    %398 = math.exp %397 : vector<8x128xf32>
    %cst_139 = arith.constant 1.000000e+00 : f32
    %399 = vector.broadcast %cst_139 : f32 to vector<8x128xf32>
    %400 = arith.addf %399, %398 : vector<8x128xf32>
    %401 = arith.divf %399, %400 : vector<8x128xf32>
    %402 = arith.mulf %393, %374 : vector<8x128xf32>
    %403 = arith.mulf %387, %395 : vector<8x128xf32>
    %404 = arith.addf %402, %403 : vector<8x128xf32>
    %405 = math.tanh %404 : vector<8x128xf32>
    %406 = arith.mulf %401, %405 : vector<8x128xf32>
    %c3_i32_140 = arith.constant 3 : i32
    %407 = arith.index_cast %c3_i32_140 : i32 to index
    %c0_141 = arith.constant 0 : index
    %c0_142 = arith.constant 0 : index
    %408 = vector.load %arg15[%407, %c0_141, %c0_142] : memref<8x8x512xf32, #tpu.memory_space<vmem>>, vector<1x8x512xf32>
    %409 = vector.shape_cast %408 : vector<1x8x512xf32> to vector<8x512xf32>
    %cst_143 = arith.constant dense<0.000000e+00> : vector<8x512xf32>
    %410 = tpu.matmul %406, %301, %cst_143 {dimension_numbers = #tpu.dot_dimension_numbers<[1], [0], [0], [1], [0, 0, 1, 1], [], []>} : vector<8x128xf32>, vector<128x512xf32>, vector<8x512xf32> -> vector<8x512xf32>
    %411 = arith.addf %409, %410 : vector<8x512xf32>
    %412 = vector.extract_strided_slice %411 {offsets = [0, 0], sizes = [8, 128], strides = [1, 1]} : vector<8x512xf32> to vector<8x128xf32>
    %413 = arith.negf %412 : vector<8x128xf32>
    %414 = math.exp %413 : vector<8x128xf32>
    %cst_144 = arith.constant 1.000000e+00 : f32
    %415 = vector.broadcast %cst_144 : f32 to vector<8x128xf32>
    %416 = arith.addf %415, %414 : vector<8x128xf32>
    %417 = arith.divf %415, %416 : vector<8x128xf32>
    %418 = vector.extract_strided_slice %411 {offsets = [0, 128], sizes = [8, 128], strides = [1, 1]} : vector<8x512xf32> to vector<8x128xf32>
    %419 = arith.negf %418 : vector<8x128xf32>
    %420 = math.exp %419 : vector<8x128xf32>
    %cst_145 = arith.constant 1.000000e+00 : f32
    %421 = vector.broadcast %cst_145 : f32 to vector<8x128xf32>
    %422 = arith.addf %421, %420 : vector<8x128xf32>
    %423 = arith.divf %421, %422 : vector<8x128xf32>
    %424 = vector.extract_strided_slice %411 {offsets = [0, 256], sizes = [8, 128], strides = [1, 1]} : vector<8x512xf32> to vector<8x128xf32>
    %425 = math.tanh %424 : vector<8x128xf32>
    %426 = vector.extract_strided_slice %411 {offsets = [0, 384], sizes = [8, 128], strides = [1, 1]} : vector<8x512xf32> to vector<8x128xf32>
    %427 = arith.negf %426 : vector<8x128xf32>
    %428 = math.exp %427 : vector<8x128xf32>
    %cst_146 = arith.constant 1.000000e+00 : f32
    %429 = vector.broadcast %cst_146 : f32 to vector<8x128xf32>
    %430 = arith.addf %429, %428 : vector<8x128xf32>
    %431 = arith.divf %429, %430 : vector<8x128xf32>
    %432 = arith.mulf %423, %404 : vector<8x128xf32>
    %433 = arith.mulf %417, %425 : vector<8x128xf32>
    %434 = arith.addf %432, %433 : vector<8x128xf32>
    %435 = math.tanh %434 : vector<8x128xf32>
    %436 = arith.mulf %431, %435 : vector<8x128xf32>
    %c4_i32_147 = arith.constant 4 : i32
    %437 = arith.index_cast %c4_i32_147 : i32 to index
    %c0_148 = arith.constant 0 : index
    %c0_149 = arith.constant 0 : index
    %438 = vector.load %arg15[%437, %c0_148, %c0_149] : memref<8x8x512xf32, #tpu.memory_space<vmem>>, vector<1x8x512xf32>
    %439 = vector.shape_cast %438 : vector<1x8x512xf32> to vector<8x512xf32>
    %cst_150 = arith.constant dense<0.000000e+00> : vector<8x512xf32>
    %440 = tpu.matmul %436, %301, %cst_150 {dimension_numbers = #tpu.dot_dimension_numbers<[1], [0], [0], [1], [0, 0, 1, 1], [], []>} : vector<8x128xf32>, vector<128x512xf32>, vector<8x512xf32> -> vector<8x512xf32>
    %441 = arith.addf %439, %440 : vector<8x512xf32>
    %442 = vector.extract_strided_slice %441 {offsets = [0, 0], sizes = [8, 128], strides = [1, 1]} : vector<8x512xf32> to vector<8x128xf32>
    %443 = arith.negf %442 : vector<8x128xf32>
    %444 = math.exp %443 : vector<8x128xf32>
    %cst_151 = arith.constant 1.000000e+00 : f32
    %445 = vector.broadcast %cst_151 : f32 to vector<8x128xf32>
    %446 = arith.addf %445, %444 : vector<8x128xf32>
    %447 = arith.divf %445, %446 : vector<8x128xf32>
    %448 = vector.extract_strided_slice %441 {offsets = [0, 128], sizes = [8, 128], strides = [1, 1]} : vector<8x512xf32> to vector<8x128xf32>
    %449 = arith.negf %448 : vector<8x128xf32>
    %450 = math.exp %449 : vector<8x128xf32>
    %cst_152 = arith.constant 1.000000e+00 : f32
    %451 = vector.broadcast %cst_152 : f32 to vector<8x128xf32>
    %452 = arith.addf %451, %450 : vector<8x128xf32>
    %453 = arith.divf %451, %452 : vector<8x128xf32>
    %454 = vector.extract_strided_slice %441 {offsets = [0, 256], sizes = [8, 128], strides = [1, 1]} : vector<8x512xf32> to vector<8x128xf32>
    %455 = math.tanh %454 : vector<8x128xf32>
    %456 = vector.extract_strided_slice %441 {offsets = [0, 384], sizes = [8, 128], strides = [1, 1]} : vector<8x512xf32> to vector<8x128xf32>
    %457 = arith.negf %456 : vector<8x128xf32>
    %458 = math.exp %457 : vector<8x128xf32>
    %cst_153 = arith.constant 1.000000e+00 : f32
    %459 = vector.broadcast %cst_153 : f32 to vector<8x128xf32>
    %460 = arith.addf %459, %458 : vector<8x128xf32>
    %461 = arith.divf %459, %460 : vector<8x128xf32>
    %462 = arith.mulf %453, %434 : vector<8x128xf32>
    %463 = arith.mulf %447, %455 : vector<8x128xf32>
    %464 = arith.addf %462, %463 : vector<8x128xf32>
    %465 = math.tanh %464 : vector<8x128xf32>
    %466 = arith.mulf %461, %465 : vector<8x128xf32>
    %c5_i32_154 = arith.constant 5 : i32
    %467 = arith.index_cast %c5_i32_154 : i32 to index
    %c0_155 = arith.constant 0 : index
    %c0_156 = arith.constant 0 : index
    %468 = vector.load %arg15[%467, %c0_155, %c0_156] : memref<8x8x512xf32, #tpu.memory_space<vmem>>, vector<1x8x512xf32>
    %469 = vector.shape_cast %468 : vector<1x8x512xf32> to vector<8x512xf32>
    %cst_157 = arith.constant dense<0.000000e+00> : vector<8x512xf32>
    %470 = tpu.matmul %466, %301, %cst_157 {dimension_numbers = #tpu.dot_dimension_numbers<[1], [0], [0], [1], [0, 0, 1, 1], [], []>} : vector<8x128xf32>, vector<128x512xf32>, vector<8x512xf32> -> vector<8x512xf32>
    %471 = arith.addf %469, %470 : vector<8x512xf32>
    %472 = vector.extract_strided_slice %471 {offsets = [0, 0], sizes = [8, 128], strides = [1, 1]} : vector<8x512xf32> to vector<8x128xf32>
    %473 = arith.negf %472 : vector<8x128xf32>
    %474 = math.exp %473 : vector<8x128xf32>
    %cst_158 = arith.constant 1.000000e+00 : f32
    %475 = vector.broadcast %cst_158 : f32 to vector<8x128xf32>
    %476 = arith.addf %475, %474 : vector<8x128xf32>
    %477 = arith.divf %475, %476 : vector<8x128xf32>
    %478 = vector.extract_strided_slice %471 {offsets = [0, 128], sizes = [8, 128], strides = [1, 1]} : vector<8x512xf32> to vector<8x128xf32>
    %479 = arith.negf %478 : vector<8x128xf32>
    %480 = math.exp %479 : vector<8x128xf32>
    %cst_159 = arith.constant 1.000000e+00 : f32
    %481 = vector.broadcast %cst_159 : f32 to vector<8x128xf32>
    %482 = arith.addf %481, %480 : vector<8x128xf32>
    %483 = arith.divf %481, %482 : vector<8x128xf32>
    %484 = vector.extract_strided_slice %471 {offsets = [0, 256], sizes = [8, 128], strides = [1, 1]} : vector<8x512xf32> to vector<8x128xf32>
    %485 = math.tanh %484 : vector<8x128xf32>
    %486 = vector.extract_strided_slice %471 {offsets = [0, 384], sizes = [8, 128], strides = [1, 1]} : vector<8x512xf32> to vector<8x128xf32>
    %487 = arith.negf %486 : vector<8x128xf32>
    %488 = math.exp %487 : vector<8x128xf32>
    %cst_160 = arith.constant 1.000000e+00 : f32
    %489 = vector.broadcast %cst_160 : f32 to vector<8x128xf32>
    %490 = arith.addf %489, %488 : vector<8x128xf32>
    %491 = arith.divf %489, %490 : vector<8x128xf32>
    %492 = arith.mulf %483, %464 : vector<8x128xf32>
    %493 = arith.mulf %477, %485 : vector<8x128xf32>
    %494 = arith.addf %492, %493 : vector<8x128xf32>
    %495 = math.tanh %494 : vector<8x128xf32>
    %496 = arith.mulf %491, %495 : vector<8x128xf32>
    %c6_i32_161 = arith.constant 6 : i32
    %497 = arith.index_cast %c6_i32_161 : i32 to index
    %c0_162 = arith.constant 0 : index
    %c0_163 = arith.constant 0 : index
    %498 = vector.load %arg15[%497, %c0_162, %c0_163] : memref<8x8x512xf32, #tpu.memory_space<vmem>>, vector<1x8x512xf32>
    %499 = vector.shape_cast %498 : vector<1x8x512xf32> to vector<8x512xf32>
    %cst_164 = arith.constant dense<0.000000e+00> : vector<8x512xf32>
    %500 = tpu.matmul %496, %301, %cst_164 {dimension_numbers = #tpu.dot_dimension_numbers<[1], [0], [0], [1], [0, 0, 1, 1], [], []>} : vector<8x128xf32>, vector<128x512xf32>, vector<8x512xf32> -> vector<8x512xf32>
    %501 = arith.addf %499, %500 : vector<8x512xf32>
    %502 = vector.extract_strided_slice %501 {offsets = [0, 0], sizes = [8, 128], strides = [1, 1]} : vector<8x512xf32> to vector<8x128xf32>
    %503 = arith.negf %502 : vector<8x128xf32>
    %504 = math.exp %503 : vector<8x128xf32>
    %cst_165 = arith.constant 1.000000e+00 : f32
    %505 = vector.broadcast %cst_165 : f32 to vector<8x128xf32>
    %506 = arith.addf %505, %504 : vector<8x128xf32>
    %507 = arith.divf %505, %506 : vector<8x128xf32>
    %508 = vector.extract_strided_slice %501 {offsets = [0, 128], sizes = [8, 128], strides = [1, 1]} : vector<8x512xf32> to vector<8x128xf32>
    %509 = arith.negf %508 : vector<8x128xf32>
    %510 = math.exp %509 : vector<8x128xf32>
    %cst_166 = arith.constant 1.000000e+00 : f32
    %511 = vector.broadcast %cst_166 : f32 to vector<8x128xf32>
    %512 = arith.addf %511, %510 : vector<8x128xf32>
    %513 = arith.divf %511, %512 : vector<8x128xf32>
    %514 = vector.extract_strided_slice %501 {offsets = [0, 256], sizes = [8, 128], strides = [1, 1]} : vector<8x512xf32> to vector<8x128xf32>
    %515 = math.tanh %514 : vector<8x128xf32>
    %516 = vector.extract_strided_slice %501 {offsets = [0, 384], sizes = [8, 128], strides = [1, 1]} : vector<8x512xf32> to vector<8x128xf32>
    %517 = arith.negf %516 : vector<8x128xf32>
    %518 = math.exp %517 : vector<8x128xf32>
    %cst_167 = arith.constant 1.000000e+00 : f32
    %519 = vector.broadcast %cst_167 : f32 to vector<8x128xf32>
    %520 = arith.addf %519, %518 : vector<8x128xf32>
    %521 = arith.divf %519, %520 : vector<8x128xf32>
    %522 = arith.mulf %513, %494 : vector<8x128xf32>
    %523 = arith.mulf %507, %515 : vector<8x128xf32>
    %524 = arith.addf %522, %523 : vector<8x128xf32>
    %525 = math.tanh %524 : vector<8x128xf32>
    %526 = arith.mulf %521, %525 : vector<8x128xf32>
    %c7_i32_168 = arith.constant 7 : i32
    %527 = arith.index_cast %c7_i32_168 : i32 to index
    %c0_169 = arith.constant 0 : index
    %c0_170 = arith.constant 0 : index
    %528 = vector.load %arg15[%527, %c0_169, %c0_170] : memref<8x8x512xf32, #tpu.memory_space<vmem>>, vector<1x8x512xf32>
    %529 = vector.shape_cast %528 : vector<1x8x512xf32> to vector<8x512xf32>
    %cst_171 = arith.constant dense<0.000000e+00> : vector<8x512xf32>
    %530 = tpu.matmul %526, %301, %cst_171 {dimension_numbers = #tpu.dot_dimension_numbers<[1], [0], [0], [1], [0, 0, 1, 1], [], []>} : vector<8x128xf32>, vector<128x512xf32>, vector<8x512xf32> -> vector<8x512xf32>
    %531 = arith.addf %529, %530 : vector<8x512xf32>
    %532 = vector.extract_strided_slice %531 {offsets = [0, 0], sizes = [8, 128], strides = [1, 1]} : vector<8x512xf32> to vector<8x128xf32>
    %533 = arith.negf %532 : vector<8x128xf32>
    %534 = math.exp %533 : vector<8x128xf32>
    %cst_172 = arith.constant 1.000000e+00 : f32
    %535 = vector.broadcast %cst_172 : f32 to vector<8x128xf32>
    %536 = arith.addf %535, %534 : vector<8x128xf32>
    %537 = arith.divf %535, %536 : vector<8x128xf32>
    %538 = vector.extract_strided_slice %531 {offsets = [0, 128], sizes = [8, 128], strides = [1, 1]} : vector<8x512xf32> to vector<8x128xf32>
    %539 = arith.negf %538 : vector<8x128xf32>
    %540 = math.exp %539 : vector<8x128xf32>
    %cst_173 = arith.constant 1.000000e+00 : f32
    %541 = vector.broadcast %cst_173 : f32 to vector<8x128xf32>
    %542 = arith.addf %541, %540 : vector<8x128xf32>
    %543 = arith.divf %541, %542 : vector<8x128xf32>
    %544 = vector.extract_strided_slice %531 {offsets = [0, 256], sizes = [8, 128], strides = [1, 1]} : vector<8x512xf32> to vector<8x128xf32>
    %545 = math.tanh %544 : vector<8x128xf32>
    %546 = vector.extract_strided_slice %531 {offsets = [0, 384], sizes = [8, 128], strides = [1, 1]} : vector<8x512xf32> to vector<8x128xf32>
    %547 = arith.negf %546 : vector<8x128xf32>
    %548 = math.exp %547 : vector<8x128xf32>
    %cst_174 = arith.constant 1.000000e+00 : f32
    %549 = vector.broadcast %cst_174 : f32 to vector<8x128xf32>
    %550 = arith.addf %549, %548 : vector<8x128xf32>
    %551 = arith.divf %549, %550 : vector<8x128xf32>
    %552 = arith.mulf %543, %524 : vector<8x128xf32>
    %553 = arith.mulf %537, %545 : vector<8x128xf32>
    %554 = arith.addf %552, %553 : vector<8x128xf32>
    %555 = math.tanh %554 : vector<8x128xf32>
    %556 = arith.mulf %551, %555 : vector<8x128xf32>
    %c8_i32_175 = arith.constant 8 : i32
    %c1_176 = arith.constant 1 : index
    %c0_177 = arith.constant 0 : index
    %c0_178 = arith.constant 0 : index
    %557 = vector.load %arg12[%c1_176, %c0_177, %c0_178] : memref<2x8x128xf32, #tpu.memory_space<vmem>>, vector<1x8x128xf32>
    %558 = vector.shape_cast %557 : vector<1x8x128xf32> to vector<8x128xf32>
    %559 = vector.shape_cast %556 : vector<8x128xf32> to vector<1x8x128xf32>
    tpu.vector_store %arg12[%c1_176, %c0_177, %c0_178], %559 {strides = array<i32>} : memref<2x8x128xf32, #tpu.memory_space<vmem>>, vector<1x8x128xf32>,
    %c1_179 = arith.constant 1 : index
    %c0_180 = arith.constant 0 : index
    %c0_181 = arith.constant 0 : index
    %560 = vector.load %arg13[%c1_179, %c0_180, %c0_181] : memref<2x8x128xf32, #tpu.memory_space<vmem>>, vector<1x8x128xf32>
    %561 = vector.shape_cast %560 : vector<1x8x128xf32> to vector<8x128xf32>
    %562 = vector.shape_cast %554 : vector<8x128xf32> to vector<1x8x128xf32>
    tpu.vector_store %arg13[%c1_179, %c0_180, %c0_181], %562 {strides = array<i32>} : memref<2x8x128xf32, #tpu.memory_space<vmem>>, vector<1x8x128xf32>,
    %c0_i32_182 = arith.constant 0 : i32
    %563 = arith.cmpi eq, %arg0, %c0_i32_182 : i32
    %564 = arith.extui %563 : i1 to i32
    %c0_i32_183 = arith.constant 0 : i32
    %565 = arith.cmpi ne, %564, %c0_i32_183 : i32
    scf.if %565 {
      %c0_184 = arith.constant 0 : index
      %c0_185 = arith.constant 0 : index
      %c0_186 = arith.constant 0 : index
      %566 = vector.load %arg12[%c0_184, %c0_185, %c0_186] : memref<2x8x128xf32, #tpu.memory_space<vmem>>, vector<2x8x128xf32>
      %c0_187 = arith.constant 0 : index
      %c0_188 = arith.constant 0 : index
      %c0_189 = arith.constant 0 : index
      %567 = vector.load %arg10[%c0_187, %c0_188, %c0_189] : memref<2x8x128xf32, #tpu.memory_space<vmem>>, vector<2x8x128xf32>
      tpu.vector_store %arg10[%c0_187, %c0_188, %c0_189], %566 {strides = array<i32>} : memref<2x8x128xf32, #tpu.memory_space<vmem>>, vector<2x8x128xf32>,
      %c0_190 = arith.constant 0 : index
      %c0_191 = arith.constant 0 : index
      %c0_192 = arith.constant 0 : index
      %568 = vector.load %arg13[%c0_190, %c0_191, %c0_192] : memref<2x8x128xf32, #tpu.memory_space<vmem>>, vector<2x8x128xf32>
      %c0_193 = arith.constant 0 : index
      %c0_194 = arith.constant 0 : index
      %c0_195 = arith.constant 0 : index
      %569 = vector.load %arg11[%c0_193, %c0_194, %c0_195] : memref<2x8x128xf32, #tpu.memory_space<vmem>>, vector<2x8x128xf32>
      tpu.vector_store %arg11[%c0_193, %c0_194, %c0_195], %568 {strides = array<i32>} : memref<2x8x128xf32, #tpu.memory_space<vmem>>, vector<2x8x128xf32>,
      %c1_196 = arith.constant 1 : index
      %c0_197 = arith.constant 0 : index
      %c0_198 = arith.constant 0 : index
      %570 = vector.load %arg12[%c1_196, %c0_197, %c0_198] : memref<2x8x128xf32, #tpu.memory_space<vmem>>, vector<1x8x128xf32>
      %571 = vector.shape_cast %570 : vector<1x8x128xf32> to vector<8x128xf32>
      %c0_199 = arith.constant 0 : index
      %c0_200 = arith.constant 0 : index
      %572 = vector.load %arg7[%c0_199, %c0_200] : memref<128x1xf32, #tpu.memory_space<vmem>>, vector<128x1xf32>
      %cst_201 = arith.constant dense<0.000000e+00> : vector<8x1xf32>
      %573 = tpu.matmul %571, %572, %cst_201 {dimension_numbers = #tpu.dot_dimension_numbers<[1], [0], [0], [1], [0, 0, 1, 1], [], []>} : vector<8x128xf32>, vector<128x1xf32>, vector<8x1xf32> -> vector<8x1xf32>
      %c0_202 = arith.constant 0 : index
      %c0_203 = arith.constant 0 : index
      %574 = vector.load %arg8[%c0_202, %c0_203] : memref<1x1xf32, #tpu.memory_space<vmem>>, vector<1x1xf32>
      %575 = vector.broadcast %574 : vector<1x1xf32> to vector<8x1xf32>
      %576 = arith.addf %573, %575 : vector<8x1xf32>
      %c0_204 = arith.constant 0 : index
      %c0_205 = arith.constant 0 : index
      %577 = vector.load %arg9[%c0_204, %c0_205] : memref<8x1xf32, #tpu.memory_space<vmem>>, vector<8x1xf32>
      tpu.vector_store %arg9[%c0_204, %c0_205], %576 {strides = array<i32>} : memref<8x1xf32, #tpu.memory_space<vmem>>, vector<8x1xf32>,
    } else {
    }
    return
  }
  func.func @transform_0(%arg0: i32) -> (i32, i32, i32) {
    %c0_i32 = arith.constant 0 : i32
    %c0_i32_0 = arith.constant 0 : i32
    %c0_i32_1 = arith.constant 0 : i32
    return %arg0, %c0_i32, %c0_i32_0 : i32, i32, i32
  }
  func.func @transform_1(%arg0: i32) -> (i32, i32, i32) {
    %c0_i32 = arith.constant 0 : i32
    %c0_i32_0 = arith.constant 0 : i32
    %c0_i32_1 = arith.constant 0 : i32
    %c0_i32_2 = arith.constant 0 : i32
    return %c0_i32, %c0_i32_0, %c0_i32_1 : i32, i32, i32
  }
  func.func @transform_2(%arg0: i32) -> (i32, i32, i32) {
    %c0_i32 = arith.constant 0 : i32
    %c0_i32_0 = arith.constant 0 : i32
    %c0_i32_1 = arith.constant 0 : i32
    %c0_i32_2 = arith.constant 0 : i32
    return %c0_i32, %c0_i32_0, %c0_i32_1 : i32, i32, i32
  }
  func.func @transform_3(%arg0: i32) -> (i32, i32, i32) {
    %c0_i32 = arith.constant 0 : i32
    %c0_i32_0 = arith.constant 0 : i32
    %c0_i32_1 = arith.constant 0 : i32
    %c0_i32_2 = arith.constant 0 : i32
    return %c0_i32, %c0_i32_0, %c0_i32_1 : i32, i32, i32
  }
  func.func @transform_4(%arg0: i32) -> (i32, i32, i32) {
    %c0_i32 = arith.constant 0 : i32
    %c0_i32_0 = arith.constant 0 : i32
    %c0_i32_1 = arith.constant 0 : i32
    %c0_i32_2 = arith.constant 0 : i32
    return %c0_i32, %c0_i32_0, %c0_i32_1 : i32, i32, i32
  }
  func.func @transform_5(%arg0: i32) -> (i32, i32, i32) {
    %c0_i32 = arith.constant 0 : i32
    %c0_i32_0 = arith.constant 0 : i32
    %c0_i32_1 = arith.constant 0 : i32
    %c0_i32_2 = arith.constant 0 : i32
    return %c0_i32, %c0_i32_0, %c0_i32_1 : i32, i32, i32
  }
  func.func @transform_6(%arg0: i32) -> (i32, i32) {
    %c0_i32 = arith.constant 0 : i32
    %c0_i32_0 = arith.constant 0 : i32
    %c0_i32_1 = arith.constant 0 : i32
    return %c0_i32, %c0_i32_0 : i32, i32
  }
  func.func @transform_7(%arg0: i32) -> (i32, i32) {
    %c0_i32 = arith.constant 0 : i32
    %c0_i32_0 = arith.constant 0 : i32
    %c0_i32_1 = arith.constant 0 : i32
    return %c0_i32, %c0_i32_0 : i32, i32
  }
  func.func @transform_8(%arg0: i32) -> (i32, i32) {
    %c0_i32 = arith.constant 0 : i32
    %c0_i32_0 = arith.constant 0 : i32
    %c0_i32_1 = arith.constant 0 : i32
    return %c0_i32, %c0_i32_0 : i32, i32
  }
  func.func @transform_9(%arg0: i32) -> (i32, i32, i32) {
    %c0_i32 = arith.constant 0 : i32
    %c0_i32_0 = arith.constant 0 : i32
    %c0_i32_1 = arith.constant 0 : i32
    %c0_i32_2 = arith.constant 0 : i32
    return %c0_i32, %c0_i32_0, %c0_i32_1 : i32, i32, i32
  }
  func.func @transform_10(%arg0: i32) -> (i32, i32, i32) {
    %c0_i32 = arith.constant 0 : i32
    %c0_i32_0 = arith.constant 0 : i32
    %c0_i32_1 = arith.constant 0 : i32
    %c0_i32_2 = arith.constant 0 : i32
    return %c0_i32, %c0_i32_0, %c0_i32_1 : i32, i32, i32
  }
}

</mosaic_0001>

<bundles_post_ra>
// kernel: tpu_custom_call.1
= control target key start
LH: loop header
LB: loop body
LE: loop exit
PB: predicated region body
PF: predicated region fallthrough
CT: control target
= control target key end

     0   :  { %s6779_s0 = inlined_call_operand.vmem [shape: f32[8,8,128], index: 0, kind: input, shape index: {}]   ;;  %s6780_s1 = inlined_call_operand.vmem [shape: f32[2,8,128], index: 1, kind: input, shape index: {}]   ;;  %s6781_s2 = inlined_call_operand.vmem [shape: f32[2,8,128], index: 2, kind: input, shape index: {}]   ;;  %s6782_s3 = inlined_call_operand.hbm [shape: f32[2,128,512], index: 3, kind: input, shape index: {}]   ;;  %s6783_s4 = inlined_call_operand.hbm [shape: f32[2,128,512], index: 4, kind: input, shape index: {}]   ;;  %s6784_s5 = inlined_call_operand.vmem [shape: f32[2,1,512], index: 5, kind: input, shape index: {}]   ;;  %s6785_s6 = inlined_call_operand.vmem [shape: f32[128,1], index: 6, kind: input, shape index: {}]   ;;  %s6786_s7 = inlined_call_operand.<no memory space> [shape: f32[1,1], index: 7, kind: input, shape index: {}]   ;;  %s6787_s8 = inlined_call_operand.vmem [shape: f32[8,1], index: 8, kind: output, shape index: {0}]   ;;  %s6788_s9 = inlined_call_operand.hbm [shape: f32[2,8,128], index: 9, kind: output, shape index: {1}]   ;;  %s6789_s10 = inlined_call_operand.hbm [shape: f32[2,8,128], index: 10, kind: output, shape index: {2}]  }
   0x1   :  { %v16_v0 = vstv %s6786_s7 }
   0x2   :  { %17 = vst [vmem:[#allocation6] sm:$0x1] %v16_v0 }
   0x3   :  { %18 = vsyncpa [#allocation8], 0 }
   0x4   :  { %19 = vsyncpa [#allocation11], 0 }
   0x5   :  { %20 = vsyncpa [#allocation9], 0 }
   0x6   :  { %21 = vsyncpa [#allocation14], 0  ;;  %s5657_s15 = smov [#allocation7]   ;;  %s5561_s19 = scalar_lea.hbm %s6782_s3, 16384 }
   0x7   :  { %s33_s16 = sshll.u32 %s5657_s15, 4  ;;  %p5562_p0 = scmp.ne.s32.totalorder %s6782_s3, %s5561_s19  ;;  %s34_s16 = int_to_ptr.vmem [resolvable:$true] %s33_s16 }
   0x8   :  { %p5565_p1 = scmp.lt.u32.totalorder %s5561_s19, %s6782_s3 }
   0xa   :  { %p5567_p2 = pnand %p5565_p1, %p5562_p0 }
   0xc   :  { %5570 = shalt.err (!%p5567_p2)
}
   0xd   :  { %s5571_s7 = scalar_lea.vmem %s34_s16, 16384  ;;  %p5576_p4 = scmp.lt.s32.totalorder %s34_s16, %s34_s16 }
   0xe   :  { %p5572_p3 = scmp.ne.s32.totalorder %s34_s16, %s5571_s7  ;;  %p5577_p5 = scmp.lt.s32.totalorder %s5571_s7, %s5571_s7 }
  0x10   :  { %p5578_p6 = por %p5577_p5, %p5576_p4 }
  0x12   :  { %p5579_p7 = pnand %p5578_p6, %p5572_p3 }
  0x14   :  { %5582 = shalt.err (!%p5579_p7)
}
  0x15   :  { %s5658_s24 = smov 512   ;;  %s5659_s25 = smov 32  }
  0x16   :  { %39 = dma.hbm_to_vmem [thread:$0]  %s6782_s3, 16384, %s34_s16, [#allocation8], %s5658_s24, %s5658_s24, %s5659_s25  }
  0x17   :  { %s5660_s28 = smov [#allocation10]   ;;  %s5583_s12 = scalar_lea.hbm %s6783_s4, 16384 }
  0x18   :  { %s45_s29 = sshll.u32 %s5660_s28, 4  ;;  %p5584_p8 = scmp.ne.s32.totalorder %s6783_s4, %s5583_s12  ;;  %s46_s29 = int_to_ptr.vmem [resolvable:$true] %s45_s29 }
  0x19   :  { %p5587_p9 = scmp.lt.u32.totalorder %s5583_s12, %s6783_s4 }
  0x1b   :  { %p5589_p10 = pnand %p5587_p9, %p5584_p8 }
  0x1d   :  { %5592 = shalt.err (!%p5589_p10)
}
  0x1e   :  { %s5593_s18 = scalar_lea.vmem %s46_s29, 16384  ;;  %p5598_p12 = scmp.lt.s32.totalorder %s46_s29, %s46_s29 }
  0x1f   :  { %p5594_p11 = scmp.ne.s32.totalorder %s46_s29, %s5593_s18  ;;  %p5599_p13 = scmp.lt.s32.totalorder %s5593_s18, %s5593_s18 }
  0x21   :  { %p5600_p0 = por %p5599_p13, %p5598_p12 }
  0x23   :  { %p5601_p1 = pnand %p5600_p0, %p5594_p11 }
  0x25   :  { %5604 = shalt.err (!%p5601_p1)
}
  0x26   :  { %51 = dma.hbm_to_vmem [thread:$0]  %s6783_s4, 16384, %s46_s29, [#allocation11], %s5658_s24, %s5658_s24, %s5659_s25  }
  0x27   :  { %5649 = dma.done.wait [#allocation8], 16384  }
  0x28   :  { %5650 = vsyncadd [#allocation8], 4294950912 }
  0x29   :  { %5651 = dma.done.wait [#allocation11], 16384  }
  0x2a   :  { %5652 = vsyncadd [#allocation11], 4294950912  ;;  %v5661_v1 = vmov 0.0   ;;  %v165_v2 = vld [vmem:[#allocation7 + $0x8] sm:$0xff]  ;;  %v167_v4 = vld [vmem:[#allocation7 + $0x18] sm:$0xff]  ;;  %vm5663_vm0 = vmmov 0  }
  0x2b   :  { %314 = vmatprep.mubr.f32.mxu0 %v5661_v1  ;;  %427 = vmatprep.mubr.f32.mxu1 %v5661_v1  ;;  %v169_v3 = vld [vmem:[#allocation7 + $0x28] sm:$0xff]  ;;  %v171_v6 = vld [vmem:[#allocation7 + $0x38] sm:$0xff]  ;;  %v164_v7 = vld [vmem:[#allocation7] sm:$0xff]  ;;  %s5665_s24 = smov [#allocation13]  }
  0x2c   :  { %v3990_v5 = vpack.c.bf16 %v169_v3, %v165_v2  ;;  %v168_v8 = vld [vmem:[#allocation7 + $0x20] sm:$0xff]  ;;  %v4022_v9 = vpack.c.bf16 %v171_v6, %v167_v4  ;;  %v166_v11 = vld [vmem:[#allocation7 + $0x10] sm:$0xff]  ;;  %v173_v13 = vld [vmem:[#allocation7 + $0x48] sm:$0xff]  ;;  %s3869_s25 = sshll.u32 %s5665_s24, 4  ;;  %s6745_s25 = int_to_ptr.vmem [resolvable:$true] %s3869_s25 }
  0x2d   :  { %v3992_v10 = vpack.c.bf16 %v168_v8, %v164_v7  ;;  %v170_v12 = vld [vmem:[#allocation7 + $0x30] sm:$0xff]  ;;  %v177_v15 = vld [vmem:[#allocation7 + $0x68] sm:$0xff]  ;;  %v175_v16 = vld [vmem:[#allocation7 + $0x58] sm:$0xff] }
  0x2e   :  { %3991 = vmatprep.subr.bf16.mxu0 %v3990_v5  ;;  %v4024_v14 = vpack.c.bf16 %v170_v12, %v166_v11  ;;  %v179_v17 = vld [vmem:[#allocation7 + $0x78] sm:$0xff]  ;;  %4023 = vmatprep.subr.bf16.mxu1 %v4022_v9  ;;  %v3994_v18 = vpack.c.bf16 %v177_v15, %v173_v13  ;;  %v172_v20 = vld [vmem:[#allocation7 + $0x40] sm:$0xff]  ;;  %v174_v22 = vld [vmem:[#allocation7 + $0x50] sm:$0xff] }
  0x2f   :  { %3993 = vmatpush1.bf16.msra.mxu0 %v3992_v10  ;;  %v4026_v19 = vpack.c.bf16 %v179_v17, %v175_v16  ;;  %v176_v21 = vld [vmem:[#allocation7 + $0x60] sm:$0xff]  ;;  %v178_v24 = vld [vmem:[#allocation7 + $0x70] sm:$0xff]  ;;  %v181_v25 = vld [vmem:[#allocation7 + $0x88] sm:$0xff] }
  0x30   :  { %4025 = vmatpush1.bf16.msra.mxu1 %v4024_v14  ;;  %v3996_v23 = vpack.c.bf16 %v176_v21, %v172_v20  ;;  %v185_v26 = vld [vmem:[#allocation7 + $0xa8] sm:$0xff]  ;;  %3995 = vmatprep.subr.bf16.mxu0 %v3994_v18  ;;  %v4028_v27 = vpack.c.bf16 %v178_v24, %v174_v22  ;;  %v183_v29 = vld [vmem:[#allocation7 + $0x98] sm:$0xff]  ;;  %v180_v31 = vld [vmem:[#allocation7 + $0x80] sm:$0xff] }
  0x31   :  { %4027 = vmatprep.subr.bf16.mxu1 %v4026_v19  ;;  %v3998_v28 = vpack.c.bf16 %v185_v26, %v181_v25  ;;  %v187_v30 = vld [vmem:[#allocation7 + $0xb8] sm:$0xff]  ;;  %v184_v33 = vld [vmem:[#allocation7 + $0xa0] sm:$0xff]  ;;  %v182_v34 = vld [vmem:[#allocation7 + $0x90] sm:$0xff] }
  0x32   :  { %v4030_v32 = vpack.c.bf16 %v187_v30, %v183_v29  ;;  %v186_v35 = vld [vmem:[#allocation7 + $0xb0] sm:$0xff]  ;;  %v4000_v36 = vpack.c.bf16 %v184_v33, %v180_v31  ;;  %v189_v37 = vld [vmem:[#allocation7 + $0xc8] sm:$0xff]  ;;  %v191_v39 = vld [vmem:[#allocation7 + $0xd8] sm:$0xff] }
  0x33   :  { %3997 = vmatpush1.bf16.msra.mxu0 %v3996_v23  ;;  %v193_v38 = vld [vmem:[#allocation7 + $0xe8] sm:$0xff]  ;;  %v4032_v40 = vpack.c.bf16 %v186_v35, %v182_v34  ;;  %v195_v42 = vld [vmem:[#allocation7 + $0xf8] sm:$0xff]  ;;  %v188_v43 = vld [vmem:[#allocation7 + $0xc0] sm:$0xff] }
  0x34   :  { %4029 = vmatpush1.bf16.msra.mxu1 %v4028_v27  ;;  %3999 = vmatprep.subr.bf16.mxu0 %v3998_v28  ;;  %v4002_v41 = vpack.c.bf16 %v193_v38, %v189_v37  ;;  %v192_v44 = vld [vmem:[#allocation7 + $0xe0] sm:$0xff]  ;;  %v4034_v45 = vpack.c.bf16 %v195_v42, %v191_v39  ;;  %v190_v46 = vld [vmem:[#allocation7 + $0xd0] sm:$0xff]  ;;  %v197_v48 = vld [vmem:[#allocation7 + $0x108] sm:$0xff] }
  0x35   :  { %4031 = vmatprep.subr.bf16.mxu1 %v4030_v32  ;;  %v194_v47 = vld [vmem:[#allocation7 + $0xf0] sm:$0xff]  ;;  %v201_v49 = vld [vmem:[#allocation7 + $0x128] sm:$0xff]  ;;  %v199_v50 = vld [vmem:[#allocation7 + $0x118] sm:$0xff]  ;;  %v4004_v52 = vpack.c.bf16 %v192_v44, %v188_v43 }
  0x36   :  { %v203_v51 = vld [vmem:[#allocation7 + $0x138] sm:$0xff]  ;;  %v4036_v53 = vpack.c.bf16 %v194_v47, %v190_v46  ;;  %v4006_v54 = vpack.c.bf16 %v201_v49, %v197_v48  ;;  %v196_v55 = vld [vmem:[#allocation7 + $0x100] sm:$0xff]  ;;  %v198_v57 = vld [vmem:[#allocation7 + $0x110] sm:$0xff] }
  0x37   :  { %4001 = vmatpush1.bf16.msra.mxu0 %v4000_v36  ;;  %v200_v56 = vld [vmem:[#allocation7 + $0x120] sm:$0xff]  ;;  %v4038_v58 = vpack.c.bf16 %v203_v51, %v199_v50  ;;  %v202_v59 = vld [vmem:[#allocation7 + $0x130] sm:$0xff]  ;;  %v205_v60 = vld [vmem:[#allocation7 + $0x148] sm:$0xff] }
  0x38   :  { %4033 = vmatpush1.bf16.msra.mxu1 %v4032_v40  ;;  %4003 = vmatprep.subr.bf16.mxu0 %v4002_v41  ;;  %v209_v61 = vld [vmem:[#allocation7 + $0x168] sm:$0xff]  ;;  %v207_v62 = vld [vmem:[#allocation7 + $0x158] sm:$0xff]  ;;  %v4008_v0 = vpack.c.bf16 %v200_v56, %v196_v55  ;;  %v4040_v2 = vpack.c.bf16 %v202_v59, %v198_v57  ;;  %v204_v4 = vld [vmem:[#allocation7 + $0x140] sm:$0xff] }
  0x39   :  { %4035 = vmatprep.subr.bf16.mxu1 %v4034_v45  ;;  %v211_v63 = vld [vmem:[#allocation7 + $0x178] sm:$0xff]  ;;  %v4010_v3 = vpack.c.bf16 %v209_v61, %v205_v60  ;;  %v208_v5 = vld [vmem:[#allocation7 + $0x160] sm:$0xff]  ;;  %v206_v6 = vld [vmem:[#allocation7 + $0x150] sm:$0xff] }
  0x3a   :  { %v4042_v7 = vpack.c.bf16 %v211_v63, %v207_v62  ;;  %v210_v8 = vld [vmem:[#allocation7 + $0x170] sm:$0xff]  ;;  %v213_v9 = vld [vmem:[#allocation7 + $0x188] sm:$0xff]  ;;  %v215_v11 = vld [vmem:[#allocation7 + $0x198] sm:$0xff]  ;;  %v4012_v13 = vpack.c.bf16 %v208_v5, %v204_v4 }
  0x3b   :  { %4005 = vmatpush1.bf16.msra.mxu0 %v4004_v52  ;;  %v217_v10 = vld [vmem:[#allocation7 + $0x1a8] sm:$0xff]  ;;  %v219_v12 = vld [vmem:[#allocation7 + $0x1b8] sm:$0xff]  ;;  %v4044_v14 = vpack.c.bf16 %v210_v8, %v206_v6  ;;  %v212_v16 = vld [vmem:[#allocation7 + $0x180] sm:$0xff] }
  0x3c   :  { %4037 = vmatpush1.bf16.msra.mxu1 %v4036_v53  ;;  %4007 = vmatprep.subr.bf16.mxu0 %v4006_v54  ;;  %v4014_v15 = vpack.c.bf16 %v217_v10, %v213_v9  ;;  %v216_v17 = vld [vmem:[#allocation7 + $0x1a0] sm:$0xff]  ;;  %v214_v18 = vld [vmem:[#allocation7 + $0x190] sm:$0xff]  ;;  %v4046_v19 = vpack.c.bf16 %v219_v12, %v215_v11  ;;  %v221_v21 = vld [vmem:[#allocation7 + $0x1c8] sm:$0xff] }
  0x3d   :  { %4039 = vmatprep.subr.bf16.mxu1 %v4038_v58  ;;  %v218_v20 = vld [vmem:[#allocation7 + $0x1b0] sm:$0xff]  ;;  %v225_v22 = vld [vmem:[#allocation7 + $0x1e8] sm:$0xff]  ;;  %v223_v23 = vld [vmem:[#allocation7 + $0x1d8] sm:$0xff]  ;;  %v4016_v25 = vpack.c.bf16 %v216_v17, %v212_v16 }
  0x3e   :  { %v227_v24 = vld [vmem:[#allocation7 + $0x1f8] sm:$0xff]  ;;  %v4048_v26 = vpack.c.bf16 %v218_v20, %v214_v18  ;;  %v4018_v27 = vpack.c.bf16 %v225_v22, %v221_v21  ;;  %v220_v28 = vld [vmem:[#allocation7 + $0x1c0] sm:$0xff]  ;;  %v222_v30 = vld [vmem:[#allocation7 + $0x1d0] sm:$0xff] }
  0x3f   :  { %4009 = vmatpush1.bf16.msra.mxu0 %v4008_v0  ;;  %v224_v29 = vld [vmem:[#allocation7 + $0x1e0] sm:$0xff]  ;;  %v4050_v31 = vpack.c.bf16 %v227_v24, %v223_v23  ;;  %v226_v32 = vld [vmem:[#allocation7 + $0x1f0] sm:$0xff]  ;;  %v93_v33 = vld [vmem:[#allocation10 + $0x8] sm:$0xff] }
  0x40   :  { %4041 = vmatpush1.bf16.msra.mxu1 %v4040_v2  ;;  %4011 = vmatprep.subr.bf16.mxu0 %v4010_v3  ;;  %v97_v34 = vld [vmem:[#allocation10 + $0x28] sm:$0xff]  ;;  %v95_v35 = vld [vmem:[#allocation10 + $0x18] sm:$0xff]  ;;  %v4020_v37 = vpack.c.bf16 %v224_v29, %v220_v28  ;;  %v4052_v38 = vpack.c.bf16 %v226_v32, %v222_v30  ;;  %v92_v40 = vld [vmem:[#allocation10] sm:$0xff] }
  0x41   :  { %4043 = vmatprep.subr.bf16.mxu1 %v4042_v7  ;;  %v99_v36 = vld [vmem:[#allocation10 + $0x38] sm:$0xff]  ;;  %v5752_v39 = vpack.c.bf16 %v97_v34, %v93_v33  ;;  %v96_v41 = vld [vmem:[#allocation10 + $0x20] sm:$0xff]  ;;  %v94_v43 = vld [vmem:[#allocation10 + $0x10] sm:$0xff] }
  0x42   :  { %v5754_v42 = vpack.c.bf16 %v99_v36, %v95_v35  ;;  %v98_v44 = vld [vmem:[#allocation10 + $0x30] sm:$0xff]  ;;  %v101_v45 = vld [vmem:[#allocation10 + $0x48] sm:$0xff]  ;;  %v76_v47 = vld [vmem:[%s6779_s0] sm:$0xff]  ;;  %v5759_v48 = vpack.c.bf16 %v96_v41, %v92_v40 }
  0x43   :  { %4013 = vmatpush1.bf16.msra.mxu0 %v4012_v13  ;;  %v105_v46 = vld [vmem:[#allocation10 + $0x68] sm:$0xff]  ;;  %v103_v49 = vld [vmem:[#allocation10 + $0x58] sm:$0xff]  ;;  %v5762_v51 = vpack.c.bf16 %v98_v44, %v94_v43  ;;  %v100_v52 = vld [vmem:[#allocation10 + $0x40] sm:$0xff] }
  0x44   :  { %4045 = vmatpush1.bf16.msra.mxu1 %v4044_v14  ;;  %4015 = vmatprep.subr.bf16.mxu0 %v4014_v15  ;;  %v107_v50 = vld [vmem:[#allocation10 + $0x78] sm:$0xff]  ;;  %v104_v53 = vld [vmem:[#allocation10 + $0x60] sm:$0xff]  ;;  %v5765_v54 = vpack.c.bf16 %v105_v46, %v101_v45  ;;  %v102_v55 = vld [vmem:[#allocation10 + $0x50] sm:$0xff] }
  0x45   :  { %4047 = vmatprep.subr.bf16.mxu1 %v4046_v19  ;;  %v106_v56 = vld [vmem:[#allocation10 + $0x70] sm:$0xff]  ;;  %v5767_v57 = vpack.c.bf16 %v107_v50, %v103_v49  ;;  %v109_v58 = vld [vmem:[#allocation10 + $0x88] sm:$0xff]  ;;  %v5773_v61 = vpack.c.bf16 %v104_v53, %v100_v52  ;;  %v111_v62 = vld [vmem:[#allocation10 + $0x98] sm:$0xff] }
  0x46   :  { %v113_v59 = vld [vmem:[#allocation10 + $0xa8] sm:$0xff]  ;;  %v115_v63 = vld [vmem:[#allocation10 + $0xb8] sm:$0xff]  ;;  %v5777_v0 = vpack.c.bf16 %v106_v56, %v102_v55  ;;  %v108_v2 = vld [vmem:[#allocation10 + $0x80] sm:$0xff] }
  0x47   :  { %4017 = vmatpush1.bf16.msra.mxu0 %v4016_v25  ;;  %v77_v60 = vld [vmem:[%s6779_s0 + $0x8] sm:$0xff]  ;;  %v5781_v4 = vpack.c.bf16 %v113_v59, %v109_v58  ;;  %v110_v5 = vld [vmem:[#allocation10 + $0x90] sm:$0xff]  ;;  %v5784_v7 = vpack.c.bf16 %v115_v63, %v111_v62  ;;  %v119_v12 = vld [vmem:[#allocation10 + $0xd8] sm:$0xff] }
  0x48   :  { %4049 = vmatpush1.bf16.msra.mxu1 %v4048_v26  ;;  %4019 = vmatprep.subr.bf16.mxu0 %v4018_v27  ;;  %v112_v3 = vld [vmem:[#allocation10 + $0xa0] sm:$0xff]  ;;  %v114_v6 = vld [vmem:[#allocation10 + $0xb0] sm:$0xff]  ;;  %v117_v8 = vld [vmem:[#allocation10 + $0xc8] sm:$0xff] }
  0x49   :  { %4051 = vmatprep.subr.bf16.mxu1 %v4050_v31  ;;  %v121_v9 = vld [vmem:[#allocation10 + $0xe8] sm:$0xff]  ;;  %v5790_v11 = vpack.c.bf16 %v112_v3, %v108_v2  ;;  %v123_v13 = vld [vmem:[#allocation10 + $0xf8] sm:$0xff]  ;;  %v5794_v14 = vpack.c.bf16 %v114_v6, %v110_v5  ;;  %v116_v15 = vld [vmem:[#allocation10 + $0xc0] sm:$0xff] }
  0x4a   :  { %v78_v10 = vld [vmem:[%s6779_s0 + $0x10] sm:$0xff]  ;;  %v120_v16 = vld [vmem:[#allocation10 + $0xe0] sm:$0xff]  ;;  %v5798_v17 = vpack.c.bf16 %v121_v9, %v117_v8  ;;  %v5801_v20 = vpack.c.bf16 %v123_v13, %v119_v12  ;;  %v79_v23 = vld [vmem:[%s6779_s0 + $0x18] sm:$0xff] }
  0x4b   :  { %4021 = vmatpush1.bf16.msra.mxu0 %v4020_v37  ;;  %v118_v18 = vld [vmem:[#allocation10 + $0xd0] sm:$0xff]  ;;  %v125_v21 = vld [vmem:[#allocation10 + $0x108] sm:$0xff]  ;;  %v5807_v24 = vpack.c.bf16 %v120_v16, %v116_v15  ;;  %v127_v25 = vld [vmem:[#allocation10 + $0x118] sm:$0xff] }
  0x4c   :  { %4053 = vmatpush1.bf16.msra.mxu1 %v4052_v38  ;;  %4055 = vmatprep.subr.bf16.mxu0 %v5752_v39  ;;  %v122_v19 = vld [vmem:[#allocation10 + $0xf0] sm:$0xff]  ;;  %v129_v22 = vld [vmem:[#allocation10 + $0x128] sm:$0xff]  ;;  %v131_v26 = vld [vmem:[#allocation10 + $0x138] sm:$0xff] }
  0x4d   :  { %4087 = vmatprep.subr.bf16.mxu1 %v5754_v42  ;;  %v5811_v27 = vpack.c.bf16 %v122_v19, %v118_v18  ;;  %v124_v28 = vld [vmem:[#allocation10 + $0x100] sm:$0xff]  ;;  %v5815_v30 = vpack.c.bf16 %v129_v22, %v125_v21  ;;  %v126_v31 = vld [vmem:[#allocation10 + $0x110] sm:$0xff]  ;;  %v5818_v33 = vpack.c.bf16 %v131_v26, %v127_v25  ;;  %v133_v34 = vld [vmem:[#allocation10 + $0x148] sm:$0xff] }
  0x4e   :  { %315 = vmatmul.mubr.f32.vlgmr.msra.gmra.mrb[0].mxu0 %v76_v47  ;;  %v128_v29 = vld [vmem:[#allocation10 + $0x120] sm:$0xff]  ;;  %v130_v32 = vld [vmem:[#allocation10 + $0x130] sm:$0xff]  ;;  %v137_v35 = vld [vmem:[#allocation10 + $0x168] sm:$0xff] }
  0x4f   :  { %428 = vmatmul.mubr.f32.vlgmr.msra.gmra.mrb[0].mxu1 %v76_v47  ;;  %4057 = vmatpush1.bf16.msra.mxu0 %v5759_v48  ;;  %v80_v36 = vld [vmem:[%s6779_s0 + $0x20] sm:$0xff]  ;;  %v5824_v37 = vpack.c.bf16 %v128_v29, %v124_v28  ;;  %v5828_v41 = vpack.c.bf16 %v130_v32, %v126_v31  ;;  %v5832_v45 = vpack.c.bf16 %v137_v35, %v133_v34  ;;  %v134_v46 = vld [vmem:[#allocation10 + $0x150] sm:$0xff]  ;;  %v141_v50 = vld [vmem:[#allocation10 + $0x188] sm:$0xff]  ;;  %v230_v31 = vlaneseq }
  0x50   :  { %4089 = vmatpush1.bf16.msra.mxu1 %v5762_v51  ;;  %320 = vmatprep.mubr.f32.mxu0 %v5661_v1  ;;  %v135_v38 = vld [vmem:[#allocation10 + $0x158] sm:$0xff]  ;;  %v132_v43 = vld [vmem:[#allocation10 + $0x140] sm:$0xff]  ;;  %v138_v47 = vld [vmem:[#allocation10 + $0x170] sm:$0xff] }
  0x51   :  { %433 = vmatprep.mubr.f32.mxu1 %v5661_v1  ;;  %4059 = vmatprep.subr.bf16.mxu0 %v5765_v54  ;;  %v139_v40 = vld [vmem:[#allocation10 + $0x178] sm:$0xff]  ;;  %v136_v44 = vld [vmem:[#allocation10 + $0x160] sm:$0xff]  ;;  %v145_v52 = vld [vmem:[#allocation10 + $0x1a8] sm:$0xff]  ;;  %v5845_v59 = vpack.c.bf16 %v138_v47, %v134_v46  ;;  %v5927_v32 = vshrl.u32 %v230_v31, 7 }
  0x52   :  { %321 = vmatmul.mubr.f32.gmra.mrb[2].mxu0 %v77_v60  ;;  %4091 = vmatprep.subr.bf16.mxu1 %v5767_v57  ;;  %v5835_v49 = vpack.c.bf16 %v139_v40, %v135_v38  ;;  %v81_v53 = vld [vmem:[%s6779_s0 + $0x28] sm:$0xff]  ;;  %v5841_v55 = vpack.c.bf16 %v136_v44, %v132_v43  ;;  %v143_v56 = vld [vmem:[#allocation10 + $0x198] sm:$0xff]  ;;  %v5849_v63 = vpack.c.bf16 %v145_v52, %v141_v50  ;;  %v142_v2 = vld [vmem:[#allocation10 + $0x190] sm:$0xff] }
  0x53   :  { %434 = vmatmul.mubr.f32.gmra.mrb[2].mxu1 %v77_v60  ;;  %4061 = vmatpush1.bf16.msra.mxu0 %v5773_v61  ;;  %v147_v58 = vld [vmem:[#allocation10 + $0x1b8] sm:$0xff]  ;;  %v140_v60 = vld [vmem:[#allocation10 + $0x180] sm:$0xff]  ;;  %v146_v3 = vld [vmem:[#allocation10 + $0x1b0] sm:$0xff]  ;;  %v232_v34 = vsub.s32 0, %v5927_v32  ;;  %v244_v44 = vsub.s32 3, %v5927_v32 }
  0x54   :  { %4093 = vmatpush1.bf16.msra.mxu1 %v5777_v0  ;;  %326 = vmatprep.mubr.f32.mxu0 %v5661_v1  ;;  %v144_v62 = vld [vmem:[#allocation10 + $0x1a0] sm:$0xff]  ;;  %v5852_v5 = vpack.c.bf16 %v147_v58, %v143_v56  ;;  %v149_v6 = vld [vmem:[#allocation10 + $0x1c8] sm:$0xff]  ;;  %v151_v12 = vld [vmem:[#allocation10 + $0x1d8] sm:$0xff]  ;;  %v5862_v15 = vpack.c.bf16 %v146_v3, %v142_v2 }
  0x55   :  { %439 = vmatprep.mubr.f32.mxu1 %v5661_v1  ;;  %4063 = vmatprep.subr.bf16.mxu0 %v5781_v4  ;;  %v153_v8 = vld [vmem:[#allocation10 + $0x1e8] sm:$0xff]  ;;  %v155_v13 = vld [vmem:[#allocation10 + $0x1f8] sm:$0xff]  ;;  %v148_v16 = vld [vmem:[#allocation10 + $0x1c0] sm:$0xff] }
  0x56   :  { %327 = vmatmul.mubr.f32.gmra.mrb[4].mxu0 %v78_v10  ;;  %4095 = vmatprep.subr.bf16.mxu1 %v5784_v7  ;;  %v82_v9 = vld [vmem:[%s6779_s0 + $0x30] sm:$0xff]  ;;  %v152_v18 = vld [vmem:[#allocation10 + $0x1e0] sm:$0xff]  ;;  %v5866_v19 = vpack.c.bf16 %v153_v8, %v149_v6  ;;  %v83_v25 = vld [vmem:[%s6779_s0 + $0x38] sm:$0xff] }
  0x57   :  { %440 = vmatmul.mubr.f32.gmra.mrb[4].mxu1 %v78_v10  ;;  %4065 = vmatpush1.bf16.msra.mxu0 %v5790_v11  ;;  %v5858_v10 = vpack.c.bf16 %v144_v62, %v140_v60  ;;  %v150_v21 = vld [vmem:[#allocation10 + $0x1d0] sm:$0xff]  ;;  %v5875_v26 = vpack.c.bf16 %v152_v18, %v148_v16  ;;  %v68_v29 = vld [vmem:[%s6780_s1] sm:$0xff]  ;;  %v240_v62 = vsub.s32 2, %v5927_v32 }
  0x58   :  { %4097 = vmatpush1.bf16.msra.mxu1 %v5794_v14  ;;  %332 = vmatprep.mubr.f32.mxu0 %v5661_v1  ;;  %v154_v22 = vld [vmem:[#allocation10 + $0x1f0] sm:$0xff]  ;;  %v228_v35 = vld [vmem:[%s6784_s5] sm:$0xf] }
  0x59   :  { %445 = vmatprep.mubr.f32.mxu1 %v5661_v1  ;;  %4067 = vmatprep.subr.bf16.mxu0 %v5798_v17  ;;  %v5879_v28 = vpack.c.bf16 %v154_v22, %v150_v21  ;;  %v5936_v38 = vrot.slane %v228_v35, %v232_v34  ;;  %v5947_v60 = vrot.slane %v228_v35, %v244_v44  ;;  %v72_v22 = vld [vmem:[%s6781_s2] sm:$0xff] }
  0x5a   :  { %333 = vmatmul.mubr.f32.gmra.mrb[6].mxu0 %v79_v23  ;;  %4099 = vmatprep.subr.bf16.mxu1 %v5801_v20  ;;  %v5953_v3 = vrot.slane %v228_v35, %v240_v62 }
  0x5b   :  { %446 = vmatmul.mubr.f32.gmra.mrb[6].mxu1 %v79_v23  ;;  %4069 = vmatpush1.bf16.msra.mxu0 %v5807_v24  ;;  %v5869_v23 = vpack.c.bf16 %v155_v13, %v151_v12 }
  0x5c   :  { %4101 = vmatpush1.bf16.msra.mxu1 %v5811_v27  ;;  %338 = vmatprep.mubr.f32.mxu0 %v5661_v1 }
  0x5d   :  { %451 = vmatprep.mubr.f32.mxu1 %v5661_v1  ;;  %4071 = vmatprep.subr.bf16.mxu0 %v5815_v30 }
  0x5e   :  { %339 = vmatmul.mubr.f32.gmra.mrb[8].mxu0 %v80_v36  ;;  %4103 = vmatprep.subr.bf16.mxu1 %v5818_v33 }
  0x5f   :  { %452 = vmatmul.mubr.f32.gmra.mrb[8].mxu1 %v80_v36  ;;  %4073 = vmatpush1.bf16.msra.mxu0 %v5824_v37  ;;  %v236_v36 = vsub.s32 1, %v5927_v32 }
  0x60   :  { %4105 = vmatpush1.bf16.msra.mxu1 %v5828_v41  ;;  %344 = vmatprep.mubr.f32.mxu0 %v5661_v1 }
  0x61   :  { %457 = vmatprep.mubr.f32.mxu1 %v5661_v1  ;;  %4075 = vmatprep.subr.bf16.mxu0 %v5832_v45  ;;  %v5940_v40 = vrot.slane %v228_v35, %v236_v36 }
  0x62   :  { %345 = vmatmul.mubr.f32.gmra.mrb[10].mxu0 %v81_v53  ;;  %4107 = vmatprep.subr.bf16.mxu1 %v5835_v49 }
  0x63   :  { %458 = vmatmul.mubr.f32.gmra.mrb[10].mxu1 %v81_v53  ;;  %4077 = vmatpush1.bf16.msra.mxu0 %v5841_v55 }
  0x64   :  { %4109 = vmatpush1.bf16.msra.mxu1 %v5845_v59  ;;  %350 = vmatprep.mubr.f32.mxu0 %v5661_v1 }
  0x65   :  { %463 = vmatprep.mubr.f32.mxu1 %v5661_v1  ;;  %4079 = vmatprep.subr.bf16.mxu0 %v5849_v63 }
  0x66   :  { %351 = vmatmul.mubr.f32.gmra.mrb[12].mxu0 %v82_v9  ;;  %4111 = vmatprep.subr.bf16.mxu1 %v5852_v5 }
  0x67   :  { %464 = vmatmul.mubr.f32.gmra.mrb[12].mxu1 %v82_v9  ;;  %4081 = vmatpush1.bf16.msra.mxu0 %v5858_v10 }
  0x68   :  { %4113 = vmatpush1.bf16.msra.mxu1 %v5862_v15  ;;  %356 = vmatprep.mubr.f32.mxu0 %v5661_v1 }
  0x69   :  { %469 = vmatprep.mubr.f32.mxu1 %v5661_v1  ;;  %4083 = vmatprep.subr.bf16.mxu0 %v5866_v19 }
  0x6a   :  { %357 = vmatmul.mubr.f32.gmra.mrb[14].mxu0 %v83_v25  ;;  %4115 = vmatprep.subr.bf16.mxu1 %v5869_v23 }
  0x6b   :  { %470 = vmatmul.mubr.f32.gmra.mrb[14].mxu1 %v83_v25  ;;  %4085 = vmatpush1.bf16.msra.mxu0 %v5875_v26 }
  0x6c   :  { %4117 = vmatpush1.bf16.msra.mxu1 %v5879_v28  ;;  %578 = vmatprep.mubr.f32.mxu0 %v5661_v1 }
  0x6d   :  { %649 = vmatprep.mubr.f32.mxu1 %v5661_v1  ;;  %4119 = vmatprep.subr.bf16.mxu0 %v5752_v39 }
  0x6e   :  { %579 = vmatmul.mubr.f32.vlgmr.msra.gmra.mrb[0].mxu0 %v68_v29  ;;  %4151 = vmatprep.subr.bf16.mxu1 %v5754_v42 }
  0x6f   :  { %650 = vmatmul.mubr.f32.vlgmr.msra.gmra.mrb[0].mxu1 %v68_v29  ;;  %4121 = vmatpush1.bf16.msra.mxu0 %v5759_v48 }
  0x70   :  { %4153 = vmatpush1.bf16.msra.mxu1 %v5762_v51  ;;  %4123 = vmatprep.subr.bf16.mxu0 %v5765_v54 }
  0x71   :  { %4155 = vmatprep.subr.bf16.mxu1 %v5767_v57  ;;  %754 = vmatprep.mubr.f32.mxu0 %v5661_v1 }
  0x72   :  { %825 = vmatprep.mubr.f32.mxu1 %v5661_v1 }
  0x73   :  { %4125 = vmatpush1.bf16.msra.mxu0 %v5773_v61 }
  0x74   :  { %4157 = vmatpush1.bf16.msra.mxu1 %v5777_v0  ;;  %4127 = vmatprep.subr.bf16.mxu0 %v5781_v4 }
  0x75   :  { %4159 = vmatprep.subr.bf16.mxu1 %v5784_v7 }
  0x77   :  { %4129 = vmatpush1.bf16.msra.mxu0 %v5790_v11 }
  0x78   :  { %4161 = vmatpush1.bf16.msra.mxu1 %v5794_v14  ;;  %4131 = vmatprep.subr.bf16.mxu0 %v5798_v17 }
  0x79   :  { %4163 = vmatprep.subr.bf16.mxu1 %v5801_v20 }
  0x7b   :  { %4133 = vmatpush1.bf16.msra.mxu0 %v5807_v24 }
  0x7c   :  { %4165 = vmatpush1.bf16.msra.mxu1 %v5811_v27  ;;  %4135 = vmatprep.subr.bf16.mxu0 %v5815_v30 }
  0x7d   :  { %4167 = vmatprep.subr.bf16.mxu1 %v5818_v33 }
  0x7f   :  { %4137 = vmatpush1.bf16.msra.mxu0 %v5824_v37 }
  0x80   :  { %4169 = vmatpush1.bf16.msra.mxu1 %v5828_v41  ;;  %4139 = vmatprep.subr.bf16.mxu0 %v5832_v45 }
  0x81   :  { %4171 = vmatprep.subr.bf16.mxu1 %v5835_v49 }
  0x83   :  { %4141 = vmatpush1.bf16.msra.mxu0 %v5841_v55 }
  0x84   :  { %4173 = vmatpush1.bf16.msra.mxu1 %v5845_v59  ;;  %4143 = vmatprep.subr.bf16.mxu0 %v5849_v63 }
  0x85   :  { %4175 = vmatprep.subr.bf16.mxu1 %v5852_v5 }
  0x87   :  { %4145 = vmatpush1.bf16.msra.mxu0 %v5858_v10 }
  0x88   :  { %4177 = vmatpush1.bf16.msra.mxu1 %v5862_v15  ;;  %4147 = vmatprep.subr.bf16.mxu0 %v5866_v19 }
  0x89   :  { %4179 = vmatprep.subr.bf16.mxu1 %v5869_v23 }
  0x8b   :  { %4149 = vmatpush1.bf16.msra.mxu0 %v5875_v26 }
  0x8c   :  { %4181 = vmatpush1.bf16.msra.mxu1 %v5879_v28  ;;  %4183 = vmatprep.subr.bf16.mxu0 %v5752_v39 }
  0x8d   :  { %4215 = vmatprep.subr.bf16.mxu1 %v5754_v42 }
 0x141   :  { %v580_v43 = vpop.f32.mrb[0].mxu0 }
 0x142   :  { %v5166_v46 = vadd.f32 %v580_v43, %v5936_v38  ;;  %v651_v47 = vpop.f32.mrb[0].mxu1  ;;  %v582_v50 = vpop.f32.mrb[1].mxu0 }
 0x143   :  { %v5167_v52 = vadd.f32 %v582_v50, %v5940_v40  ;;  %v653_v53 = vpop.f32.mrb[1].mxu1  ;;  %v5182_v8 = vadd.f32 %v651_v47, %v5953_v3 }
 0x144   :  { %v3888_v56 = vmul.f32 -1.442695, %v5166_v46  ;;  %v5183_v2 = vadd.f32 %v653_v53, %v5947_v60 }
 0x145   :  { %v3889_v58 = vmul.f32 -1.442695, %v5167_v52 }
 0x146   :  { %5305 = vpow2.f32 %v3888_v56  ;;  %v3890_v6 = vmul.f32 -1.442695, %v5183_v2 }
 0x147   :  { %5307 = vpow2.f32 %v3889_v58 }
 0x148   :  { %5309 = vpow2.f32 %v3890_v6 }
 0x149   :  { %5311 = vtanh.f32 %v5182_v8 }
 0x150   :  { %v5306_v9 = vpop.eup %5305 }
 0x151   :  { %v5308_v12 = vpop.eup %5307  ;;  %v663_v13 = vadd.f32 1.0, %v5306_v9 }
 0x152   :  { %v669_v16 = vadd.f32 1.0, %v5308_v12  ;;  %v5310_v18 = vpop.eup %5309 }
 0x153   :  { %5313 = vrcp.f32 %v663_v13  ;;  %v5312_v21 = vpop.eup %5311  ;;  %v676_v35 = vadd.f32 1.0, %v5310_v18 }
 0x154   :  { %5315 = vrcp.f32 %v669_v16 }
 0x155   :  { %5317 = vrcp.f32 %v676_v35 }
 0x15d   :  { %v5314_v25 = vpop.eup %5313 }
 0x15e   :  { %v5316_v29 = vpop.eup %5315  ;;  %v680_v31 = vmul.f32 %v5314_v25, %v5312_v21 }
 0x15f   :  { %v679_v43 = vmul.f32 %v5316_v29, %v72_v22  ;;  %v5318_v47 = vpop.eup %5317 }
 0x161   :  { %v5959_v46 = vadd.f32 %v680_v31, %v679_v43 }
 0x163   :  { %5319 = vtanh.f32 %v5959_v46 }
 0x16d   :  { %v5320_v50 = vpop.eup %5319 }
 0x16e   :  { %v5962_v52 = vmul.f32 %v5320_v50, %v5318_v47 }
 0x170   :  { %755 = vmatmul.mubr.f32.vlgmr.msra.gmra.mrb[2].mxu0 %v5962_v52  ;;  %826 = vmatmul.mubr.f32.vlgmr.msra.gmra.mrb[2].mxu1 %v5962_v52 }
 0x171   :  { %4185 = vmatpush1.bf16.msra.mxu0 %v5759_v48  ;;  %4217 = vmatpush1.bf16.msra.mxu1 %v5762_v51 }
 0x172   :  { %4187 = vmatprep.subr.bf16.mxu0 %v5765_v54  ;;  %4219 = vmatprep.subr.bf16.mxu1 %v5767_v57 }
 0x173   :  { %931 = vmatprep.mubr.f32.mxu0 %v5661_v1  ;;  %1002 = vmatprep.mubr.f32.mxu1 %v5661_v1 }
 0x175   :  { %4189 = vmatpush1.bf16.msra.mxu0 %v5773_v61  ;;  %4221 = vmatpush1.bf16.msra.mxu1 %v5777_v0 }
 0x176   :  { %4191 = vmatprep.subr.bf16.mxu0 %v5781_v4  ;;  %4223 = vmatprep.subr.bf16.mxu1 %v5784_v7 }
 0x179   :  { %4193 = vmatpush1.bf16.msra.mxu0 %v5790_v11  ;;  %4225 = vmatpush1.bf16.msra.mxu1 %v5794_v14 }
 0x17a   :  { %4195 = vmatprep.subr.bf16.mxu0 %v5798_v17  ;;  %4227 = vmatprep.subr.bf16.mxu1 %v5801_v20 }
 0x17d   :  { %4197 = vmatpush1.bf16.msra.mxu0 %v5807_v24  ;;  %4229 = vmatpush1.bf16.msra.mxu1 %v5811_v27 }
 0x17e   :  { %4199 = vmatprep.subr.bf16.mxu0 %v5815_v30  ;;  %4231 = vmatprep.subr.bf16.mxu1 %v5818_v33 }
 0x181   :  { %4201 = vmatpush1.bf16.msra.mxu0 %v5824_v37  ;;  %4233 = vmatpush1.bf16.msra.mxu1 %v5828_v41 }
 0x182   :  { %4203 = vmatprep.subr.bf16.mxu0 %v5832_v45  ;;  %4235 = vmatprep.subr.bf16.mxu1 %v5835_v49 }
 0x185   :  { %4205 = vmatpush1.bf16.msra.mxu0 %v5841_v55  ;;  %4237 = vmatpush1.bf16.msra.mxu1 %v5845_v59 }
 0x186   :  { %4207 = vmatprep.subr.bf16.mxu0 %v5849_v63  ;;  %4239 = vmatprep.subr.bf16.mxu1 %v5852_v5 }
 0x189   :  { %4209 = vmatpush1.bf16.msra.mxu0 %v5858_v10  ;;  %4241 = vmatpush1.bf16.msra.mxu1 %v5862_v15 }
 0x18a   :  { %4211 = vmatprep.subr.bf16.mxu0 %v5866_v19  ;;  %4243 = vmatprep.subr.bf16.mxu1 %v5869_v23 }
 0x18d   :  { %4213 = vmatpush1.bf16.msra.mxu0 %v5875_v26  ;;  %4245 = vmatpush1.bf16.msra.mxu1 %v5879_v28 }
 0x18e   :  { %4247 = vmatprep.subr.bf16.mxu0 %v5752_v39  ;;  %4279 = vmatprep.subr.bf16.mxu1 %v5754_v42 }
 0x243   :  { %v756_v53 = vpop.f32.mrb[2].mxu0  ;;  %v827_v56 = vpop.f32.mrb[2].mxu1 }
 0x244   :  { %v5168_v58 = vadd.f32 %v756_v53, %v5936_v38  ;;  %v758_v2 = vpop.f32.mrb[3].mxu0  ;;  %v829_v6 = vpop.f32.mrb[3].mxu1  ;;  %v5184_v18 = vadd.f32 %v827_v56, %v5953_v3 }
 0x245   :  { %v5169_v8 = vadd.f32 %v758_v2, %v5940_v40  ;;  %v5185_v13 = vadd.f32 %v829_v6, %v5947_v60 }
 0x246   :  { %v3891_v9 = vmul.f32 -1.442695, %v5168_v58 }
 0x247   :  { %v3892_v12 = vmul.f32 -1.442695, %v5169_v8  ;;  %v3893_v16 = vmul.f32 -1.442695, %v5185_v13 }
 0x248   :  { %5321 = vpow2.f32 %v3891_v9 }
 0x249   :  { %5323 = vpow2.f32 %v3892_v12 }
 0x24a   :  { %5325 = vpow2.f32 %v3893_v16 }
 0x24b   :  { %5327 = vtanh.f32 %v5184_v18 }
 0x252   :  { %v5322_v21 = vpop.eup %5321 }
 0x253   :  { %v5324_v22 = vpop.eup %5323  ;;  %v839_v25 = vadd.f32 1.0, %v5322_v21 }
 0x254   :  { %v845_v29 = vadd.f32 1.0, %v5324_v22  ;;  %v5326_v31 = vpop.eup %5325 }
 0x255   :  { %5329 = vrcp.f32 %v839_v25  ;;  %v5328_v35 = vpop.eup %5327  ;;  %v852_v53 = vadd.f32 1.0, %v5326_v31 }
 0x256   :  { %5331 = vrcp.f32 %v845_v29 }
 0x257   :  { %5333 = vrcp.f32 %v852_v53 }
 0x25f   :  { %v5330_v43 = vpop.eup %5329 }
 0x260   :  { %v5332_v47 = vpop.eup %5331  ;;  %v856_v50 = vmul.f32 %v5330_v43, %v5328_v35 }
 0x261   :  { %v855_v58 = vmul.f32 %v5332_v47, %v5959_v46  ;;  %v5334_v56 = vpop.eup %5333 }
 0x263   :  { %v6005_v2 = vadd.f32 %v856_v50, %v855_v58 }
 0x265   :  { %5335 = vtanh.f32 %v6005_v2 }
 0x26f   :  { %v5336_v6 = vpop.eup %5335 }
 0x270   :  { %v6008_v8 = vmul.f32 %v5336_v6, %v5334_v56 }
 0x272   :  { %932 = vmatmul.mubr.f32.vlgmr.msra.gmra.mrb[4].mxu0 %v6008_v8  ;;  %1003 = vmatmul.mubr.f32.vlgmr.msra.gmra.mrb[4].mxu1 %v6008_v8 }
 0x273   :  { %4249 = vmatpush1.bf16.msra.mxu0 %v5759_v48  ;;  %4281 = vmatpush1.bf16.msra.mxu1 %v5762_v51 }
 0x274   :  { %4251 = vmatprep.subr.bf16.mxu0 %v5765_v54  ;;  %4283 = vmatprep.subr.bf16.mxu1 %v5767_v57 }
 0x275   :  { %1108 = vmatprep.mubr.f32.mxu0 %v5661_v1  ;;  %1179 = vmatprep.mubr.f32.mxu1 %v5661_v1 }
 0x277   :  { %4253 = vmatpush1.bf16.msra.mxu0 %v5773_v61  ;;  %4285 = vmatpush1.bf16.msra.mxu1 %v5777_v0 }
 0x278   :  { %4255 = vmatprep.subr.bf16.mxu0 %v5781_v4  ;;  %4287 = vmatprep.subr.bf16.mxu1 %v5784_v7 }
 0x27b   :  { %4257 = vmatpush1.bf16.msra.mxu0 %v5790_v11  ;;  %4289 = vmatpush1.bf16.msra.mxu1 %v5794_v14 }
 0x27c   :  { %4259 = vmatprep.subr.bf16.mxu0 %v5798_v17  ;;  %4291 = vmatprep.subr.bf16.mxu1 %v5801_v20 }
 0x27f   :  { %4261 = vmatpush1.bf16.msra.mxu0 %v5807_v24  ;;  %4293 = vmatpush1.bf16.msra.mxu1 %v5811_v27 }
 0x280   :  { %4263 = vmatprep.subr.bf16.mxu0 %v5815_v30  ;;  %4295 = vmatprep.subr.bf16.mxu1 %v5818_v33 }
 0x283   :  { %4265 = vmatpush1.bf16.msra.mxu0 %v5824_v37  ;;  %4297 = vmatpush1.bf16.msra.mxu1 %v5828_v41 }
 0x284   :  { %4267 = vmatprep.subr.bf16.mxu0 %v5832_v45  ;;  %4299 = vmatprep.subr.bf16.mxu1 %v5835_v49 }
 0x287   :  { %4269 = vmatpush1.bf16.msra.mxu0 %v5841_v55  ;;  %4301 = vmatpush1.bf16.msra.mxu1 %v5845_v59 }
 0x288   :  { %4271 = vmatprep.subr.bf16.mxu0 %v5849_v63  ;;  %4303 = vmatprep.subr.bf16.mxu1 %v5852_v5 }
 0x28b   :  { %4273 = vmatpush1.bf16.msra.mxu0 %v5858_v10  ;;  %4305 = vmatpush1.bf16.msra.mxu1 %v5862_v15 }
 0x28c   :  { %4275 = vmatprep.subr.bf16.mxu0 %v5866_v19  ;;  %4307 = vmatprep.subr.bf16.mxu1 %v5869_v23 }
 0x28f   :  { %4277 = vmatpush1.bf16.msra.mxu0 %v5875_v26  ;;  %4309 = vmatpush1.bf16.msra.mxu1 %v5879_v28 }
 0x290   :  { %4311 = vmatprep.subr.bf16.mxu0 %v5752_v39  ;;  %4343 = vmatprep.subr.bf16.mxu1 %v5754_v42 }
 0x345   :  { %v933_v46 = vpop.f32.mrb[4].mxu0  ;;  %v1004_v9 = vpop.f32.mrb[4].mxu1 }
 0x346   :  { %v5170_v12 = vadd.f32 %v933_v46, %v5936_v38  ;;  %v935_v13 = vpop.f32.mrb[5].mxu0  ;;  %v1006_v16 = vpop.f32.mrb[5].mxu1  ;;  %v5186_v31 = vadd.f32 %v1004_v9, %v5953_v3 }
 0x347   :  { %v5171_v18 = vadd.f32 %v935_v13, %v5940_v40  ;;  %v5187_v25 = vadd.f32 %v1006_v16, %v5947_v60 }
 0x348   :  { %v3894_v21 = vmul.f32 -1.442695, %v5170_v12 }
 0x349   :  { %v3895_v22 = vmul.f32 -1.442695, %v5171_v18  ;;  %v3896_v29 = vmul.f32 -1.442695, %v5187_v25 }
 0x34a   :  { %5337 = vpow2.f32 %v3894_v21 }
 0x34b   :  { %5339 = vpow2.f32 %v3895_v22 }
 0x34c   :  { %5341 = vpow2.f32 %v3896_v29 }
 0x34d   :  { %5343 = vtanh.f32 %v5186_v31 }
 0x354   :  { %v5338_v35 = vpop.eup %5337 }
 0x355   :  { %v5340_v43 = vpop.eup %5339  ;;  %v1016_v47 = vadd.f32 1.0, %v5338_v35 }
 0x356   :  { %v1022_v50 = vadd.f32 1.0, %v5340_v43  ;;  %v5342_v53 = vpop.eup %5341 }
 0x357   :  { %5345 = vrcp.f32 %v1016_v47  ;;  %v5344_v58 = vpop.eup %5343  ;;  %v1029_v12 = vadd.f32 1.0, %v5342_v53 }
 0x358   :  { %5347 = vrcp.f32 %v1022_v50 }
 0x359   :  { %5349 = vrcp.f32 %v1029_v12 }
 0x361   :  { %v5346_v56 = vpop.eup %5345 }
 0x362   :  { %v5348_v6 = vpop.eup %5347  ;;  %v1033_v46 = vmul.f32 %v5346_v56, %v5344_v58 }
 0x363   :  { %v1032_v13 = vmul.f32 %v5348_v6, %v6005_v2  ;;  %v5350_v9 = vpop.eup %5349 }
 0x365   :  { %v6051_v16 = vadd.f32 %v1033_v46, %v1032_v13 }
 0x367   :  { %5351 = vtanh.f32 %v6051_v16 }
 0x371   :  { %v5352_v18 = vpop.eup %5351 }
 0x372   :  { %v6054_v21 = vmul.f32 %v5352_v18, %v5350_v9 }
 0x374   :  { %1109 = vmatmul.mubr.f32.vlgmr.msra.gmra.mrb[6].mxu0 %v6054_v21  ;;  %1180 = vmatmul.mubr.f32.vlgmr.msra.gmra.mrb[6].mxu1 %v6054_v21 }
 0x375   :  { %4313 = vmatpush1.bf16.msra.mxu0 %v5759_v48  ;;  %4345 = vmatpush1.bf16.msra.mxu1 %v5762_v51 }
 0x376   :  { %4315 = vmatprep.subr.bf16.mxu0 %v5765_v54  ;;  %4347 = vmatprep.subr.bf16.mxu1 %v5767_v57 }
 0x377   :  { %1285 = vmatprep.mubr.f32.mxu0 %v5661_v1  ;;  %1356 = vmatprep.mubr.f32.mxu1 %v5661_v1 }
 0x379   :  { %4317 = vmatpush1.bf16.msra.mxu0 %v5773_v61  ;;  %4349 = vmatpush1.bf16.msra.mxu1 %v5777_v0 }
 0x37a   :  { %4319 = vmatprep.subr.bf16.mxu0 %v5781_v4  ;;  %4351 = vmatprep.subr.bf16.mxu1 %v5784_v7 }
 0x37d   :  { %4321 = vmatpush1.bf16.msra.mxu0 %v5790_v11  ;;  %4353 = vmatpush1.bf16.msra.mxu1 %v5794_v14 }
 0x37e   :  { %4323 = vmatprep.subr.bf16.mxu0 %v5798_v17  ;;  %4355 = vmatprep.subr.bf16.mxu1 %v5801_v20 }
 0x381   :  { %4325 = vmatpush1.bf16.msra.mxu0 %v5807_v24  ;;  %4357 = vmatpush1.bf16.msra.mxu1 %v5811_v27 }
 0x382   :  { %4327 = vmatprep.subr.bf16.mxu0 %v5815_v30  ;;  %4359 = vmatprep.subr.bf16.mxu1 %v5818_v33 }
 0x385   :  { %4329 = vmatpush1.bf16.msra.mxu0 %v5824_v37  ;;  %4361 = vmatpush1.bf16.msra.mxu1 %v5828_v41 }
 0x386   :  { %4331 = vmatprep.subr.bf16.mxu0 %v5832_v45  ;;  %4363 = vmatprep.subr.bf16.mxu1 %v5835_v49 }
 0x389   :  { %4333 = vmatpush1.bf16.msra.mxu0 %v5841_v55  ;;  %4365 = vmatpush1.bf16.msra.mxu1 %v5845_v59 }
 0x38a   :  { %4335 = vmatprep.subr.bf16.mxu0 %v5849_v63  ;;  %4367 = vmatprep.subr.bf16.mxu1 %v5852_v5 }
 0x38d   :  { %4337 = vmatpush1.bf16.msra.mxu0 %v5858_v10  ;;  %4369 = vmatpush1.bf16.msra.mxu1 %v5862_v15 }
 0x38e   :  { %4339 = vmatprep.subr.bf16.mxu0 %v5866_v19  ;;  %4371 = vmatprep.subr.bf16.mxu1 %v5869_v23 }
 0x391   :  { %4341 = vmatpush1.bf16.msra.mxu0 %v5875_v26  ;;  %4373 = vmatpush1.bf16.msra.mxu1 %v5879_v28 }
 0x392   :  { %4375 = vmatprep.subr.bf16.mxu0 %v5752_v39  ;;  %4407 = vmatprep.subr.bf16.mxu1 %v5754_v42 }
 0x447   :  { %v1110_v2 = vpop.f32.mrb[6].mxu0  ;;  %v1181_v22 = vpop.f32.mrb[6].mxu1 }
 0x448   :  { %v5172_v25 = vadd.f32 %v1110_v2, %v5936_v38  ;;  %v1112_v29 = vpop.f32.mrb[7].mxu0  ;;  %v1183_v31 = vpop.f32.mrb[7].mxu1  ;;  %v5188_v58 = vadd.f32 %v1181_v22, %v5953_v3 }
 0x449   :  { %v5173_v35 = vadd.f32 %v1112_v29, %v5940_v40  ;;  %v5189_v50 = vadd.f32 %v1183_v31, %v5947_v60 }
 0x44a   :  { %v3897_v43 = vmul.f32 -1.442695, %v5172_v25 }
 0x44b   :  { %v3898_v47 = vmul.f32 -1.442695, %v5173_v35  ;;  %v3899_v53 = vmul.f32 -1.442695, %v5189_v50 }
 0x44c   :  { %5353 = vpow2.f32 %v3897_v43 }
 0x44d   :  { %5355 = vpow2.f32 %v3898_v47 }
 0x44e   :  { %5357 = vpow2.f32 %v3899_v53 }
 0x44f   :  { %5359 = vtanh.f32 %v5188_v58 }
 0x456   :  { %v5354_v56 = vpop.eup %5353 }
 0x457   :  { %v5356_v6 = vpop.eup %5355  ;;  %v1193_v46 = vadd.f32 1.0, %v5354_v56 }
 0x458   :  { %v1199_v12 = vadd.f32 1.0, %v5356_v6  ;;  %v5358_v13 = vpop.eup %5357 }
 0x459   :  { %5361 = vrcp.f32 %v1193_v46  ;;  %v5360_v9 = vpop.eup %5359  ;;  %v1206_v29 = vadd.f32 1.0, %v5358_v13 }
 0x45a   :  { %5363 = vrcp.f32 %v1199_v12 }
 0x45b   :  { %5365 = vrcp.f32 %v1206_v29 }
 0x463   :  { %v5362_v18 = vpop.eup %5361 }
 0x464   :  { %v5364_v2 = vpop.eup %5363  ;;  %v1210_v25 = vmul.f32 %v5362_v18, %v5360_v9 }
 0x465   :  { %v1209_v35 = vmul.f32 %v5364_v2, %v6051_v16  ;;  %v5366_v22 = vpop.eup %5365 }
 0x467   :  { %v6097_v31 = vadd.f32 %v1210_v25, %v1209_v35 }
 0x469   :  { %5367 = vtanh.f32 %v6097_v31 }
 0x473   :  { %v5368_v43 = vpop.eup %5367 }
 0x474   :  { %v6100_v47 = vmul.f32 %v5368_v43, %v5366_v22 }
 0x476   :  { %1286 = vmatmul.mubr.f32.vlgmr.msra.gmra.mrb[8].mxu0 %v6100_v47  ;;  %1357 = vmatmul.mubr.f32.vlgmr.msra.gmra.mrb[8].mxu1 %v6100_v47 }
 0x477   :  { %4377 = vmatpush1.bf16.msra.mxu0 %v5759_v48  ;;  %4409 = vmatpush1.bf16.msra.mxu1 %v5762_v51 }
 0x478   :  { %4379 = vmatprep.subr.bf16.mxu0 %v5765_v54  ;;  %4411 = vmatprep.subr.bf16.mxu1 %v5767_v57 }
 0x479   :  { %1462 = vmatprep.mubr.f32.mxu0 %v5661_v1  ;;  %1533 = vmatprep.mubr.f32.mxu1 %v5661_v1 }
 0x47b   :  { %4381 = vmatpush1.bf16.msra.mxu0 %v5773_v61  ;;  %4413 = vmatpush1.bf16.msra.mxu1 %v5777_v0 }
 0x47c   :  { %4383 = vmatprep.subr.bf16.mxu0 %v5781_v4  ;;  %4415 = vmatprep.subr.bf16.mxu1 %v5784_v7 }
 0x47f   :  { %4385 = vmatpush1.bf16.msra.mxu0 %v5790_v11  ;;  %4417 = vmatpush1.bf16.msra.mxu1 %v5794_v14 }
 0x480   :  { %4387 = vmatprep.subr.bf16.mxu0 %v5798_v17  ;;  %4419 = vmatprep.subr.bf16.mxu1 %v5801_v20 }
 0x483   :  { %4389 = vmatpush1.bf16.msra.mxu0 %v5807_v24  ;;  %4421 = vmatpush1.bf16.msra.mxu1 %v5811_v27 }
 0x484   :  { %4391 = vmatprep.subr.bf16.mxu0 %v5815_v30  ;;  %4423 = vmatprep.subr.bf16.mxu1 %v5818_v33 }
 0x487   :  { %4393 = vmatpush1.bf16.msra.mxu0 %v5824_v37  ;;  %4425 = vmatpush1.bf16.msra.mxu1 %v5828_v41 }
 0x488   :  { %4395 = vmatprep.subr.bf16.mxu0 %v5832_v45  ;;  %4427 = vmatprep.subr.bf16.mxu1 %v5835_v49 }
 0x48b   :  { %4397 = vmatpush1.bf16.msra.mxu0 %v5841_v55  ;;  %4429 = vmatpush1.bf16.msra.mxu1 %v5845_v59 }
 0x48c   :  { %4399 = vmatprep.subr.bf16.mxu0 %v5849_v63  ;;  %4431 = vmatprep.subr.bf16.mxu1 %v5852_v5 }
 0x48f   :  { %4401 = vmatpush1.bf16.msra.mxu0 %v5858_v10  ;;  %4433 = vmatpush1.bf16.msra.mxu1 %v5862_v15 }
 0x490   :  { %4403 = vmatprep.subr.bf16.mxu0 %v5866_v19  ;;  %4435 = vmatprep.subr.bf16.mxu1 %v5869_v23 }
 0x493   :  { %4405 = vmatpush1.bf16.msra.mxu0 %v5875_v26  ;;  %4437 = vmatpush1.bf16.msra.mxu1 %v5879_v28 }
 0x494   :  { %4439 = vmatprep.subr.bf16.mxu0 %v5752_v39  ;;  %4471 = vmatprep.subr.bf16.mxu1 %v5754_v42 }
 0x549   :  { %v1287_v16 = vpop.f32.mrb[8].mxu0  ;;  %v1358_v50 = vpop.f32.mrb[8].mxu1 }
 0x54a   :  { %v5174_v53 = vadd.f32 %v1287_v16, %v5936_v38  ;;  %v1289_v58 = vpop.f32.mrb[9].mxu0  ;;  %v1360_v56 = vpop.f32.mrb[9].mxu1  ;;  %v5190_v18 = vadd.f32 %v1358_v50, %v5953_v3 }
 0x54b   :  { %v5175_v6 = vadd.f32 %v1289_v58, %v5940_v40  ;;  %v5191_v13 = vadd.f32 %v1360_v56, %v5947_v60 }
 0x54c   :  { %v3900_v46 = vmul.f32 -1.442695, %v5174_v53 }
 0x54d   :  { %v3901_v12 = vmul.f32 -1.442695, %v5175_v6  ;;  %v3902_v9 = vmul.f32 -1.442695, %v5191_v13 }
 0x54e   :  { %5369 = vpow2.f32 %v3900_v46 }
 0x54f   :  { %5371 = vpow2.f32 %v3901_v12 }
 0x550   :  { %5373 = vpow2.f32 %v3902_v9 }
 0x551   :  { %5375 = vtanh.f32 %v5190_v18 }
 0x558   :  { %v5370_v2 = vpop.eup %5369 }
 0x559   :  { %v5372_v25 = vpop.eup %5371  ;;  %v1370_v29 = vadd.f32 1.0, %v5370_v2 }
 0x55a   :  { %v1376_v35 = vadd.f32 1.0, %v5372_v25  ;;  %v5374_v22 = vpop.eup %5373 }
 0x55b   :  { %5377 = vrcp.f32 %v1370_v29  ;;  %v5376_v43 = vpop.eup %5375  ;;  %v1383_v6 = vadd.f32 1.0, %v5374_v22 }
 0x55c   :  { %5379 = vrcp.f32 %v1376_v35 }
 0x55d   :  { %5381 = vrcp.f32 %v1383_v6 }
 0x565   :  { %v5378_v16 = vpop.eup %5377 }
 0x566   :  { %v5380_v53 = vpop.eup %5379  ;;  %v1387_v58 = vmul.f32 %v5378_v16, %v5376_v43 }
 0x567   :  { %v1386_v46 = vmul.f32 %v5380_v53, %v6097_v31  ;;  %v5382_v50 = vpop.eup %5381 }
 0x569   :  { %v6143_v56 = vadd.f32 %v1387_v58, %v1386_v46 }
 0x56b   :  { %5383 = vtanh.f32 %v6143_v56 }
 0x575   :  { %v5384_v12 = vpop.eup %5383 }
 0x576   :  { %v6146_v13 = vmul.f32 %v5384_v12, %v5382_v50 }
 0x578   :  { %1463 = vmatmul.mubr.f32.vlgmr.msra.gmra.mrb[10].mxu0 %v6146_v13  ;;  %1534 = vmatmul.mubr.f32.vlgmr.msra.gmra.mrb[10].mxu1 %v6146_v13 }
 0x579   :  { %4441 = vmatpush1.bf16.msra.mxu0 %v5759_v48  ;;  %4473 = vmatpush1.bf16.msra.mxu1 %v5762_v51 }
 0x57a   :  { %4443 = vmatprep.subr.bf16.mxu0 %v5765_v54  ;;  %4475 = vmatprep.subr.bf16.mxu1 %v5767_v57 }
 0x57b   :  { %1639 = vmatprep.mubr.f32.mxu0 %v5661_v1  ;;  %1710 = vmatprep.mubr.f32.mxu1 %v5661_v1 }
 0x57d   :  { %4445 = vmatpush1.bf16.msra.mxu0 %v5773_v61  ;;  %4477 = vmatpush1.bf16.msra.mxu1 %v5777_v0 }
 0x57e   :  { %4447 = vmatprep.subr.bf16.mxu0 %v5781_v4  ;;  %4479 = vmatprep.subr.bf16.mxu1 %v5784_v7 }
 0x581   :  { %4449 = vmatpush1.bf16.msra.mxu0 %v5790_v11  ;;  %4481 = vmatpush1.bf16.msra.mxu1 %v5794_v14 }
 0x582   :  { %4451 = vmatprep.subr.bf16.mxu0 %v5798_v17  ;;  %4483 = vmatprep.subr.bf16.mxu1 %v5801_v20 }
 0x585   :  { %4453 = vmatpush1.bf16.msra.mxu0 %v5807_v24  ;;  %4485 = vmatpush1.bf16.msra.mxu1 %v5811_v27 }
 0x586   :  { %4455 = vmatprep.subr.bf16.mxu0 %v5815_v30  ;;  %4487 = vmatprep.subr.bf16.mxu1 %v5818_v33 }
 0x589   :  { %4457 = vmatpush1.bf16.msra.mxu0 %v5824_v37  ;;  %4489 = vmatpush1.bf16.msra.mxu1 %v5828_v41 }
 0x58a   :  { %4459 = vmatprep.subr.bf16.mxu0 %v5832_v45  ;;  %4491 = vmatprep.subr.bf16.mxu1 %v5835_v49 }
 0x58d   :  { %4461 = vmatpush1.bf16.msra.mxu0 %v5841_v55  ;;  %4493 = vmatpush1.bf16.msra.mxu1 %v5845_v59 }
 0x58e   :  { %4463 = vmatprep.subr.bf16.mxu0 %v5849_v63  ;;  %4495 = vmatprep.subr.bf16.mxu1 %v5852_v5 }
 0x591   :  { %4465 = vmatpush1.bf16.msra.mxu0 %v5858_v10  ;;  %4497 = vmatpush1.bf16.msra.mxu1 %v5862_v15 }
 0x592   :  { %4467 = vmatprep.subr.bf16.mxu0 %v5866_v19  ;;  %4499 = vmatprep.subr.bf16.mxu1 %v5869_v23 }
 0x595   :  { %4469 = vmatpush1.bf16.msra.mxu0 %v5875_v26  ;;  %4501 = vmatpush1.bf16.msra.mxu1 %v5879_v28 }
 0x596   :  { %4503 = vmatprep.subr.bf16.mxu0 %v5752_v39  ;;  %4535 = vmatprep.subr.bf16.mxu1 %v5754_v42 }
 0x64b   :  { %v1464_v31 = vpop.f32.mrb[10].mxu0  ;;  %v1535_v9 = vpop.f32.mrb[10].mxu1 }
 0x64c   :  { %v5176_v18 = vadd.f32 %v1464_v31, %v5936_v38  ;;  %v1466_v2 = vpop.f32.mrb[11].mxu0  ;;  %v1537_v25 = vpop.f32.mrb[11].mxu1  ;;  %v5192_v53 = vadd.f32 %v1535_v9, %v5953_v3 }
 0x64d   :  { %v5177_v29 = vadd.f32 %v1466_v2, %v5940_v40  ;;  %v5193_v43 = vadd.f32 %v1537_v25, %v5947_v60 }
 0x64e   :  { %v3903_v35 = vmul.f32 -1.442695, %v5176_v18 }
 0x64f   :  { %v3904_v22 = vmul.f32 -1.442695, %v5177_v29  ;;  %v3905_v16 = vmul.f32 -1.442695, %v5193_v43  ;;  %v2002_v43 = vld [vmem:[#allocation7 + $0x210] sm:$0xff] }
 0x650   :  { %5385 = vpow2.f32 %v3903_v35 }
 0x651   :  { %5387 = vpow2.f32 %v3904_v22 }
 0x652   :  { %5389 = vpow2.f32 %v3905_v16  ;;  %v2006_v16 = vld [vmem:[#allocation7 + $0x230] sm:$0xff] }
 0x653   :  { %5391 = vtanh.f32 %v5192_v53  ;;  %v2009_v53 = vld [vmem:[#allocation7 + $0x248] sm:$0xff] }
 0x65a   :  { %v5386_v39 = vpop.eup %5385 }
 0x65b   :  { %v5388_v58 = vpop.eup %5387  ;;  %v1547_v42 = vadd.f32 1.0, %v5386_v39  ;;  %v2013_v39 = vld [vmem:[#allocation7 + $0x268] sm:$0xff] }
 0x65c   :  { %v1553_v6 = vadd.f32 1.0, %v5388_v58  ;;  %v5390_v46 = vpop.eup %5389  ;;  %v2011_v58 = vld [vmem:[#allocation7 + $0x258] sm:$0xff] }
 0x65d   :  { %5393 = vrcp.f32 %v1547_v42  ;;  %v5392_v50 = vpop.eup %5391  ;;  %v1560_v2 = vadd.f32 1.0, %v5390_v46  ;;  %v2015_v42 = vld [vmem:[#allocation7 + $0x278] sm:$0xff] }
 0x65e   :  { %5395 = vrcp.f32 %v1553_v6 }
 0x65f   :  { %5397 = vrcp.f32 %v1560_v2 }
 0x667   :  { %v5394_v12 = vpop.eup %5393 }
 0x668   :  { %v5396_v31 = vpop.eup %5395  ;;  %v1564_v18 = vmul.f32 %v5394_v12, %v5392_v50  ;;  %v4600_v12 = vpack.c.bf16 %v2006_v16, %v2002_v43  ;;  %v2032_v43 = vld [vmem:[#allocation7 + $0x300] sm:$0xff] }
 0x669   :  { %v1563_v29 = vmul.f32 %v5396_v31, %v6143_v56  ;;  %v5398_v9 = vpop.eup %5397  ;;  %v2004_v56 = vld [vmem:[#allocation7 + $0x220] sm:$0xff] }
 0x66a   :  { %v2008_v31 = vld [vmem:[#allocation7 + $0x240] sm:$0xff] }
 0x66b   :  { %v6189_v25 = vadd.f32 %v1564_v18, %v1563_v29  ;;  %v2012_v18 = vld [vmem:[#allocation7 + $0x260] sm:$0xff]  ;;  %v4570_v29 = vpack.c.bf16 %v2013_v39, %v2009_v53 }
 0x66c   :  { %v2036_v16 = vld [vmem:[#allocation7 + $0x320] sm:$0xff] }
 0x66d   :  { %5399 = vtanh.f32 %v6189_v25 }
 0x677   :  { %v5400_v35 = vpop.eup %5399 }
 0x678   :  { %v6192_v22 = vmul.f32 %v5400_v35, %v5398_v9  ;;  %v2010_v9 = vld [vmem:[#allocation7 + $0x250] sm:$0xff] }
 0x679   :  { %v2014_v35 = vld [vmem:[#allocation7 + $0x270] sm:$0xff] }
 0x67a   :  { %1640 = vmatmul.mubr.f32.vlgmr.msra.gmra.mrb[12].mxu0 %v6192_v22  ;;  %1711 = vmatmul.mubr.f32.vlgmr.msra.gmra.mrb[12].mxu1 %v6192_v22 }
 0x67b   :  { %4505 = vmatpush1.bf16.msra.mxu0 %v5759_v48  ;;  %4537 = vmatpush1.bf16.msra.mxu1 %v5762_v51  ;;  %v2001_v48 = vld [vmem:[#allocation7 + $0x208] sm:$0xff] }
 0x67c   :  { %4507 = vmatprep.subr.bf16.mxu0 %v5765_v54  ;;  %4539 = vmatprep.subr.bf16.mxu1 %v5767_v57  ;;  %v2005_v51 = vld [vmem:[#allocation7 + $0x228] sm:$0xff]  ;;  %v2003_v54 = vld [vmem:[#allocation7 + $0x218] sm:$0xff] }
 0x67d   :  { %1816 = vmatprep.mubr.f32.mxu0 %v5661_v1  ;;  %1887 = vmatprep.mubr.f32.mxu1 %v5661_v1  ;;  %v4566_v57 = vpack.c.bf16 %v2005_v51, %v2001_v48  ;;  %v2017_v48 = vld [vmem:[#allocation7 + $0x288] sm:$0xff] }
 0x67e   :  { %v2021_v51 = vld [vmem:[#allocation7 + $0x2a8] sm:$0xff] }
 0x67f   :  { %4509 = vmatpush1.bf16.msra.mxu0 %v5773_v61  ;;  %4541 = vmatpush1.bf16.msra.mxu1 %v5777_v0  ;;  %v2007_v61 = vld [vmem:[#allocation7 + $0x238] sm:$0xff] }
 0x680   :  { %4511 = vmatprep.subr.bf16.mxu0 %v5781_v4  ;;  %4543 = vmatprep.subr.bf16.mxu1 %v5784_v7  ;;  %v4598_v0 = vpack.c.bf16 %v2007_v61, %v2003_v54  ;;  %v2019_v54 = vld [vmem:[#allocation7 + $0x298] sm:$0xff]  ;;  %v4572_v61 = vpack.c.bf16 %v2012_v18, %v2008_v31  ;;  %v4584_v31 = vpack.c.bf16 %v2036_v16, %v2032_v43  ;;  %v1929_v16 = vld [vmem:[#allocation10 + $0x210] sm:$0xff] }
 0x683   :  { %4513 = vmatpush1.bf16.msra.mxu0 %v5790_v11  ;;  %4545 = vmatpush1.bf16.msra.mxu1 %v5794_v14 }
 0x684   :  { %4515 = vmatprep.subr.bf16.mxu0 %v5798_v17  ;;  %4547 = vmatprep.subr.bf16.mxu1 %v5801_v20 }
 0x687   :  { %4517 = vmatpush1.bf16.msra.mxu0 %v5807_v24  ;;  %4549 = vmatpush1.bf16.msra.mxu1 %v5811_v27 }
 0x688   :  { %4519 = vmatprep.subr.bf16.mxu0 %v5815_v30  ;;  %4551 = vmatprep.subr.bf16.mxu1 %v5818_v33 }
 0x68b   :  { %4521 = vmatpush1.bf16.msra.mxu0 %v5824_v37  ;;  %4553 = vmatpush1.bf16.msra.mxu1 %v5828_v41 }
 0x68c   :  { %4523 = vmatprep.subr.bf16.mxu0 %v5832_v45  ;;  %4555 = vmatprep.subr.bf16.mxu1 %v5835_v49 }
 0x68f   :  { %4525 = vmatpush1.bf16.msra.mxu0 %v5841_v55  ;;  %4557 = vmatpush1.bf16.msra.mxu1 %v5845_v59 }
 0x690   :  { %4527 = vmatprep.subr.bf16.mxu0 %v5849_v63  ;;  %4559 = vmatprep.subr.bf16.mxu1 %v5852_v5 }
 0x693   :  { %4529 = vmatpush1.bf16.msra.mxu0 %v5858_v10  ;;  %4561 = vmatpush1.bf16.msra.mxu1 %v5862_v15 }
 0x694   :  { %4531 = vmatprep.subr.bf16.mxu0 %v5866_v19  ;;  %4563 = vmatprep.subr.bf16.mxu1 %v5869_v23 }
 0x697   :  { %4533 = vmatpush1.bf16.msra.mxu0 %v5875_v26  ;;  %4565 = vmatpush1.bf16.msra.mxu1 %v5879_v28  ;;  %v2000_v28 = vld [vmem:[#allocation7 + $0x200] sm:$0xff] }
 0x698   :  { %4567 = vmatprep.subr.bf16.mxu0 %v4566_v57  ;;  %4599 = vmatprep.subr.bf16.mxu1 %v4598_v0  ;;  %v4568_v50 = vpack.c.bf16 %v2004_v56, %v2000_v28  ;;  %v2023_v57 = vld [vmem:[#allocation7 + $0x2b8] sm:$0xff]  ;;  %v4604_v0 = vpack.c.bf16 %v2014_v35, %v2010_v9 }
 0x74d   :  { %v1641_v4 = vpop.f32.mrb[12].mxu0  ;;  %v1712_v7 = vpop.f32.mrb[12].mxu1 }
 0x74e   :  { %v5178_v11 = vadd.f32 %v1641_v4, %v5936_v38  ;;  %v1643_v14 = vpop.f32.mrb[13].mxu0  ;;  %v1714_v17 = vpop.f32.mrb[13].mxu1  ;;  %v5194_v37 = vadd.f32 %v1712_v7, %v5953_v3  ;;  %v2016_v4 = vld [vmem:[#allocation7 + $0x280] sm:$0xff] }
 0x74f   :  { %v5179_v20 = vadd.f32 %v1643_v14, %v5940_v40  ;;  %v5195_v30 = vadd.f32 %v1714_v17, %v5947_v60  ;;  %v2020_v7 = vld [vmem:[#allocation7 + $0x2a0] sm:$0xff]  ;;  %v4606_v14 = vpack.c.bf16 %v2023_v57, %v2019_v54  ;;  %v2018_v17 = vld [vmem:[#allocation7 + $0x290] sm:$0xff]  ;;  %v2049_v54 = vld [vmem:[#allocation7 + $0x388] sm:$0xff] }
 0x750   :  { %v3906_v24 = vmul.f32 -1.442695, %v5178_v11  ;;  %v4574_v11 = vpack.c.bf16 %v2021_v51, %v2017_v48  ;;  %v2042_v48 = vld [vmem:[#allocation7 + $0x350] sm:$0xff]  ;;  %v2053_v57 = vld [vmem:[#allocation7 + $0x3a8] sm:$0xff] }
 0x751   :  { %v3907_v27 = vmul.f32 -1.442695, %v5179_v20  ;;  %v3908_v33 = vmul.f32 -1.442695, %v5195_v30  ;;  %v2022_v20 = vld [vmem:[#allocation7 + $0x2b0] sm:$0xff]  ;;  %v2027_v30 = vld [vmem:[#allocation7 + $0x2d8] sm:$0xff] }
 0x752   :  { %5401 = vpow2.f32 %v3906_v24  ;;  %v2025_v24 = vld [vmem:[#allocation7 + $0x2c8] sm:$0xff]  ;;  %v2046_v51 = vld [vmem:[#allocation7 + $0x370] sm:$0xff] }
 0x753   :  { %5403 = vpow2.f32 %v3907_v27  ;;  %v2029_v27 = vld [vmem:[#allocation7 + $0x2e8] sm:$0xff] }
 0x754   :  { %5405 = vpow2.f32 %v3908_v33  ;;  %v2031_v33 = vld [vmem:[#allocation7 + $0x2f8] sm:$0xff] }
 0x755   :  { %5407 = vtanh.f32 %v5194_v37  ;;  %v4576_v37 = vpack.c.bf16 %v2020_v7, %v2016_v4  ;;  %v4620_v7 = vpack.c.bf16 %v2046_v51, %v2042_v48  ;;  %v1948_v48 = vld [vmem:[#allocation10 + $0x2a8] sm:$0xff]  ;;  %v1946_v51 = vld [vmem:[#allocation10 + $0x298] sm:$0xff] }
 0x75c   :  { %v5402_v41 = vpop.eup %5401 }
 0x75d   :  { %v5404_v45 = vpop.eup %5403  ;;  %v1724_v49 = vadd.f32 1.0, %v5402_v41  ;;  %v4608_v41 = vpack.c.bf16 %v2022_v20, %v2018_v17  ;;  %v4590_v17 = vpack.c.bf16 %v2053_v57, %v2049_v54  ;;  %v1950_v57 = vld [vmem:[#allocation10 + $0x2b8] sm:$0xff] }
 0x75e   :  { %v1730_v55 = vadd.f32 1.0, %v5404_v45  ;;  %v5406_v59 = vpop.eup %5405  ;;  %v2024_v45 = vld [vmem:[#allocation7 + $0x2c0] sm:$0xff] }
 0x75f   :  { %5409 = vrcp.f32 %v1724_v49  ;;  %v5408_v63 = vpop.eup %5407  ;;  %v1737_v19 = vadd.f32 1.0, %v5406_v59  ;;  %v2028_v49 = vld [vmem:[#allocation7 + $0x2e0] sm:$0xff]  ;;  %v4610_v59 = vpack.c.bf16 %v2031_v33, %v2027_v30  ;;  %v2057_v30 = vld [vmem:[#allocation7 + $0x3c8] sm:$0xff] }
 0x760   :  { %5411 = vrcp.f32 %v1730_v55  ;;  %v4578_v55 = vpack.c.bf16 %v2029_v27, %v2025_v24  ;;  %v4580_v28 = vpack.c.bf16 %v2028_v49, %v2024_v45  ;;  %v2050_v24 = vld [vmem:[#allocation7 + $0x390] sm:$0xff]  ;;  %v2061_v33 = vld [vmem:[#allocation7 + $0x3e8] sm:$0xff] }
 0x761   :  { %5413 = vrcp.f32 %v1737_v19  ;;  %v2035_v19 = vld [vmem:[#allocation7 + $0x318] sm:$0xff]  ;;  %v2054_v27 = vld [vmem:[#allocation7 + $0x3b0] sm:$0xff] }
 0x762   :  { %v4624_v49 = vpack.c.bf16 %v2054_v27, %v2050_v24  ;;  %v1956_v24 = vld [vmem:[#allocation10 + $0x2e8] sm:$0xff]  ;;  %v1954_v27 = vld [vmem:[#allocation10 + $0x2d8] sm:$0xff] }
 0x769   :  { %v5410_v5 = vpop.eup %5409 }
 0x76a   :  { %v5412_v10 = vpop.eup %5411  ;;  %v1741_v15 = vmul.f32 %v5410_v5, %v5408_v63  ;;  %v2026_v63 = vld [vmem:[#allocation7 + $0x2d0] sm:$0xff] }
 0x76b   :  { %v1740_v23 = vmul.f32 %v5412_v10, %v6189_v25  ;;  %v5414_v6 = vpop.eup %5413  ;;  %v4602_v25 = vpack.c.bf16 %v2015_v42, %v2011_v58  ;;  %v2030_v5 = vld [vmem:[#allocation7 + $0x2f0] sm:$0xff]  ;;  %v2033_v10 = vld [vmem:[#allocation7 + $0x308] sm:$0xff] }
 0x76c   :  { %v4612_v56 = vpack.c.bf16 %v2030_v5, %v2026_v63  ;;  %v2034_v58 = vld [vmem:[#allocation7 + $0x310] sm:$0xff]  ;;  %v2060_v5 = vld [vmem:[#allocation7 + $0x3e0] sm:$0xff] }
 0x76d   :  { %v6233_v26 = vadd.f32 %v1741_v15, %v1740_v23  ;;  %v2037_v15 = vld [vmem:[#allocation7 + $0x328] sm:$0xff]  ;;  %v2039_v23 = vld [vmem:[#allocation7 + $0x338] sm:$0xff]  ;;  %v2038_v42 = vld [vmem:[#allocation7 + $0x330] sm:$0xff] }
 0x76e   :  { %v4582_v53 = vpack.c.bf16 %v2037_v15, %v2033_v10  ;;  %v4614_v39 = vpack.c.bf16 %v2039_v23, %v2035_v19  ;;  %v4616_v18 = vpack.c.bf16 %v2038_v42, %v2034_v58  ;;  %v2058_v10 = vld [vmem:[#allocation7 + $0x3d0] sm:$0xff]  ;;  %v1940_v58 = vld [vmem:[#allocation10 + $0x268] sm:$0xff]  ;;  %v1938_v42 = vld [vmem:[#allocation10 + $0x258] sm:$0xff] }
 0x76f   :  { %5415 = vtanh.f32 %v6233_v26  ;;  %v2062_v15 = vld [vmem:[#allocation7 + $0x3f0] sm:$0xff] }
 0x770   :  { %v4628_v23 = vpack.c.bf16 %v2062_v15, %v2058_v10  ;;  %v1964_v10 = vld [vmem:[#allocation10 + $0x328] sm:$0xff]  ;;  %v1962_v15 = vld [vmem:[#allocation10 + $0x318] sm:$0xff] }
 0x779   :  { %v5416_v46 = vpop.eup %5415 }
 0x77a   :  { %v6236_v2 = vmul.f32 %v5416_v46, %v5414_v6  ;;  %v2041_v6 = vld [vmem:[#allocation7 + $0x348] sm:$0xff] }
 0x77b   :  { %v2045_v46 = vld [vmem:[#allocation7 + $0x368] sm:$0xff] }
 0x77c   :  { %1817 = vmatmul.mubr.f32.vlgmr.msra.gmra.mrb[14].mxu0 %v6236_v2  ;;  %1888 = vmatmul.mubr.f32.vlgmr.msra.gmra.mrb[14].mxu1 %v6236_v2  ;;  %v4586_v9 = vpack.c.bf16 %v2045_v46, %v2041_v6  ;;  %v1942_v46 = vld [vmem:[#allocation10 + $0x278] sm:$0xff] }
 0x77d   :  { %4569 = vmatpush1.bf16.msra.mxu0 %v4568_v50  ;;  %4601 = vmatpush1.bf16.msra.mxu1 %v4600_v12  ;;  %v2043_v50 = vld [vmem:[#allocation7 + $0x358] sm:$0xff] }
 0x77e   :  { %4571 = vmatprep.subr.bf16.mxu0 %v4570_v29  ;;  %4603 = vmatprep.subr.bf16.mxu1 %v4602_v25  ;;  %v2047_v12 = vld [vmem:[#allocation7 + $0x378] sm:$0xff]  ;;  %v2040_v29 = vld [vmem:[#allocation7 + $0x340] sm:$0xff] }
 0x77f   :  { %2151 = vmatprep.mubr.f32.mxu0 %v5661_v1  ;;  %2264 = vmatprep.mubr.f32.mxu1 %v5661_v1  ;;  %v2044_v25 = vld [vmem:[#allocation7 + $0x360] sm:$0xff]  ;;  %v4618_v35 = vpack.c.bf16 %v2047_v12, %v2043_v50 }
 0x780   :  { %v4588_v4 = vpack.c.bf16 %v2044_v25, %v2040_v29  ;;  %v1935_v50 = vld [vmem:[#allocation10 + $0x240] sm:$0xff]  ;;  %v1937_v29 = vld [vmem:[#allocation10 + $0x250] sm:$0xff] }
 0x781   :  { %4573 = vmatpush1.bf16.msra.mxu0 %v4572_v61  ;;  %4605 = vmatpush1.bf16.msra.mxu1 %v4604_v0  ;;  %v2051_v61 = vld [vmem:[#allocation7 + $0x398] sm:$0xff]  ;;  %v1939_v12 = vld [vmem:[#allocation10 + $0x260] sm:$0xff]  ;;  %v1941_v25 = vld [vmem:[#allocation10 + $0x270] sm:$0xff] }
 0x782   :  { %4575 = vmatprep.subr.bf16.mxu0 %v4574_v11  ;;  %4607 = vmatprep.subr.bf16.mxu1 %v4606_v14  ;;  %v2055_v0 = vld [vmem:[#allocation7 + $0x3b8] sm:$0xff]  ;;  %v2048_v11 = vld [vmem:[#allocation7 + $0x380] sm:$0xff] }
 0x783   :  { %v2052_v14 = vld [vmem:[#allocation7 + $0x3a0] sm:$0xff]  ;;  %v4622_v20 = vpack.c.bf16 %v2055_v0, %v2051_v61 }
 0x784   :  { %v4592_v45 = vpack.c.bf16 %v2052_v14, %v2048_v11  ;;  %v1943_v61 = vld [vmem:[#allocation10 + $0x280] sm:$0xff]  ;;  %v1945_v11 = vld [vmem:[#allocation10 + $0x290] sm:$0xff] }
 0x785   :  { %4577 = vmatpush1.bf16.msra.mxu0 %v4576_v37  ;;  %4609 = vmatpush1.bf16.msra.mxu1 %v4608_v41  ;;  %v2059_v37 = vld [vmem:[#allocation7 + $0x3d8] sm:$0xff]  ;;  %v1947_v0 = vld [vmem:[#allocation10 + $0x2a0] sm:$0xff]  ;;  %v1949_v14 = vld [vmem:[#allocation10 + $0x2b0] sm:$0xff] }
 0x786   :  { %4579 = vmatprep.subr.bf16.mxu0 %v4578_v55  ;;  %4611 = vmatprep.subr.bf16.mxu1 %v4610_v59  ;;  %v2063_v41 = vld [vmem:[#allocation7 + $0x3f8] sm:$0xff]  ;;  %v2056_v55 = vld [vmem:[#allocation7 + $0x3c0] sm:$0xff]  ;;  %v4594_v59 = vpack.c.bf16 %v2061_v33, %v2057_v30 }
 0x787   :  { %v4626_v63 = vpack.c.bf16 %v2063_v41, %v2059_v37  ;;  %v4596_v19 = vpack.c.bf16 %v2060_v5, %v2056_v55  ;;  %v1958_v33 = vld [vmem:[#allocation10 + $0x2f8] sm:$0xff]  ;;  %v1951_v37 = vld [vmem:[#allocation10 + $0x2c0] sm:$0xff]  ;;  %v1953_v55 = vld [vmem:[#allocation10 + $0x2d0] sm:$0xff] }
 0x788   :  { %v1955_v41 = vld [vmem:[#allocation10 + $0x2e0] sm:$0xff] }
 0x789   :  { %4581 = vmatpush1.bf16.msra.mxu0 %v4580_v28  ;;  %4613 = vmatpush1.bf16.msra.mxu1 %v4612_v56  ;;  %v1927_v28 = vld [vmem:[#allocation10 + $0x200] sm:$0xff] }
 0x78a   :  { %4583 = vmatprep.subr.bf16.mxu0 %v4582_v53  ;;  %4615 = vmatprep.subr.bf16.mxu1 %v4614_v39  ;;  %v1933_v53 = vld [vmem:[#allocation10 + $0x230] sm:$0xff]  ;;  %v1936_v39 = vld [vmem:[#allocation10 + $0x248] sm:$0xff] }
 0x78b   :  { %v6282_v6 = vpack.c.bf16 %v1940_v58, %v1936_v39 }
 0x78d   :  { %4585 = vmatpush1.bf16.msra.mxu0 %v4584_v31  ;;  %4617 = vmatpush1.bf16.msra.mxu1 %v4616_v18  ;;  %v6284_v31 = vpack.c.bf16 %v1942_v46, %v1938_v42  ;;  %v6286_v18 = vpack.c.bf16 %v1939_v12, %v1935_v50  ;;  %v1970_v42 = vld [vmem:[#allocation10 + $0x358] sm:$0xff]  ;;  %v1967_v50 = vld [vmem:[#allocation10 + $0x340] sm:$0xff] }
 0x78e   :  { %4587 = vmatprep.subr.bf16.mxu0 %v4586_v9  ;;  %4619 = vmatprep.subr.bf16.mxu1 %v4618_v35  ;;  %v6289_v9 = vpack.c.bf16 %v1941_v25, %v1937_v29  ;;  %v1944_v35 = vld [vmem:[#allocation10 + $0x288] sm:$0xff]  ;;  %v1974_v46 = vld [vmem:[#allocation10 + $0x378] sm:$0xff]  ;;  %v1971_v29 = vld [vmem:[#allocation10 + $0x360] sm:$0xff] }
 0x78f   :  { %v6294_v54 = vpack.c.bf16 %v1948_v48, %v1944_v35  ;;  %v6330_v12 = vpack.c.bf16 %v1974_v46, %v1970_v42  ;;  %v1969_v25 = vld [vmem:[#allocation10 + $0x350] sm:$0xff]  ;;  %v6333_v48 = vpack.c.bf16 %v1971_v29, %v1967_v50 }
 0x790   :  { %v1973_v35 = vld [vmem:[#allocation10 + $0x370] sm:$0xff] }
 0x791   :  { %4589 = vmatpush1.bf16.msra.mxu0 %v4588_v4  ;;  %4621 = vmatpush1.bf16.msra.mxu1 %v4620_v7  ;;  %v6296_v4 = vpack.c.bf16 %v1950_v57, %v1946_v51  ;;  %v6298_v7 = vpack.c.bf16 %v1947_v0, %v1943_v61  ;;  %v1976_v51 = vld [vmem:[#allocation10 + $0x388] sm:$0xff]  ;;  %v1978_v61 = vld [vmem:[#allocation10 + $0x398] sm:$0xff]  ;;  %v6337_v0 = vpack.c.bf16 %v1973_v35, %v1969_v25 }
 0x792   :  { %4591 = vmatprep.subr.bf16.mxu0 %v4590_v17  ;;  %4623 = vmatprep.subr.bf16.mxu1 %v4622_v20  ;;  %v6301_v17 = vpack.c.bf16 %v1949_v14, %v1945_v11  ;;  %v1952_v20 = vld [vmem:[#allocation10 + $0x2c8] sm:$0xff]  ;;  %v1982_v14 = vld [vmem:[#allocation10 + $0x3b8] sm:$0xff] }
 0x793   :  { %v6306_v30 = vpack.c.bf16 %v1956_v24, %v1952_v20  ;;  %v1980_v57 = vld [vmem:[#allocation10 + $0x3a8] sm:$0xff]  ;;  %v1975_v20 = vld [vmem:[#allocation10 + $0x380] sm:$0xff] }
 0x794   :  { %v6339_v11 = vpack.c.bf16 %v1980_v57, %v1976_v51  ;;  %v1979_v24 = vld [vmem:[#allocation10 + $0x3a0] sm:$0xff] }
 0x795   :  { %4593 = vmatpush1.bf16.msra.mxu0 %v4592_v45  ;;  %4625 = vmatpush1.bf16.msra.mxu1 %v4624_v49  ;;  %v6308_v45 = vpack.c.bf16 %v1958_v33, %v1954_v27  ;;  %v6310_v49 = vpack.c.bf16 %v1955_v41, %v1951_v37  ;;  %v6342_v27 = vpack.c.bf16 %v1982_v14, %v1978_v61  ;;  %v1977_v33 = vld [vmem:[#allocation10 + $0x390] sm:$0xff] }
 0x796   :  { %4595 = vmatprep.subr.bf16.mxu0 %v4594_v59  ;;  %4627 = vmatprep.subr.bf16.mxu1 %v4626_v63  ;;  %v1957_v59 = vld [vmem:[#allocation10 + $0x2f0] sm:$0xff]  ;;  %v1960_v63 = vld [vmem:[#allocation10 + $0x308] sm:$0xff]  ;;  %v6345_v41 = vpack.c.bf16 %v1979_v24, %v1975_v20 }
 0x797   :  { %v6313_v5 = vpack.c.bf16 %v1957_v59, %v1953_v55  ;;  %v1981_v37 = vld [vmem:[#allocation10 + $0x3b0] sm:$0xff]  ;;  %v1984_v59 = vld [vmem:[#allocation10 + $0x3c8] sm:$0xff] }
 0x798   :  { %v6349_v55 = vpack.c.bf16 %v1981_v37, %v1977_v33 }
 0x799   :  { %4597 = vmatpush1.bf16.msra.mxu0 %v4596_v19  ;;  %4629 = vmatpush1.bf16.msra.mxu1 %v4628_v23  ;;  %v1966_v19 = vld [vmem:[#allocation10 + $0x338] sm:$0xff]  ;;  %v6317_v23 = vpack.c.bf16 %v1964_v10, %v1960_v63  ;;  %v1988_v63 = vld [vmem:[#allocation10 + $0x3e8] sm:$0xff] }
 0x79a   :  { %v1986_v10 = vld [vmem:[#allocation10 + $0x3d8] sm:$0xff] }
 0x79c   :  { %2152 = vmatmul.mubr.f32.vlgmr.msra.gmra.mrb[16].mxu0 %v5962_v52  ;;  %2265 = vmatmul.mubr.f32.vlgmr.msra.gmra.mrb[16].mxu1 %v5962_v52  ;;  %v1928_v52 = vld [vmem:[#allocation10 + $0x208] sm:$0xff] }
 0x79d   :  { %2157 = vmatprep.mubr.f32.mxu0 %v5661_v1  ;;  %2270 = vmatprep.mubr.f32.mxu1 %v5661_v1 }
 0x7a0   :  { %2158 = vmatmul.mubr.f32.gmra.mrb[18].mxu0 %v6008_v8  ;;  %2271 = vmatmul.mubr.f32.gmra.mrb[18].mxu1 %v6008_v8  ;;  %v1932_v8 = vld [vmem:[#allocation10 + $0x228] sm:$0xff] }
 0x7a1   :  { %2163 = vmatprep.mubr.f32.mxu0 %v5661_v1  ;;  %2276 = vmatprep.mubr.f32.mxu1 %v5661_v1 }
 0x7a4   :  { %2164 = vmatmul.mubr.f32.gmra.mrb[20].mxu0 %v6054_v21  ;;  %2277 = vmatmul.mubr.f32.gmra.mrb[20].mxu1 %v6054_v21  ;;  %v1930_v21 = vld [vmem:[#allocation10 + $0x218] sm:$0xff] }
 0x7a5   :  { %2169 = vmatprep.mubr.f32.mxu0 %v5661_v1  ;;  %2282 = vmatprep.mubr.f32.mxu1 %v5661_v1 }
 0x7a8   :  { %2170 = vmatmul.mubr.f32.gmra.mrb[22].mxu0 %v6100_v47  ;;  %2283 = vmatmul.mubr.f32.gmra.mrb[22].mxu1 %v6100_v47  ;;  %v6270_v47 = vpack.c.bf16 %v1932_v8, %v1928_v52  ;;  %v6319_v52 = vpack.c.bf16 %v1966_v19, %v1962_v15  ;;  %v1959_v8 = vld [vmem:[#allocation10 + $0x300] sm:$0xff]  ;;  %v6354_v15 = vpack.c.bf16 %v1988_v63, %v1984_v59  ;;  %v1990_v19 = vld [vmem:[#allocation10 + $0x3f8] sm:$0xff] }
 0x7a9   :  { %2175 = vmatprep.mubr.f32.mxu0 %v5661_v1  ;;  %2288 = vmatprep.mubr.f32.mxu1 %v5661_v1 }
 0x7aa   :  { %4631 = vmatprep.subr.bf16.mxu0 %v6270_v47 }
 0x7ac   :  { %2176 = vmatmul.mubr.f32.gmra.mrb[24].mxu0 %v6146_v13  ;;  %2289 = vmatmul.mubr.f32.gmra.mrb[24].mxu1 %v6146_v13  ;;  %v1934_v13 = vld [vmem:[#allocation10 + $0x238] sm:$0xff] }
 0x7ad   :  { %2181 = vmatprep.mubr.f32.mxu0 %v5661_v1  ;;  %2294 = vmatprep.mubr.f32.mxu1 %v5661_v1  ;;  %v6272_v56 = vpack.c.bf16 %v1934_v13, %v1930_v21  ;;  %v1963_v21 = vld [vmem:[#allocation10 + $0x320] sm:$0xff]  ;;  %v1961_v13 = vld [vmem:[#allocation10 + $0x310] sm:$0xff] }
 0x7af   :  { %4663 = vmatprep.subr.bf16.mxu1 %v6272_v56 }
 0x7b0   :  { %2182 = vmatmul.mubr.f32.gmra.mrb[26].mxu0 %v6192_v22  ;;  %2295 = vmatmul.mubr.f32.gmra.mrb[26].mxu1 %v6192_v22  ;;  %v1931_v22 = vld [vmem:[#allocation10 + $0x220] sm:$0xff] }
 0x7b1   :  { %2187 = vmatprep.mubr.f32.mxu0 %v5661_v1  ;;  %2300 = vmatprep.mubr.f32.mxu1 %v5661_v1  ;;  %v6274_v43 = vpack.c.bf16 %v1931_v22, %v1927_v28  ;;  %v6322_v28 = vpack.c.bf16 %v1963_v21, %v1959_v8  ;;  %v1965_v22 = vld [vmem:[#allocation10 + $0x330] sm:$0xff]  ;;  %v1983_v8 = vld [vmem:[#allocation10 + $0x3c0] sm:$0xff] }
 0x7b2   :  { %v6326_v39 = vpack.c.bf16 %v1965_v22, %v1961_v13  ;;  %v1987_v21 = vld [vmem:[#allocation10 + $0x3e0] sm:$0xff]  ;;  %v6356_v13 = vpack.c.bf16 %v1990_v19, %v1986_v10 }
 0x7b3   :  { %4633 = vmatpush1.bf16.msra.mxu0 %v6274_v43  ;;  %v6358_v22 = vpack.c.bf16 %v1987_v21, %v1983_v8 }
 0x7b4   :  { %2188 = vmatmul.mubr.f32.gmra.mrb[28].mxu0 %v6236_v2  ;;  %2301 = vmatmul.mubr.f32.gmra.mrb[28].mxu1 %v6236_v2  ;;  %v6277_v2 = vpack.c.bf16 %v1933_v53, %v1929_v16  ;;  %v1968_v16 = vld [vmem:[#allocation10 + $0x348] sm:$0xff] }
 0x7b5   :  { %2193 = vmatprep.mubr.f32.mxu0 %v5661_v1  ;;  %2306 = vmatprep.mubr.f32.mxu1 %v5661_v1  ;;  %v1972_v53 = vld [vmem:[#allocation10 + $0x368] sm:$0xff] }
 0x7b6   :  { %4665 = vmatpush1.bf16.msra.mxu1 %v6277_v2  ;;  %4635 = vmatprep.subr.bf16.mxu0 %v6282_v6  ;;  %v6328_v58 = vpack.c.bf16 %v1972_v53, %v1968_v16  ;;  %v1985_v16 = vld [vmem:[#allocation10 + $0x3d0] sm:$0xff] }
 0x7b7   :  { %4667 = vmatprep.subr.bf16.mxu1 %v6284_v31  ;;  %4637 = vmatpush1.bf16.msra.mxu0 %v6286_v18  ;;  %v1989_v53 = vld [vmem:[#allocation10 + $0x3f0] sm:$0xff] }
 0x7b8   :  { %4639 = vmatprep.subr.bf16.mxu0 %v6294_v54  ;;  %v6361_v42 = vpack.c.bf16 %v1989_v53, %v1985_v16 }
 0x7ba   :  { %4669 = vmatpush1.bf16.msra.mxu1 %v6289_v9 }
 0x7bb   :  { %4671 = vmatprep.subr.bf16.mxu1 %v6296_v4  ;;  %4641 = vmatpush1.bf16.msra.mxu0 %v6298_v7 }
 0x7bc   :  { %4643 = vmatprep.subr.bf16.mxu0 %v6306_v30 }
 0x7be   :  { %4673 = vmatpush1.bf16.msra.mxu1 %v6301_v17 }
 0x7bf   :  { %4675 = vmatprep.subr.bf16.mxu1 %v6308_v45  ;;  %4645 = vmatpush1.bf16.msra.mxu0 %v6310_v49 }
 0x7c0   :  { %4647 = vmatprep.subr.bf16.mxu0 %v6317_v23 }
 0x7c2   :  { %4677 = vmatpush1.bf16.msra.mxu1 %v6313_v5 }
 0x7c3   :  { %4679 = vmatprep.subr.bf16.mxu1 %v6319_v52  ;;  %4649 = vmatpush1.bf16.msra.mxu0 %v6322_v28 }
 0x7c4   :  { %4651 = vmatprep.subr.bf16.mxu0 %v6328_v58 }
 0x7c6   :  { %4681 = vmatpush1.bf16.msra.mxu1 %v6326_v39 }
 0x7c7   :  { %4683 = vmatprep.subr.bf16.mxu1 %v6330_v12  ;;  %4653 = vmatpush1.bf16.msra.mxu0 %v6333_v48 }
 0x7c8   :  { %4655 = vmatprep.subr.bf16.mxu0 %v6339_v11 }
 0x7ca   :  { %4685 = vmatpush1.bf16.msra.mxu1 %v6337_v0 }
 0x7cb   :  { %4687 = vmatprep.subr.bf16.mxu1 %v6342_v27  ;;  %4657 = vmatpush1.bf16.msra.mxu0 %v6345_v41 }
 0x7cc   :  { %4659 = vmatprep.subr.bf16.mxu0 %v6354_v15 }
 0x7ce   :  { %4689 = vmatpush1.bf16.msra.mxu1 %v6349_v55 }
 0x7cf   :  { %4691 = vmatprep.subr.bf16.mxu1 %v6356_v13  ;;  %4661 = vmatpush1.bf16.msra.mxu0 %v6358_v22 }
 0x7d0   :  { %4695 = vmatprep.subr.bf16.mxu0 %v6270_v47 }
 0x7d2   :  { %4693 = vmatpush1.bf16.msra.mxu1 %v6361_v42 }
 0x7d3   :  { %4727 = vmatprep.subr.bf16.mxu1 %v6272_v56 }
 0x84f   :  { %v1818_v46 = vpop.f32.mrb[14].mxu0  ;;  %v1889_v50 = vpop.f32.mrb[14].mxu1 }
 0x850   :  { %v5180_v29 = vadd.f32 %v1818_v46, %v5936_v38  ;;  %v1820_v25 = vpop.f32.mrb[15].mxu0  ;;  %v1891_v35 = vpop.f32.mrb[15].mxu1  ;;  %v5196_v24 = vadd.f32 %v1889_v50, %v5953_v3  ;;  %v69_v50 = vld [vmem:[%s6780_s1 + $0x8] sm:$0xff] }
 0x851   :  { %v5181_v51 = vadd.f32 %v1820_v25, %v5940_v40  ;;  %v5197_v14 = vadd.f32 %v1891_v35, %v5947_v60 }
 0x852   :  { %v3909_v57 = vmul.f32 -1.442695, %v5180_v29 }
 0x853   :  { %v3910_v61 = vmul.f32 -1.442695, %v5181_v51  ;;  %v3911_v20 = vmul.f32 -1.442695, %v5197_v14 }
 0x854   :  { %5417 = vpow2.f32 %v3909_v57 }
 0x855   :  { %5419 = vpow2.f32 %v3910_v61 }
 0x856   :  { %5421 = vpow2.f32 %v3911_v20 }
 0x857   :  { %5423 = vtanh.f32 %v5196_v24 }
 0x85e   :  { %v5418_v33 = vpop.eup %5417 }
 0x85f   :  { %v5420_v37 = vpop.eup %5419  ;;  %v1901_v59 = vadd.f32 1.0, %v5418_v33 }
 0x860   :  { %v1907_v63 = vadd.f32 1.0, %v5420_v37  ;;  %v5422_v38 = vpop.eup %5421 }
 0x861   :  { %5425 = vrcp.f32 %v1901_v59  ;;  %v5424_v10 = vpop.eup %5423  ;;  %v1914_v21 = vadd.f32 1.0, %v5422_v38 }
 0x862   :  { %5427 = vrcp.f32 %v1907_v63 }
 0x863   :  { %5429 = vrcp.f32 %v1914_v21  ;;  %v73_v21 = vld [vmem:[%s6781_s2 + $0x8] sm:$0xff] }
 0x86b   :  { %v5426_v40 = vpop.eup %5425 }
 0x86c   :  { %v5428_v19 = vpop.eup %5427  ;;  %v1918_v8 = vmul.f32 %v5426_v40, %v5424_v10 }
 0x86d   :  { %v1917_v16 = vmul.f32 %v5428_v19, %v6233_v26  ;;  %v5430_v3 = vpop.eup %5429  ;;  %v3912_v26 = vld [vmem:[%s6784_s5 + $0x4] sm:$0xf] }
 0x86e   :  { %v6417_v29 = vrot.slane %v3912_v26, %v232_v34  ;;  %v6421_v25 = vrot.slane %v3912_v26, %v236_v36  ;;  %v6427_v37 = vrot.slane %v3912_v26, %v244_v44  ;;  %v6432_v36 = vrot.slane %v3912_v26, %v240_v62 }
 0x86f   :  { %v1919_v60 = vadd.f32 %v1918_v8, %v1917_v16 }
 0x871   :  { %5431 = vtanh.f32 %v1919_v60  ;;  %3752 = vst [vmem:[#allocation13] sm:$0xff] %v1919_v60 }
 0x87b   :  { %v5432_v53 = vpop.eup %5431 }
 0x87c   :  { %v1921_v46 = vmul.f32 %v5432_v53, %v5430_v3 }
 0x87e   :  { %2194 = vmatmul.mubr.f32.gmra.mrb[30].mxu0 %v1921_v46  ;;  %3748 = vst [vmem:[#allocation12] sm:$0xff] %v1921_v46  ;;  %2307 = vmatmul.mubr.f32.gmra.mrb[30].mxu1 %v1921_v46 }
 0x87f   :  { %2417 = vmatprep.mubr.f32.mxu0 %v5661_v1  ;;  %2488 = vmatprep.mubr.f32.mxu1 %v5661_v1 }
 0x882   :  { %2418 = vmatmul.mubr.f32.vlgmr.msra.gmra.mrb[16].mxu0 %v69_v50  ;;  %2489 = vmatmul.mubr.f32.vlgmr.msra.gmra.mrb[16].mxu1 %v69_v50 }
 0x883   :  { %4697 = vmatpush1.bf16.msra.mxu0 %v6274_v43  ;;  %4729 = vmatpush1.bf16.msra.mxu1 %v6277_v2 }
 0x884   :  { %4699 = vmatprep.subr.bf16.mxu0 %v6282_v6  ;;  %4731 = vmatprep.subr.bf16.mxu1 %v6284_v31 }
 0x885   :  { %2591 = vmatprep.mubr.f32.mxu0 %v5661_v1  ;;  %2662 = vmatprep.mubr.f32.mxu1 %v5661_v1 }
 0x887   :  { %4701 = vmatpush1.bf16.msra.mxu0 %v6286_v18  ;;  %4733 = vmatpush1.bf16.msra.mxu1 %v6289_v9 }
 0x888   :  { %4703 = vmatprep.subr.bf16.mxu0 %v6294_v54  ;;  %4735 = vmatprep.subr.bf16.mxu1 %v6296_v4 }
 0x88b   :  { %4705 = vmatpush1.bf16.msra.mxu0 %v6298_v7  ;;  %4737 = vmatpush1.bf16.msra.mxu1 %v6301_v17 }
 0x88c   :  { %4707 = vmatprep.subr.bf16.mxu0 %v6306_v30  ;;  %4739 = vmatprep.subr.bf16.mxu1 %v6308_v45 }
 0x88f   :  { %4709 = vmatpush1.bf16.msra.mxu0 %v6310_v49  ;;  %4741 = vmatpush1.bf16.msra.mxu1 %v6313_v5 }
 0x890   :  { %4711 = vmatprep.subr.bf16.mxu0 %v6317_v23  ;;  %4743 = vmatprep.subr.bf16.mxu1 %v6319_v52 }
 0x893   :  { %4713 = vmatpush1.bf16.msra.mxu0 %v6322_v28  ;;  %4745 = vmatpush1.bf16.msra.mxu1 %v6326_v39 }
 0x894   :  { %4715 = vmatprep.subr.bf16.mxu0 %v6328_v58  ;;  %4747 = vmatprep.subr.bf16.mxu1 %v6330_v12 }
 0x897   :  { %4717 = vmatpush1.bf16.msra.mxu0 %v6333_v48  ;;  %4749 = vmatpush1.bf16.msra.mxu1 %v6337_v0 }
 0x898   :  { %4719 = vmatprep.subr.bf16.mxu0 %v6339_v11  ;;  %4751 = vmatprep.subr.bf16.mxu1 %v6342_v27 }
 0x89b   :  { %4721 = vmatpush1.bf16.msra.mxu0 %v6345_v41  ;;  %4753 = vmatpush1.bf16.msra.mxu1 %v6349_v55 }
 0x89c   :  { %4723 = vmatprep.subr.bf16.mxu0 %v6354_v15  ;;  %4755 = vmatprep.subr.bf16.mxu1 %v6356_v13 }
 0x89f   :  { %4725 = vmatpush1.bf16.msra.mxu0 %v6358_v22  ;;  %4757 = vmatpush1.bf16.msra.mxu1 %v6361_v42 }
 0x8a0   :  { %4759 = vmatprep.subr.bf16.mxu0 %v6270_v47  ;;  %4791 = vmatprep.subr.bf16.mxu1 %v6272_v56 }
 0x955   :  { %v2419_v35 = vpop.f32.mrb[16].mxu0  ;;  %v2490_v51 = vpop.f32.mrb[16].mxu1 }
 0x956   :  { %v5198_v57 = vadd.f32 %v2419_v35, %v6417_v29  ;;  %v2421_v61 = vpop.f32.mrb[17].mxu0  ;;  %v2492_v14 = vpop.f32.mrb[17].mxu1  ;;  %v5214_v63 = vadd.f32 %v2490_v51, %v6432_v36 }
 0x957   :  { %v5199_v20 = vadd.f32 %v2421_v61, %v6421_v25  ;;  %v5215_v34 = vadd.f32 %v2492_v14, %v6427_v37 }
 0x958   :  { %v3913_v24 = vmul.f32 -1.442695, %v5198_v57 }
 0x959   :  { %v3914_v33 = vmul.f32 -1.442695, %v5199_v20  ;;  %v3915_v59 = vmul.f32 -1.442695, %v5215_v34 }
 0x95a   :  { %5433 = vpow2.f32 %v3913_v24 }
 0x95b   :  { %5435 = vpow2.f32 %v3914_v33 }
 0x95c   :  { %5437 = vpow2.f32 %v3915_v59 }
 0x95d   :  { %5439 = vtanh.f32 %v5214_v63 }
 0x964   :  { %v5434_v38 = vpop.eup %5433 }
 0x965   :  { %v5436_v10 = vpop.eup %5435  ;;  %v2502_v40 = vadd.f32 1.0, %v5434_v38 }
 0x966   :  { %v2508_v19 = vadd.f32 1.0, %v5436_v10  ;;  %v5438_v44 = vpop.eup %5437 }
 0x967   :  { %5441 = vrcp.f32 %v2502_v40  ;;  %v5440_v8 = vpop.eup %5439  ;;  %v2515_v60 = vadd.f32 1.0, %v5438_v44 }
 0x968   :  { %5443 = vrcp.f32 %v2508_v19 }
 0x969   :  { %5445 = vrcp.f32 %v2515_v60 }
 0x971   :  { %v5442_v32 = vpop.eup %5441 }
 0x972   :  { %v5444_v62 = vpop.eup %5443  ;;  %v2519_v16 = vmul.f32 %v5442_v32, %v5440_v8 }
 0x973   :  { %v2518_v3 = vmul.f32 %v5444_v62, %v73_v21  ;;  %v5446_v46 = vpop.eup %5445 }
 0x975   :  { %v6438_v53 = vadd.f32 %v2519_v16, %v2518_v3 }
 0x977   :  { %5447 = vtanh.f32 %v6438_v53 }
 0x981   :  { %v5448_v50 = vpop.eup %5447 }
 0x982   :  { %v2522_v26 = vmul.f32 %v5448_v50, %v5446_v46 }
 0x984   :  { %2592 = vmatmul.mubr.f32.vlgmr.msra.gmra.mrb[18].mxu0 %v2522_v26  ;;  %2663 = vmatmul.mubr.f32.vlgmr.msra.gmra.mrb[18].mxu1 %v2522_v26 }
 0x985   :  { %4761 = vmatpush1.bf16.msra.mxu0 %v6274_v43  ;;  %4793 = vmatpush1.bf16.msra.mxu1 %v6277_v2 }
 0x986   :  { %4763 = vmatprep.subr.bf16.mxu0 %v6282_v6  ;;  %4795 = vmatprep.subr.bf16.mxu1 %v6284_v31 }
 0x987   :  { %2765 = vmatprep.mubr.f32.mxu0 %v5661_v1  ;;  %2836 = vmatprep.mubr.f32.mxu1 %v5661_v1 }
 0x989   :  { %4765 = vmatpush1.bf16.msra.mxu0 %v6286_v18  ;;  %4797 = vmatpush1.bf16.msra.mxu1 %v6289_v9 }
 0x98a   :  { %4767 = vmatprep.subr.bf16.mxu0 %v6294_v54  ;;  %4799 = vmatprep.subr.bf16.mxu1 %v6296_v4 }
 0x98d   :  { %4769 = vmatpush1.bf16.msra.mxu0 %v6298_v7  ;;  %4801 = vmatpush1.bf16.msra.mxu1 %v6301_v17 }
 0x98e   :  { %4771 = vmatprep.subr.bf16.mxu0 %v6306_v30  ;;  %4803 = vmatprep.subr.bf16.mxu1 %v6308_v45 }
 0x991   :  { %4773 = vmatpush1.bf16.msra.mxu0 %v6310_v49  ;;  %4805 = vmatpush1.bf16.msra.mxu1 %v6313_v5 }
 0x992   :  { %4775 = vmatprep.subr.bf16.mxu0 %v6317_v23  ;;  %4807 = vmatprep.subr.bf16.mxu1 %v6319_v52 }
 0x995   :  { %4777 = vmatpush1.bf16.msra.mxu0 %v6322_v28  ;;  %4809 = vmatpush1.bf16.msra.mxu1 %v6326_v39 }
 0x996   :  { %4779 = vmatprep.subr.bf16.mxu0 %v6328_v58  ;;  %4811 = vmatprep.subr.bf16.mxu1 %v6330_v12 }
 0x999   :  { %4781 = vmatpush1.bf16.msra.mxu0 %v6333_v48  ;;  %4813 = vmatpush1.bf16.msra.mxu1 %v6337_v0 }
 0x99a   :  { %4783 = vmatprep.subr.bf16.mxu0 %v6339_v11  ;;  %4815 = vmatprep.subr.bf16.mxu1 %v6342_v27 }
 0x99d   :  { %4785 = vmatpush1.bf16.msra.mxu0 %v6345_v41  ;;  %4817 = vmatpush1.bf16.msra.mxu1 %v6349_v55 }
 0x99e   :  { %4787 = vmatprep.subr.bf16.mxu0 %v6354_v15  ;;  %4819 = vmatprep.subr.bf16.mxu1 %v6356_v13 }
 0x9a1   :  { %4789 = vmatpush1.bf16.msra.mxu0 %v6358_v22  ;;  %4821 = vmatpush1.bf16.msra.mxu1 %v6361_v42 }
 0x9a2   :  { %4823 = vmatprep.subr.bf16.mxu0 %v6270_v47  ;;  %4855 = vmatprep.subr.bf16.mxu1 %v6272_v56 }
 0xa57   :  { %v2593_v35 = vpop.f32.mrb[18].mxu0  ;;  %v2664_v51 = vpop.f32.mrb[18].mxu1 }
 0xa58   :  { %v5200_v57 = vadd.f32 %v2593_v35, %v6417_v29  ;;  %v2595_v61 = vpop.f32.mrb[19].mxu0  ;;  %v2666_v14 = vpop.f32.mrb[19].mxu1  ;;  %v5216_v63 = vadd.f32 %v2664_v51, %v6432_v36 }
 0xa59   :  { %v5201_v20 = vadd.f32 %v2595_v61, %v6421_v25  ;;  %v5217_v34 = vadd.f32 %v2666_v14, %v6427_v37 }
 0xa5a   :  { %v3916_v24 = vmul.f32 -1.442695, %v5200_v57 }
 0xa5b   :  { %v3917_v33 = vmul.f32 -1.442695, %v5201_v20  ;;  %v3918_v59 = vmul.f32 -1.442695, %v5217_v34 }
 0xa5c   :  { %5449 = vpow2.f32 %v3916_v24 }
 0xa5d   :  { %5451 = vpow2.f32 %v3917_v33 }
 0xa5e   :  { %5453 = vpow2.f32 %v3918_v59 }
 0xa5f   :  { %5455 = vtanh.f32 %v5216_v63 }
 0xa66   :  { %v5450_v38 = vpop.eup %5449 }
 0xa67   :  { %v5452_v10 = vpop.eup %5451  ;;  %v2676_v40 = vadd.f32 1.0, %v5450_v38 }
 0xa68   :  { %v2682_v19 = vadd.f32 1.0, %v5452_v10  ;;  %v5454_v44 = vpop.eup %5453 }
 0xa69   :  { %5457 = vrcp.f32 %v2676_v40  ;;  %v5456_v8 = vpop.eup %5455  ;;  %v2689_v16 = vadd.f32 1.0, %v5454_v44 }
 0xa6a   :  { %5459 = vrcp.f32 %v2682_v19 }
 0xa6b   :  { %5461 = vrcp.f32 %v2689_v16 }
 0xa73   :  { %v5458_v21 = vpop.eup %5457 }
 0xa74   :  { %v5460_v32 = vpop.eup %5459  ;;  %v2693_v62 = vmul.f32 %v5458_v21, %v5456_v8 }
 0xa75   :  { %v2692_v60 = vmul.f32 %v5460_v32, %v6438_v53  ;;  %v5462_v46 = vpop.eup %5461 }
 0xa77   :  { %v6480_v3 = vadd.f32 %v2693_v62, %v2692_v60 }
 0xa79   :  { %5463 = vtanh.f32 %v6480_v3 }
 0xa83   :  { %v5464_v50 = vpop.eup %5463 }
 0xa84   :  { %v2696_v26 = vmul.f32 %v5464_v50, %v5462_v46 }
 0xa86   :  { %2766 = vmatmul.mubr.f32.vlgmr.msra.gmra.mrb[20].mxu0 %v2696_v26  ;;  %2837 = vmatmul.mubr.f32.vlgmr.msra.gmra.mrb[20].mxu1 %v2696_v26 }
 0xa87   :  { %4825 = vmatpush1.bf16.msra.mxu0 %v6274_v43  ;;  %4857 = vmatpush1.bf16.msra.mxu1 %v6277_v2 }
 0xa88   :  { %4827 = vmatprep.subr.bf16.mxu0 %v6282_v6  ;;  %4859 = vmatprep.subr.bf16.mxu1 %v6284_v31 }
 0xa89   :  { %2939 = vmatprep.mubr.f32.mxu0 %v5661_v1  ;;  %3010 = vmatprep.mubr.f32.mxu1 %v5661_v1 }
 0xa8b   :  { %4829 = vmatpush1.bf16.msra.mxu0 %v6286_v18  ;;  %4861 = vmatpush1.bf16.msra.mxu1 %v6289_v9 }
 0xa8c   :  { %4831 = vmatprep.subr.bf16.mxu0 %v6294_v54  ;;  %4863 = vmatprep.subr.bf16.mxu1 %v6296_v4 }
 0xa8f   :  { %4833 = vmatpush1.bf16.msra.mxu0 %v6298_v7  ;;  %4865 = vmatpush1.bf16.msra.mxu1 %v6301_v17 }
 0xa90   :  { %4835 = vmatprep.subr.bf16.mxu0 %v6306_v30  ;;  %4867 = vmatprep.subr.bf16.mxu1 %v6308_v45 }
 0xa93   :  { %4837 = vmatpush1.bf16.msra.mxu0 %v6310_v49  ;;  %4869 = vmatpush1.bf16.msra.mxu1 %v6313_v5 }
 0xa94   :  { %4839 = vmatprep.subr.bf16.mxu0 %v6317_v23  ;;  %4871 = vmatprep.subr.bf16.mxu1 %v6319_v52 }
 0xa97   :  { %4841 = vmatpush1.bf16.msra.mxu0 %v6322_v28  ;;  %4873 = vmatpush1.bf16.msra.mxu1 %v6326_v39 }
 0xa98   :  { %4843 = vmatprep.subr.bf16.mxu0 %v6328_v58  ;;  %4875 = vmatprep.subr.bf16.mxu1 %v6330_v12 }
 0xa9b   :  { %4845 = vmatpush1.bf16.msra.mxu0 %v6333_v48  ;;  %4877 = vmatpush1.bf16.msra.mxu1 %v6337_v0 }
 0xa9c   :  { %4847 = vmatprep.subr.bf16.mxu0 %v6339_v11  ;;  %4879 = vmatprep.subr.bf16.mxu1 %v6342_v27 }
 0xa9f   :  { %4849 = vmatpush1.bf16.msra.mxu0 %v6345_v41  ;;  %4881 = vmatpush1.bf16.msra.mxu1 %v6349_v55 }
 0xaa0   :  { %4851 = vmatprep.subr.bf16.mxu0 %v6354_v15  ;;  %4883 = vmatprep.subr.bf16.mxu1 %v6356_v13 }
 0xaa3   :  { %4853 = vmatpush1.bf16.msra.mxu0 %v6358_v22  ;;  %4885 = vmatpush1.bf16.msra.mxu1 %v6361_v42 }
 0xaa4   :  { %4887 = vmatprep.subr.bf16.mxu0 %v6270_v47  ;;  %4919 = vmatprep.subr.bf16.mxu1 %v6272_v56 }
 0xb59   :  { %v2767_v53 = vpop.f32.mrb[20].mxu0  ;;  %v2838_v35 = vpop.f32.mrb[20].mxu1 }
 0xb5a   :  { %v5202_v51 = vadd.f32 %v2767_v53, %v6417_v29  ;;  %v2769_v57 = vpop.f32.mrb[21].mxu0  ;;  %v2840_v61 = vpop.f32.mrb[21].mxu1  ;;  %v5218_v59 = vadd.f32 %v2838_v35, %v6432_v36 }
 0xb5b   :  { %v5203_v14 = vadd.f32 %v2769_v57, %v6421_v25  ;;  %v5219_v33 = vadd.f32 %v2840_v61, %v6427_v37 }
 0xb5c   :  { %v3919_v20 = vmul.f32 -1.442695, %v5202_v51 }
 0xb5d   :  { %v3920_v24 = vmul.f32 -1.442695, %v5203_v14  ;;  %v3921_v34 = vmul.f32 -1.442695, %v5219_v33 }
 0xb5e   :  { %5465 = vpow2.f32 %v3919_v20 }
 0xb5f   :  { %5467 = vpow2.f32 %v3920_v24 }
 0xb60   :  { %5469 = vpow2.f32 %v3921_v34 }
 0xb61   :  { %5471 = vtanh.f32 %v5218_v59 }
 0xb68   :  { %v5466_v63 = vpop.eup %5465 }
 0xb69   :  { %v5468_v38 = vpop.eup %5467  ;;  %v2850_v10 = vadd.f32 1.0, %v5466_v63 }
 0xb6a   :  { %v2856_v40 = vadd.f32 1.0, %v5468_v38  ;;  %v5470_v19 = vpop.eup %5469 }
 0xb6b   :  { %5473 = vrcp.f32 %v2850_v10  ;;  %v5472_v44 = vpop.eup %5471  ;;  %v2863_v62 = vadd.f32 1.0, %v5470_v19 }
 0xb6c   :  { %5475 = vrcp.f32 %v2856_v40 }
 0xb6d   :  { %5477 = vrcp.f32 %v2863_v62 }
 0xb75   :  { %v5474_v8 = vpop.eup %5473 }
 0xb76   :  { %v5476_v21 = vpop.eup %5475  ;;  %v2867_v32 = vmul.f32 %v5474_v8, %v5472_v44 }
 0xb77   :  { %v2866_v16 = vmul.f32 %v5476_v21, %v6480_v3  ;;  %v5478_v46 = vpop.eup %5477 }
 0xb79   :  { %v6522_v60 = vadd.f32 %v2867_v32, %v2866_v16 }
 0xb7b   :  { %5479 = vtanh.f32 %v6522_v60 }
 0xb85   :  { %v5480_v50 = vpop.eup %5479 }
 0xb86   :  { %v2870_v26 = vmul.f32 %v5480_v50, %v5478_v46 }
 0xb88   :  { %2940 = vmatmul.mubr.f32.vlgmr.msra.gmra.mrb[22].mxu0 %v2870_v26  ;;  %3011 = vmatmul.mubr.f32.vlgmr.msra.gmra.mrb[22].mxu1 %v2870_v26 }
 0xb89   :  { %4889 = vmatpush1.bf16.msra.mxu0 %v6274_v43  ;;  %4921 = vmatpush1.bf16.msra.mxu1 %v6277_v2 }
 0xb8a   :  { %4891 = vmatprep.subr.bf16.mxu0 %v6282_v6  ;;  %4923 = vmatprep.subr.bf16.mxu1 %v6284_v31 }
 0xb8b   :  { %3113 = vmatprep.mubr.f32.mxu0 %v5661_v1  ;;  %3184 = vmatprep.mubr.f32.mxu1 %v5661_v1 }
 0xb8d   :  { %4893 = vmatpush1.bf16.msra.mxu0 %v6286_v18  ;;  %4925 = vmatpush1.bf16.msra.mxu1 %v6289_v9 }
 0xb8e   :  { %4895 = vmatprep.subr.bf16.mxu0 %v6294_v54  ;;  %4927 = vmatprep.subr.bf16.mxu1 %v6296_v4 }
 0xb91   :  { %4897 = vmatpush1.bf16.msra.mxu0 %v6298_v7  ;;  %4929 = vmatpush1.bf16.msra.mxu1 %v6301_v17 }
 0xb92   :  { %4899 = vmatprep.subr.bf16.mxu0 %v6306_v30  ;;  %4931 = vmatprep.subr.bf16.mxu1 %v6308_v45 }
 0xb95   :  { %4901 = vmatpush1.bf16.msra.mxu0 %v6310_v49  ;;  %4933 = vmatpush1.bf16.msra.mxu1 %v6313_v5 }
 0xb96   :  { %4903 = vmatprep.subr.bf16.mxu0 %v6317_v23  ;;  %4935 = vmatprep.subr.bf16.mxu1 %v6319_v52 }
 0xb99   :  { %4905 = vmatpush1.bf16.msra.mxu0 %v6322_v28  ;;  %4937 = vmatpush1.bf16.msra.mxu1 %v6326_v39 }
 0xb9a   :  { %4907 = vmatprep.subr.bf16.mxu0 %v6328_v58  ;;  %4939 = vmatprep.subr.bf16.mxu1 %v6330_v12 }
 0xb9d   :  { %4909 = vmatpush1.bf16.msra.mxu0 %v6333_v48  ;;  %4941 = vmatpush1.bf16.msra.mxu1 %v6337_v0 }
 0xb9e   :  { %4911 = vmatprep.subr.bf16.mxu0 %v6339_v11  ;;  %4943 = vmatprep.subr.bf16.mxu1 %v6342_v27 }
 0xba1   :  { %4913 = vmatpush1.bf16.msra.mxu0 %v6345_v41  ;;  %4945 = vmatpush1.bf16.msra.mxu1 %v6349_v55 }
 0xba2   :  { %4915 = vmatprep.subr.bf16.mxu0 %v6354_v15  ;;  %4947 = vmatprep.subr.bf16.mxu1 %v6356_v13 }
 0xba5   :  { %4917 = vmatpush1.bf16.msra.mxu0 %v6358_v22  ;;  %4949 = vmatpush1.bf16.msra.mxu1 %v6361_v42 }
 0xba6   :  { %4951 = vmatprep.subr.bf16.mxu0 %v6270_v47  ;;  %4983 = vmatprep.subr.bf16.mxu1 %v6272_v56 }
 0xc5b   :  { %v2941_v3 = vpop.f32.mrb[22].mxu0  ;;  %v3012_v53 = vpop.f32.mrb[22].mxu1 }
 0xc5c   :  { %v5204_v35 = vadd.f32 %v2941_v3, %v6417_v29  ;;  %v2943_v51 = vpop.f32.mrb[23].mxu0  ;;  %v3014_v57 = vpop.f32.mrb[23].mxu1  ;;  %v5220_v34 = vadd.f32 %v3012_v53, %v6432_v36 }
 0xc5d   :  { %v5205_v61 = vadd.f32 %v2943_v51, %v6421_v25  ;;  %v5221_v24 = vadd.f32 %v3014_v57, %v6427_v37 }
 0xc5e   :  { %v3922_v14 = vmul.f32 -1.442695, %v5204_v35 }
 0xc5f   :  { %v3923_v20 = vmul.f32 -1.442695, %v5205_v61  ;;  %v3924_v33 = vmul.f32 -1.442695, %v5221_v24 }
 0xc60   :  { %5481 = vpow2.f32 %v3922_v14 }
 0xc61   :  { %5483 = vpow2.f32 %v3923_v20 }
 0xc62   :  { %5485 = vpow2.f32 %v3924_v33 }
 0xc63   :  { %5487 = vtanh.f32 %v5220_v34 }
 0xc6a   :  { %v5482_v59 = vpop.eup %5481 }
 0xc6b   :  { %v5484_v63 = vpop.eup %5483  ;;  %v3024_v38 = vadd.f32 1.0, %v5482_v59 }
 0xc6c   :  { %v3030_v10 = vadd.f32 1.0, %v5484_v63  ;;  %v5486_v40 = vpop.eup %5485 }
 0xc6d   :  { %5489 = vrcp.f32 %v3024_v38  ;;  %v5488_v19 = vpop.eup %5487  ;;  %v3037_v32 = vadd.f32 1.0, %v5486_v40 }
 0xc6e   :  { %5491 = vrcp.f32 %v3030_v10 }
 0xc6f   :  { %5493 = vrcp.f32 %v3037_v32 }
 0xc77   :  { %v5490_v44 = vpop.eup %5489 }
 0xc78   :  { %v5492_v8 = vpop.eup %5491  ;;  %v3041_v21 = vmul.f32 %v5490_v44, %v5488_v19 }
 0xc79   :  { %v3040_v62 = vmul.f32 %v5492_v8, %v6522_v60  ;;  %v5494_v46 = vpop.eup %5493 }
 0xc7b   :  { %v6564_v16 = vadd.f32 %v3041_v21, %v3040_v62 }
 0xc7d   :  { %5495 = vtanh.f32 %v6564_v16 }
 0xc87   :  { %v5496_v50 = vpop.eup %5495 }
 0xc88   :  { %v3044_v26 = vmul.f32 %v5496_v50, %v5494_v46 }
 0xc8a   :  { %3114 = vmatmul.mubr.f32.vlgmr.msra.gmra.mrb[24].mxu0 %v3044_v26  ;;  %3185 = vmatmul.mubr.f32.vlgmr.msra.gmra.mrb[24].mxu1 %v3044_v26 }
 0xc8b   :  { %4953 = vmatpush1.bf16.msra.mxu0 %v6274_v43  ;;  %4985 = vmatpush1.bf16.msra.mxu1 %v6277_v2 }
 0xc8c   :  { %4955 = vmatprep.subr.bf16.mxu0 %v6282_v6  ;;  %4987 = vmatprep.subr.bf16.mxu1 %v6284_v31 }
 0xc8d   :  { %3287 = vmatprep.mubr.f32.mxu0 %v5661_v1  ;;  %3358 = vmatprep.mubr.f32.mxu1 %v5661_v1 }
 0xc8f   :  { %4957 = vmatpush1.bf16.msra.mxu0 %v6286_v18  ;;  %4989 = vmatpush1.bf16.msra.mxu1 %v6289_v9 }
 0xc90   :  { %4959 = vmatprep.subr.bf16.mxu0 %v6294_v54  ;;  %4991 = vmatprep.subr.bf16.mxu1 %v6296_v4 }
 0xc93   :  { %4961 = vmatpush1.bf16.msra.mxu0 %v6298_v7  ;;  %4993 = vmatpush1.bf16.msra.mxu1 %v6301_v17 }
 0xc94   :  { %4963 = vmatprep.subr.bf16.mxu0 %v6306_v30  ;;  %4995 = vmatprep.subr.bf16.mxu1 %v6308_v45 }
 0xc97   :  { %4965 = vmatpush1.bf16.msra.mxu0 %v6310_v49  ;;  %4997 = vmatpush1.bf16.msra.mxu1 %v6313_v5 }
 0xc98   :  { %4967 = vmatprep.subr.bf16.mxu0 %v6317_v23  ;;  %4999 = vmatprep.subr.bf16.mxu1 %v6319_v52 }
 0xc9b   :  { %4969 = vmatpush1.bf16.msra.mxu0 %v6322_v28  ;;  %5001 = vmatpush1.bf16.msra.mxu1 %v6326_v39 }
 0xc9c   :  { %4971 = vmatprep.subr.bf16.mxu0 %v6328_v58  ;;  %5003 = vmatprep.subr.bf16.mxu1 %v6330_v12 }
 0xc9f   :  { %4973 = vmatpush1.bf16.msra.mxu0 %v6333_v48  ;;  %5005 = vmatpush1.bf16.msra.mxu1 %v6337_v0 }
 0xca0   :  { %4975 = vmatprep.subr.bf16.mxu0 %v6339_v11  ;;  %5007 = vmatprep.subr.bf16.mxu1 %v6342_v27 }
 0xca3   :  { %4977 = vmatpush1.bf16.msra.mxu0 %v6345_v41  ;;  %5009 = vmatpush1.bf16.msra.mxu1 %v6349_v55 }
 0xca4   :  { %4979 = vmatprep.subr.bf16.mxu0 %v6354_v15  ;;  %5011 = vmatprep.subr.bf16.mxu1 %v6356_v13 }
 0xca7   :  { %4981 = vmatpush1.bf16.msra.mxu0 %v6358_v22  ;;  %5013 = vmatpush1.bf16.msra.mxu1 %v6361_v42 }
 0xca8   :  { %5015 = vmatprep.subr.bf16.mxu0 %v6270_v47  ;;  %5047 = vmatprep.subr.bf16.mxu1 %v6272_v56 }
 0xd5d   :  { %v3115_v60 = vpop.f32.mrb[24].mxu0  ;;  %v3186_v3 = vpop.f32.mrb[24].mxu1 }
 0xd5e   :  { %v5206_v53 = vadd.f32 %v3115_v60, %v6417_v29  ;;  %v3117_v35 = vpop.f32.mrb[25].mxu0  ;;  %v3188_v51 = vpop.f32.mrb[25].mxu1  ;;  %v5222_v33 = vadd.f32 %v3186_v3, %v6432_v36 }
 0xd5f   :  { %v5207_v57 = vadd.f32 %v3117_v35, %v6421_v25  ;;  %v5223_v20 = vadd.f32 %v3188_v51, %v6427_v37 }
 0xd60   :  { %v3925_v61 = vmul.f32 -1.442695, %v5206_v53 }
 0xd61   :  { %v3926_v14 = vmul.f32 -1.442695, %v5207_v57  ;;  %v3927_v24 = vmul.f32 -1.442695, %v5223_v20 }
 0xd62   :  { %5497 = vpow2.f32 %v3925_v61 }
 0xd63   :  { %5499 = vpow2.f32 %v3926_v14 }
 0xd64   :  { %5501 = vpow2.f32 %v3927_v24 }
 0xd65   :  { %5503 = vtanh.f32 %v5222_v33 }
 0xd6c   :  { %v5498_v34 = vpop.eup %5497 }
 0xd6d   :  { %v5500_v59 = vpop.eup %5499  ;;  %v3198_v63 = vadd.f32 1.0, %v5498_v34 }
 0xd6e   :  { %v3204_v38 = vadd.f32 1.0, %v5500_v59  ;;  %v5502_v10 = vpop.eup %5501 }
 0xd6f   :  { %5505 = vrcp.f32 %v3198_v63  ;;  %v5504_v40 = vpop.eup %5503  ;;  %v3211_v21 = vadd.f32 1.0, %v5502_v10 }
 0xd70   :  { %5507 = vrcp.f32 %v3204_v38 }
 0xd71   :  { %5509 = vrcp.f32 %v3211_v21 }
 0xd79   :  { %v5506_v19 = vpop.eup %5505 }
 0xd7a   :  { %v5508_v44 = vpop.eup %5507  ;;  %v3215_v8 = vmul.f32 %v5506_v19, %v5504_v40 }
 0xd7b   :  { %v3214_v32 = vmul.f32 %v5508_v44, %v6564_v16  ;;  %v5510_v46 = vpop.eup %5509 }
 0xd7d   :  { %v6606_v62 = vadd.f32 %v3215_v8, %v3214_v32 }
 0xd7f   :  { %5511 = vtanh.f32 %v6606_v62 }
 0xd89   :  { %v5512_v50 = vpop.eup %5511 }
 0xd8a   :  { %v3218_v26 = vmul.f32 %v5512_v50, %v5510_v46  ;;  %v3758_v50 = vld [vmem:[%s6785_s6 + $0x18] sm:$0xff] }
 0xd8c   :  { %3288 = vmatmul.mubr.f32.vlgmr.msra.gmra.mrb[26].mxu0 %v3218_v26  ;;  %3359 = vmatmul.mubr.f32.vlgmr.msra.gmra.mrb[26].mxu1 %v3218_v26 }
 0xd8d   :  { %5017 = vmatpush1.bf16.msra.mxu0 %v6274_v43  ;;  %5049 = vmatpush1.bf16.msra.mxu1 %v6277_v2 }
 0xd8e   :  { %5019 = vmatprep.subr.bf16.mxu0 %v6282_v6  ;;  %5051 = vmatprep.subr.bf16.mxu1 %v6284_v31 }
 0xd8f   :  { %3461 = vmatprep.mubr.f32.mxu0 %v5661_v1  ;;  %3532 = vmatprep.mubr.f32.mxu1 %v5661_v1 }
 0xd91   :  { %5021 = vmatpush1.bf16.msra.mxu0 %v6286_v18  ;;  %5053 = vmatpush1.bf16.msra.mxu1 %v6289_v9 }
 0xd92   :  { %5023 = vmatprep.subr.bf16.mxu0 %v6294_v54  ;;  %5055 = vmatprep.subr.bf16.mxu1 %v6296_v4 }
 0xd95   :  { %5025 = vmatpush1.bf16.msra.mxu0 %v6298_v7  ;;  %5057 = vmatpush1.bf16.msra.mxu1 %v6301_v17 }
 0xd96   :  { %5027 = vmatprep.subr.bf16.mxu0 %v6306_v30  ;;  %5059 = vmatprep.subr.bf16.mxu1 %v6308_v45 }
 0xd99   :  { %5029 = vmatpush1.bf16.msra.mxu0 %v6310_v49  ;;  %5061 = vmatpush1.bf16.msra.mxu1 %v6313_v5 }
 0xd9a   :  { %5031 = vmatprep.subr.bf16.mxu0 %v6317_v23  ;;  %5063 = vmatprep.subr.bf16.mxu1 %v6319_v52 }
 0xd9d   :  { %5033 = vmatpush1.bf16.msra.mxu0 %v6322_v28  ;;  %5065 = vmatpush1.bf16.msra.mxu1 %v6326_v39 }
 0xd9e   :  { %5035 = vmatprep.subr.bf16.mxu0 %v6328_v58  ;;  %5067 = vmatprep.subr.bf16.mxu1 %v6330_v12 }
 0xda1   :  { %5037 = vmatpush1.bf16.msra.mxu0 %v6333_v48  ;;  %5069 = vmatpush1.bf16.msra.mxu1 %v6337_v0 }
 0xda2   :  { %5039 = vmatprep.subr.bf16.mxu0 %v6339_v11  ;;  %5071 = vmatprep.subr.bf16.mxu1 %v6342_v27 }
 0xda5   :  { %5041 = vmatpush1.bf16.msra.mxu0 %v6345_v41  ;;  %5073 = vmatpush1.bf16.msra.mxu1 %v6349_v55 }
 0xda6   :  { %5043 = vmatprep.subr.bf16.mxu0 %v6354_v15  ;;  %5075 = vmatprep.subr.bf16.mxu1 %v6356_v13 }
 0xda9   :  { %5045 = vmatpush1.bf16.msra.mxu0 %v6358_v22  ;;  %5077 = vmatpush1.bf16.msra.mxu1 %v6361_v42 }
 0xdaa   :  { %5079 = vmatprep.subr.bf16.mxu0 %v6270_v47  ;;  %5111 = vmatprep.subr.bf16.mxu1 %v6272_v56 }
 0xe5f   :  { %v3289_v16 = vpop.f32.mrb[26].mxu0  ;;  %v3360_v60 = vpop.f32.mrb[26].mxu1 }
 0xe60   :  { %v5208_v3 = vadd.f32 %v3289_v16, %v6417_v29  ;;  %v3291_v53 = vpop.f32.mrb[27].mxu0  ;;  %v3362_v35 = vpop.f32.mrb[27].mxu1  ;;  %v5224_v24 = vadd.f32 %v3360_v60, %v6432_v36  ;;  %v3759_v16 = vld [vmem:[%s6785_s6 + $0x20] sm:$0xff]  ;;  %v3760_v60 = vld [vmem:[%s6785_s6 + $0x28] sm:$0xff] }
 0xe61   :  { %v5209_v51 = vadd.f32 %v3291_v53, %v6421_v25  ;;  %v5225_v14 = vadd.f32 %v3362_v35, %v6427_v37  ;;  %v3761_v53 = vld [vmem:[%s6785_s6 + $0x30] sm:$0xff]  ;;  %v3762_v35 = vld [vmem:[%s6785_s6 + $0x38] sm:$0xff] }
 0xe62   :  { %v3928_v57 = vmul.f32 -1.442695, %v5208_v3  ;;  %v5149_v3 = vpack.c.bf16 %v3760_v60, %v3759_v16 }
 0xe63   :  { %v3929_v61 = vmul.f32 -1.442695, %v5209_v51  ;;  %v3930_v20 = vmul.f32 -1.442695, %v5225_v14  ;;  %v5152_v51 = vpack.c.bf16 %v3762_v35, %v3761_v53 }
 0xe64   :  { %5513 = vpow2.f32 %v3928_v57  ;;  %v3763_v57 = vld [vmem:[%s6785_s6 + $0x40] sm:$0xff] }
 0xe65   :  { %5515 = vpow2.f32 %v3929_v61  ;;  %v3764_v61 = vld [vmem:[%s6785_s6 + $0x48] sm:$0xff] }
 0xe66   :  { %5517 = vpow2.f32 %v3930_v20  ;;  %v5155_v14 = vpack.c.bf16 %v3764_v61, %v3763_v57  ;;  %v3765_v20 = vld [vmem:[%s6785_s6 + $0x50] sm:$0xff] }
 0xe67   :  { %5519 = vtanh.f32 %v5224_v24  ;;  %v3766_v24 = vld [vmem:[%s6785_s6 + $0x58] sm:$0xff] }
 0xe6e   :  { %v5514_v47 = vpop.eup %5513 }
 0xe6f   :  { %v5516_v33 = vpop.eup %5515  ;;  %v3372_v56 = vadd.f32 1.0, %v5514_v47  ;;  %v3767_v47 = vld [vmem:[%s6785_s6 + $0x60] sm:$0xff] }
 0xe70   :  { %v3378_v34 = vadd.f32 1.0, %v5516_v33  ;;  %v5518_v59 = vpop.eup %5517  ;;  %v5158_v33 = vpack.c.bf16 %v3766_v24, %v3765_v20 }
 0xe71   :  { %5521 = vrcp.f32 %v3372_v56  ;;  %v5520_v63 = vpop.eup %5519  ;;  %v3385_v19 = vadd.f32 1.0, %v5518_v59  ;;  %v3768_v56 = vld [vmem:[%s6785_s6 + $0x68] sm:$0xff]  ;;  %v3769_v59 = vld [vmem:[%s6785_s6 + $0x70] sm:$0xff] }
 0xe72   :  { %5523 = vrcp.f32 %v3378_v34  ;;  %v5161_v34 = vpack.c.bf16 %v3768_v56, %v3767_v47 }
 0xe73   :  { %5525 = vrcp.f32 %v3385_v19 }
 0xe7b   :  { %v5522_v38 = vpop.eup %5521 }
 0xe7c   :  { %v5524_v10 = vpop.eup %5523  ;;  %v3389_v40 = vmul.f32 %v5522_v38, %v5520_v63  ;;  %v3770_v63 = vld [vmem:[%s6785_s6 + $0x78] sm:$0xff] }
 0xe7d   :  { %v3388_v44 = vmul.f32 %v5524_v10, %v6606_v62  ;;  %v5526_v21 = vpop.eup %5525  ;;  %v3757_v62 = vld [vmem:[%s6785_s6 + $0x10] sm:$0xff]  ;;  %v5164_v38 = vpack.c.bf16 %v3770_v63, %v3769_v59 }
 0xe7e   :  { %v5146_v26 = vpack.c.bf16 %v3758_v50, %v3757_v62 }
 0xe7f   :  { %v6648_v8 = vadd.f32 %v3389_v40, %v3388_v44 }
 0xe81   :  { %5527 = vtanh.f32 %v6648_v8 }
 0xe8b   :  { %v5528_v32 = vpop.eup %5527 }
 0xe8c   :  { %v3392_v46 = vmul.f32 %v5528_v32, %v5526_v21 }
 0xe8e   :  { %3462 = vmatmul.mubr.f32.vlgmr.msra.gmra.mrb[28].mxu0 %v3392_v46  ;;  %3533 = vmatmul.mubr.f32.vlgmr.msra.gmra.mrb[28].mxu1 %v3392_v46 }
 0xe8f   :  { %5081 = vmatpush1.bf16.msra.mxu0 %v6274_v43  ;;  %5113 = vmatpush1.bf16.msra.mxu1 %v6277_v2 }
 0xe90   :  { %5083 = vmatprep.subr.bf16.mxu0 %v6282_v6  ;;  %5115 = vmatprep.subr.bf16.mxu1 %v6284_v31 }
 0xe91   :  { %3635 = vmatprep.mubr.f32.mxu0 %v5661_v1  ;;  %3706 = vmatprep.mubr.f32.mxu1 %v5661_v1 }
 0xe93   :  { %5085 = vmatpush1.bf16.msra.mxu0 %v6286_v18  ;;  %5117 = vmatpush1.bf16.msra.mxu1 %v6289_v9 }
 0xe94   :  { %5087 = vmatprep.subr.bf16.mxu0 %v6294_v54  ;;  %5119 = vmatprep.subr.bf16.mxu1 %v6296_v4 }
 0xe97   :  { %5089 = vmatpush1.bf16.msra.mxu0 %v6298_v7  ;;  %5121 = vmatpush1.bf16.msra.mxu1 %v6301_v17 }
 0xe98   :  { %5091 = vmatprep.subr.bf16.mxu0 %v6306_v30  ;;  %5123 = vmatprep.subr.bf16.mxu1 %v6308_v45 }
 0xe9b   :  { %5093 = vmatpush1.bf16.msra.mxu0 %v6310_v49  ;;  %5125 = vmatpush1.bf16.msra.mxu1 %v6313_v5 }
 0xe9c   :  { %5095 = vmatprep.subr.bf16.mxu0 %v6317_v23  ;;  %5127 = vmatprep.subr.bf16.mxu1 %v6319_v52 }
 0xe9f   :  { %5097 = vmatpush1.bf16.msra.mxu0 %v6322_v28  ;;  %5129 = vmatpush1.bf16.msra.mxu1 %v6326_v39 }
 0xea0   :  { %5099 = vmatprep.subr.bf16.mxu0 %v6328_v58  ;;  %5131 = vmatprep.subr.bf16.mxu1 %v6330_v12 }
 0xea3   :  { %5101 = vmatpush1.bf16.msra.mxu0 %v6333_v48  ;;  %5133 = vmatpush1.bf16.msra.mxu1 %v6337_v0 }
 0xea4   :  { %5103 = vmatprep.subr.bf16.mxu0 %v6339_v11  ;;  %5135 = vmatprep.subr.bf16.mxu1 %v6342_v27 }
 0xea7   :  { %5105 = vmatpush1.bf16.msra.mxu0 %v6345_v41  ;;  %5137 = vmatpush1.bf16.msra.mxu1 %v6349_v55 }
 0xea8   :  { %5107 = vmatprep.subr.bf16.mxu0 %v6354_v15  ;;  %5139 = vmatprep.subr.bf16.mxu1 %v6356_v13  ;;  %v3755_v15 = vld [vmem:[%s6785_s6] sm:$0xff]  ;;  %v3756_v13 = vld [vmem:[%s6785_s6 + $0x8] sm:$0xff]  ;;  %s5664_s6 = smov [#allocation12]  }
 0xea9   :  { %s3857_s7 = sshll.u32 %s5664_s6, 4  ;;  %s3858_s7 = int_to_ptr.vmem [resolvable:$true] %s3857_s7 }
 0xeaa   :  { %s5605_s26 = scalar_lea.vmem %s3858_s7, 256  ;;  %p5610_p3 = scmp.lt.s32.totalorder %s3858_s7, %s3858_s7 }
 0xeab   :  { %5109 = vmatpush1.bf16.msra.mxu0 %v6358_v22  ;;  %5141 = vmatpush1.bf16.msra.mxu1 %v6361_v42  ;;  %v5143_v22 = vpack.c.bf16 %v3756_v13, %v3755_v15  ;;  %v5662_v42 = vmov 0.0|0.0   ;;  %p5606_p2 = scmp.ne.s32.totalorder %s3858_s7, %s5605_s26  ;;  %p5611_p4 = scmp.lt.s32.totalorder %s5605_s26, %s5605_s26 }
 0xeac   :  { %5142 = vmatprep.subr.bf16.mxu0 %v5662_v42 }
 0xead   :  { %p5612_p5 = por %p5611_p4, %p5610_p3 }
 0xeaf   :  { %p5613_p6 = pnand %p5612_p5, %p5606_p2 }
 0xf61   :  { %v3463_v43 = vpop.f32.mrb[28].mxu0  ;;  %v3534_v2 = vpop.f32.mrb[28].mxu1 }
 0xf62   :  { %v5210_v6 = vadd.f32 %v3463_v43, %v6417_v29  ;;  %v3465_v31 = vpop.f32.mrb[29].mxu0  ;;  %v3536_v18 = vpop.f32.mrb[29].mxu1  ;;  %v5226_v30 = vadd.f32 %v3534_v2, %v6432_v36 }
 0xf63   :  { %v5211_v9 = vadd.f32 %v3465_v31, %v6421_v25  ;;  %v5227_v7 = vadd.f32 %v3536_v18, %v6427_v37 }
 0xf64   :  { %v3931_v54 = vmul.f32 -1.442695, %v5210_v6 }
 0xf65   :  { %v3932_v4 = vmul.f32 -1.442695, %v5211_v9  ;;  %v3933_v17 = vmul.f32 -1.442695, %v5227_v7 }
 0xf66   :  { %5529 = vpow2.f32 %v3931_v54 }
 0xf67   :  { %5531 = vpow2.f32 %v3932_v4 }
 0xf68   :  { %5533 = vpow2.f32 %v3933_v17 }
 0xf69   :  { %5535 = vtanh.f32 %v5226_v30 }
 0xf70   :  { %v5530_v45 = vpop.eup %5529 }
 0xf71   :  { %v5532_v49 = vpop.eup %5531  ;;  %v3546_v5 = vadd.f32 1.0, %v5530_v45 }
 0xf72   :  { %v3552_v23 = vadd.f32 1.0, %v5532_v49  ;;  %v5534_v52 = vpop.eup %5533 }
 0xf73   :  { %5537 = vrcp.f32 %v3546_v5  ;;  %v5536_v28 = vpop.eup %5535  ;;  %v3559_v48 = vadd.f32 1.0, %v5534_v52 }
 0xf74   :  { %5539 = vrcp.f32 %v3552_v23 }
 0xf75   :  { %5541 = vrcp.f32 %v3559_v48 }
 0xf7d   :  { %v5538_v39 = vpop.eup %5537 }
 0xf7e   :  { %v5540_v58 = vpop.eup %5539  ;;  %v3563_v12 = vmul.f32 %v5538_v39, %v5536_v28 }
 0xf7f   :  { %v3562_v0 = vmul.f32 %v5540_v58, %v6648_v8  ;;  %v5542_v27 = vpop.eup %5541 }
 0xf81   :  { %v6688_v11 = vadd.f32 %v3563_v12, %v3562_v0 }
 0xf83   :  { %5543 = vtanh.f32 %v6688_v11 }
 0xf8d   :  { %v5544_v41 = vpop.eup %5543 }
 0xf8e   :  { %v3566_v55 = vmul.f32 %v5544_v41, %v5542_v27 }
 0xf90   :  { %3636 = vmatmul.mubr.f32.vlgmr.msra.gmra.mrb[30].mxu0 %v3566_v55  ;;  %3707 = vmatmul.mubr.f32.vlgmr.msra.gmra.mrb[30].mxu1 %v3566_v55 }
 0xf91   :  { %5144 = vmatpush3.bf16.msra.mxu0 %v5143_v22  ;;  %3987 = vmatprep.mubr.msk.f32.mxu0 %vm5663_vm0, %v5661_v1 }
 0xf92   :  { %5145 = vmatprep.subr.bf16.mxu0 %v5662_v42 }
 0xf95   :  { %5147 = vmatpush3.bf16.msra.mxu0 %v5146_v26 }
 0xf96   :  { %5148 = vmatprep.subr.bf16.mxu0 %v5662_v42 }
 0xf99   :  { %5150 = vmatpush3.bf16.msra.mxu0 %v5149_v3 }
 0xf9a   :  { %5151 = vmatprep.subr.bf16.mxu0 %v5662_v42 }
 0xf9d   :  { %5153 = vmatpush3.bf16.msra.mxu0 %v5152_v51 }
 0xf9e   :  { %5154 = vmatprep.subr.bf16.mxu0 %v5662_v42 }
 0xfa1   :  { %5156 = vmatpush3.bf16.msra.mxu0 %v5155_v14 }
 0xfa2   :  { %5157 = vmatprep.subr.bf16.mxu0 %v5662_v42 }
 0xfa5   :  { %5159 = vmatpush3.bf16.msra.mxu0 %v5158_v33 }
 0xfa6   :  { %5160 = vmatprep.subr.bf16.mxu0 %v5662_v42 }
 0xfa9   :  { %5162 = vmatpush3.bf16.msra.mxu0 %v5161_v34 }
 0xfaa   :  { %5163 = vmatprep.subr.bf16.mxu0 %v5662_v42 }
 0xfad   :  { %5165 = vmatpush3.bf16.msra.mxu0 %v5164_v38 }
0x1063   :  { %v3637_v10 = vpop.f32.mrb[30].mxu0  ;;  %v3708_v40 = vpop.f32.mrb[30].mxu1 }
0x1064   :  { %v5212_v19 = vadd.f32 %v3637_v10, %v6417_v29  ;;  %v3639_v1 = vpop.f32.mrb[31].mxu0  ;;  %v3710_v44 = vpop.f32.mrb[31].mxu1  ;;  %v5228_v2 = vadd.f32 %v3708_v40, %v6432_v36 }
0x1065   :  { %v5213_v8 = vadd.f32 %v3639_v1, %v6421_v25  ;;  %v5229_v46 = vadd.f32 %v3710_v44, %v6427_v37 }
0x1066   :  { %v3934_v21 = vmul.f32 -1.442695, %v5212_v19 }
0x1067   :  { %v3935_v32 = vmul.f32 -1.442695, %v5213_v8  ;;  %v3936_v43 = vmul.f32 -1.442695, %v5229_v46 }
0x1068   :  { %5545 = vpow2.f32 %v3934_v21 }
0x1069   :  { %5547 = vpow2.f32 %v3935_v32 }
0x106a   :  { %5549 = vpow2.f32 %v3936_v43 }
0x106b   :  { %5551 = vtanh.f32 %v5228_v2 }
0x1072   :  { %v5546_v6 = vpop.eup %5545 }
0x1073   :  { %v5548_v31 = vpop.eup %5547  ;;  %v3720_v18 = vadd.f32 1.0, %v5546_v6 }
0x1074   :  { %v3726_v9 = vadd.f32 1.0, %v5548_v31  ;;  %v5550_v29 = vpop.eup %5549 }
0x1075   :  { %5553 = vrcp.f32 %v3720_v18  ;;  %v5552_v54 = vpop.eup %5551  ;;  %v3733_v17 = vadd.f32 1.0, %v5550_v29 }
0x1076   :  { %5555 = vrcp.f32 %v3726_v9 }
0x1077   :  { %5557 = vrcp.f32 %v3733_v17 }
0x107f   :  { %v5554_v25 = vpop.eup %5553 }
0x1080   :  { %v5556_v4 = vpop.eup %5555  ;;  %v3737_v7 = vmul.f32 %v5554_v25, %v5552_v54 }
0x1081   :  { %v3736_v30 = vmul.f32 %v5556_v4, %v6688_v11  ;;  %v5558_v36 = vpop.eup %5557 }
0x1083   :  { %v3738_v37 = vadd.f32 %v3737_v7, %v3736_v30 }
0x1085   :  { %3753 = vst [vmem:[#allocation13 + $0x8] sm:$0xff] %v3738_v37  ;;  %5559 = vtanh.f32 %v3738_v37 }
0x108f   :  { %v5560_v45 = vpop.eup %5559 }
0x1090   :  { %v3740_v49 = vmul.f32 %v5560_v45, %v5558_v36 }
0x1092   :  { %3988 = vmatmul.mubr.f32.vlgmr.msra.gmra.mrb[32].mxu0 %v3740_v49  ;;  %3749 = vst [vmem:[#allocation12 + $0x8] sm:$0xff] %v3740_v49 }
0x1093   :  { %5616 = shalt.err (!%p5613_p6)
}
0x1094   :  { %s5617_s29 = scalar_lea.hbm %s6788_s9, 256 }
0x1095   :  { %p5618_p7 = scmp.ne.s32.totalorder %s6788_s9, %s5617_s29  ;;  %p5621_p8 = scmp.lt.u32.totalorder %s5617_s29, %s6788_s9 }
0x1097   :  { %p5623_p9 = pnand %p5621_p8, %p5618_p7 }
0x1099   :  { %5626 = shalt.err (!%p5623_p9)
}
0x109a   :  { %s5666_s0 = smov 128   ;;  %s5667_s14 = smov 8  }
0x109b   :  { %3863 = dma.vmem_to_hbm [thread:$0]  %s3858_s7, 256, %s6788_s9, [#allocation9], %s5666_s0, %s5666_s0, %s5667_s14  }
0x109c   :  { %s5627_s18 = scalar_lea.vmem %s6745_s25, 256  ;;  %p5632_p11 = scmp.lt.s32.totalorder %s6745_s25, %s6745_s25 }
0x109d   :  { %p5628_p10 = scmp.ne.s32.totalorder %s6745_s25, %s5627_s18  ;;  %p5633_p12 = scmp.lt.s32.totalorder %s5627_s18, %s5627_s18 }
0x109f   :  { %p5634_p13 = por %p5633_p12, %p5632_p11 }
0x10a1   :  { %p5635_p0 = pnand %p5634_p13, %p5628_p10 }
0x10a3   :  { %5638 = shalt.err (!%p5635_p0)
}
0x10a4   :  { %s5639_s1 = scalar_lea.hbm %s6789_s10, 256 }
0x10a5   :  { %p5640_p1 = scmp.ne.s32.totalorder %s6789_s10, %s5639_s1  ;;  %p5643_p2 = scmp.lt.u32.totalorder %s5639_s1, %s6789_s10 }
0x10a7   :  { %p5645_p3 = pnand %p5643_p2, %p5640_p1 }
0x10a9   :  { %5648 = shalt.err (!%p5645_p3)
}
0x10aa   :  { %3875 = dma.vmem_to_hbm [thread:$0]  %s6745_s25, 256, %s6789_s10, [#allocation14], %s5666_s0, %s5666_s0, %s5667_s14   ;;  %v3937_v5 = vld [vmem:[#allocation6] ss:$0 sm:$0xff]  ;;  %vm3848_vm1 = vcmask 7168  }
0x1165   :  { %v3844_v23 = vpop.f32.mrb[32].mxu0 }
0x1166   :  { %v3845_v52 = vadd.f32 %v3937_v5, %v3844_v23  ;;  %v3989_v28 = vpop.f32.mrb[33].mxu0 }
0x1168   :  { %3849 = vst.msk [vmem:[%s6787_s8] sm:$0xff] %vm3848_vm1, %v3845_v52 }
0x1169   :  { %5653 = dma.done.wait [#allocation9], 256  }
0x116a   :  { %5654 = vsyncadd [#allocation9], 4294967040 }
0x116b   :  { %5655 = dma.done.wait [#allocation14], 256  }
0x116c   :  { %5656 = vsyncadd [#allocation14], 4294967040 }
0x116d   :  { %3884 = vsyncpa [#allocation8], 1 }
0x116e   :  { %3885 = vsyncpa [#allocation11], 1 }
0x116f   :  { %3886 = vsyncpa [#allocation9], 1 }
0x1170   :  { %3887 = vsyncpa [#allocation14], 1 }

</bundles_post_ra>
